<compile_context>
chip_gen: v7x
topology: tpu7x:2x2x1
jax: 0.10.0
libtpu: 0.0.40
codegen_flags: <defaults>
</compile_context>

<pallas_src>
import functools

import jax
import jax.numpy as jnp
from jax.experimental import pallas as pl
from jax.experimental.pallas import tpu as pltpu


# --------------------------------------------------------------------------
# tiling helpers
# --------------------------------------------------------------------------
def _cdiv(a, b):
    return -(-a // b)


def _round_up(x, m):
    return _cdiv(x, m) * m


def _choose_point_tile(n, k, feat_max, batch, target_bytes=4 * 1024 * 1024):
    """Points per tile (multiple of 8).  A (k, tp, feat_max) f32 block stays
    under target_bytes, and batch * n_tiles >= ~8 grid steps when possible
    (v7x 2-TensorCore sharding).  n is padded up to a multiple of tp."""
    cap = max(8, (target_bytes // (k * feat_max * 4)) // 8 * 8)
    min_tiles = _cdiv(8, max(1, batch))
    cap = min(cap, max(8, _round_up(_cdiv(n, min_tiles), 8)))
    tiles = _cdiv(n, cap)
    tp = _round_up(_cdiv(n, tiles), 8)
    return tp, tp * tiles


def _choose_row_tile(n_pad, n_cols, batch, target_bytes=2 * 1024 * 1024):
    """Query-row tile for the kNN kernel: multiple-of-8 divisor of n_pad whose
    (tm, n_cols) f32 score block stays under target_bytes."""
    cap = max(8, target_bytes // (n_cols * 4))
    min_tiles = _cdiv(8, max(1, batch))
    cap = min(cap, max(8, _round_up(_cdiv(n_pad, min_tiles), 8)))
    best = 8
    for t in range(8, n_pad + 1, 8):
        if n_pad % t == 0 and t <= cap:
            best = t
    return best


def _compiler_params():
    return pltpu.CompilerParams(
        dimension_semantics=("parallel", "parallel"),
        vmem_limit_bytes=48 * 1024 * 1024)


# --------------------------------------------------------------------------
# kernel 1: fused kNN metric + top-k index selection (no (B,N,N) HBM tensor)
# --------------------------------------------------------------------------
def _make_knn_kernel(k):
    def kernel(xq_ref, xc_ref, sqc_ref, idx_ref):
        xq = xq_ref[0]                                          # (TM, C)
        xc = xc_ref[0]                                          # (N,  C)
        # 2*<q,c> - ||c||^2 == -||q-c||^2 + const(row): identical top-k order
        # and identical ties as the reference metric.  dot_general contracts
        # the last axes directly (no transpose of the candidate block).
        score = 2.0 * jax.lax.dot_general(
            xq, xc, (((1,), (1,)), ((), ())),
            preferred_element_type=jnp.float32) - sqc_ref[0]    # (TM, N)
        tm, n = score.shape
        col = jax.lax.broadcasted_iota(jnp.int32, (tm, n), 1).astype(jnp.float32)
        lane = jax.lax.broadcasted_iota(jnp.int32, (tm, k), 1)
        big = jnp.float32(1e30)
        idx_out = jnp.zeros((tm, k), jnp.int32)
        for j in range(k):                                      # k is small
            m = jnp.max(score, axis=-1, keepdims=True)          # (TM, 1)
            best = jnp.min(jnp.where(score == m, col, big),     # first max idx
                           axis=-1, keepdims=True)              # (TM, 1) f32
            idx_out = jnp.where(lane == j, best.astype(jnp.int32), idx_out)
            score = jnp.where(col == best, -big, score)         # knock it out
        idx_ref[0] = idx_out
    return kernel


def knn_indices(xq, xc, sqc, k, tm):
    B, n_pad, C = xq.shape
    N = xc.shape[1]
    return pl.pallas_call(
        _make_knn_kernel(k),
        out_shape=jax.ShapeDtypeStruct((B, n_pad, k), jnp.int32),
        grid=(B, n_pad // tm),
        in_specs=[pl.BlockSpec((1, tm, C), lambda b, m: (b, m, 0)),
                  pl.BlockSpec((1, N, C), lambda b, m: (b, 0, 0)),
                  pl.BlockSpec((1, 1, N), lambda b, m: (b, 0, 0))],
        out_specs=pl.BlockSpec((1, tm, k), lambda b, m: (b, m, 0)),
        compiler_params=_compiler_params(),
    )(xq, xc, sqc)


# --------------------------------------------------------------------------
# kernel 2: layer-0 edge conv (nbr @ Wa + ctr @ (Wb-Wa)) + partial BN stats
# --------------------------------------------------------------------------
def _make_edge0_kernel(k, f0, tp, n_valid, need_mask):
    def kernel(nbr_ref, xq_ref, wa_ref, wd_ref, h_ref, sum_ref, sq_ref):
        ctr = jnp.dot(xq_ref[0], wd_ref[...],
                      preferred_element_type=jnp.float32)       # (TP, F0)
        acc_s = jnp.zeros((1, f0), jnp.float32)
        acc_q = jnp.zeros((1, f0), jnp.float32)
        if need_mask:
            pid = (pl.program_id(1) * tp
                   + jax.lax.broadcasted_iota(jnp.int32, (tp, 1), 0))
            valid = pid < n_valid
        for j in range(k):
            hj = jnp.dot(nbr_ref[0, j], wa_ref[...],
                         preferred_element_type=jnp.float32) + ctr
            if need_mask:
                hj = jnp.where(valid, hj, 0.0)                  # padded points
            acc_s = acc_s + jnp.sum(hj, axis=0, keepdims=True)
            acc_q = acc_q + jnp.sum(hj * hj, axis=0, keepdims=True)
            h_ref[0, j] = hj.astype(h_ref.dtype)                # bf16 store
        sum_ref[0, 0] = acc_s
        sq_ref[0, 0] = acc_q
    return kernel


def edge0(nbr, xq, wa, wd, k, tp, n_valid):
    B, _, n_pad, C = nbr.shape
    f0 = wa.shape[1]
    nt = n_pad // tp
    need_mask = n_pad != n_valid
    return pl.pallas_call(
        _make_edge0_kernel(k, f0, tp, n_valid, need_mask),
        out_shape=(jax.ShapeDtypeStruct((B, k, n_pad, f0), jnp.bfloat16),
                   jax.ShapeDtypeStruct((B, nt, 1, f0), jnp.float32),
                   jax.ShapeDtypeStruct((B, nt, 1, f0), jnp.float32)),
        grid=(B, nt),
        in_specs=[pl.BlockSpec((1, k, tp, C), lambda b, t: (b, 0, t, 0)),
                  pl.BlockSpec((1, tp, C), lambda b, t: (b, t, 0)),
                  pl.BlockSpec((C, f0), lambda b, t: (0, 0)),
                  pl.BlockSpec((C, f0), lambda b, t: (0, 0))],
        out_specs=(pl.BlockSpec((1, k, tp, f0), lambda b, t: (b, 0, t, 0)),
                   pl.BlockSpec((1, 1, 1, f0), lambda b, t: (b, t, 0, 0)),
                   pl.BlockSpec((1, 1, 1, f0), lambda b, t: (b, t, 0, 0))),
        compiler_params=_compiler_params(),
    )(nbr, xq, wa, wd)


# --------------------------------------------------------------------------
# kernel 3: BN affine + LeakyReLU + next 1x1 conv + next-layer partial stats
# --------------------------------------------------------------------------
def _make_layer_kernel(k, fout, neg_slope, tp, n_valid, need_mask):
    def kernel(h_ref, scale_ref, shift_ref, w_ref, out_ref, sum_ref, sq_ref):
        scale = scale_ref[...]
        shift = shift_ref[...]
        acc_s = jnp.zeros((1, fout), jnp.float32)
        acc_q = jnp.zeros((1, fout), jnp.float32)
        if need_mask:
            pid = (pl.program_id(1) * tp
                   + jax.lax.broadcasted_iota(jnp.int32, (tp, 1), 0))
            valid = pid < n_valid
        for j in range(k):
            hj = h_ref[0, j].astype(jnp.float32)                # (TP, Fin)
            a = hj * scale + shift                              # folded BN
            a = jnp.where(a >= 0, a, neg_slope * a)             # LeakyReLU
            oj = jnp.dot(a.astype(jnp.bfloat16), w_ref[...],    # bf16 MXU
                         preferred_element_type=jnp.float32)    # (TP, Fout)
            if need_mask:
                oj = jnp.where(valid, oj, 0.0)
            acc_s = acc_s + jnp.sum(oj, axis=0, keepdims=True)
            acc_q = acc_q + jnp.sum(oj * oj, axis=0, keepdims=True)
            out_ref[0, j] = oj.astype(out_ref.dtype)            # bf16 store
        sum_ref[0, 0] = acc_s
        sq_ref[0, 0] = acc_q
    return kernel


def layer_step(h, scale, shift, w_bf16, k, tp, n_valid, neg_slope):
    B, _, n_pad, fin = h.shape
    fout = w_bf16.shape[1]
    nt = n_pad // tp
    need_mask = n_pad != n_valid
    return pl.pallas_call(
        _make_layer_kernel(k, fout, neg_slope, tp, n_valid, need_mask),
        out_shape=(jax.ShapeDtypeStruct((B, k, n_pad, fout), jnp.bfloat16),
                   jax.ShapeDtypeStruct((B, nt, 1, fout), jnp.float32),
                   jax.ShapeDtypeStruct((B, nt, 1, fout), jnp.float32)),
        grid=(B, nt),
        in_specs=[pl.BlockSpec((1, k, tp, fin), lambda b, t: (b, 0, t, 0)),
                  pl.BlockSpec((1, fin), lambda b, t: (0, 0)),
                  pl.BlockSpec((1, fin), lambda b, t: (0, 0)),
                  pl.BlockSpec((fin, fout), lambda b, t: (0, 0))],
        out_specs=(pl.BlockSpec((1, k, tp, fout), lambda b, t: (b, 0, t, 0)),
                   pl.BlockSpec((1, 1, 1, fout), lambda b, t: (b, t, 0, 0)),
                   pl.BlockSpec((1, 1, 1, fout), lambda b, t: (b, t, 0, 0))),
        compiler_params=_compiler_params(),
    )(h, scale, shift, w_bf16)


# --------------------------------------------------------------------------
# kernel 4: last layer BN affine + LeakyReLU + max over the k neighbors
# --------------------------------------------------------------------------
def _make_final_kernel(k, neg_slope):
    def kernel(h_ref, scale_ref, shift_ref, out_ref):
        scale = scale_ref[...]
        shift = shift_ref[...]
        m = None
        for j in range(k):                                      # unrolled max
            a = h_ref[0, j].astype(jnp.float32) * scale + shift
            a = jnp.where(a >= 0, a, neg_slope * a)
            m = a if m is None else jnp.maximum(m, a)
        out_ref[0] = m
    return kernel


def final_reduce(h, scale, shift, k, tp, neg_slope):
    B, _, n_pad, f = h.shape
    nt = n_pad // tp
    return pl.pallas_call(
        _make_final_kernel(k, neg_slope),
        out_shape=jax.ShapeDtypeStruct((B, n_pad, f), jnp.float32),
        grid=(B, nt),
        in_specs=[pl.BlockSpec((1, k, tp, f), lambda b, t: (b, 0, t, 0)),
                  pl.BlockSpec((1, f), lambda b, t: (0, 0)),
                  pl.BlockSpec((1, f), lambda b, t: (0, 0))],
        out_specs=pl.BlockSpec((1, tp, f), lambda b, t: (b, t, 0)),
        compiler_params=_compiler_params(),
    )(h, scale, shift)


# --------------------------------------------------------------------------
# glue: fold global (training-mode) BN stats into a per-channel scale/shift
# --------------------------------------------------------------------------
def _bn_scale_shift(s, ss, gamma, beta, count, eps):
    tot_s = jnp.sum(s, axis=(0, 1, 2))                          # (F,)
    tot_ss = jnp.sum(ss, axis=(0, 1, 2))                        # (F,)
    mean = tot_s / count
    var = jnp.maximum(tot_ss / count - mean * mean, 0.0)        # biased var
    inv = jax.lax.rsqrt(var + eps)
    scale = gamma * inv[None, :]                                # (1, F)
    shift = beta - mean[None, :] * scale                        # (1, F)
    return scale, shift


# --------------------------------------------------------------------------
# full forward pass
# --------------------------------------------------------------------------
def multi_edge_convolution(x, params, k, neg_slope=0.2, eps=1e-5):
    """x: (B, C, N) float32 -> (B, mlp[-1], N) float32."""
    weights, gammas, betas = params
    B, C, N = x.shape
    num_layers = len(weights)
    feat_max = max(w.shape[1] for w in weights)
    xt = jnp.transpose(x, (0, 2, 1)).astype(jnp.float32)        # (B, N, C)

    tp, n_pad = _choose_point_tile(N, k, feat_max, B)           # padded points
    tm = _choose_row_tile(n_pad, N, B)

    # Queries are padded (with zero rows) so every block is bounded; the
    # CANDIDATE side stays unpadded, so padded rows can never be selected.
    xq = jnp.pad(xt, ((0, 0), (0, n_pad - N), (0, 0))) if n_pad != N else xt
    sqc = jnp.sum(xt * xt, axis=-1)[:, None, :]                 # (B, 1, N)

    # ---- fused kNN metric + top-k: only (B, N, k) int32 touches HBM --------
    idx = knn_indices(xq, xt, sqc, k, tm)                       # (B, n_pad, k)

    # ---- neighbor gather in NARROW C-space (not F0-space) ------------------
    # TODO(synk): fold this data-dependent row gather into the edge0 kernel
    # (vectorized in-kernel gather); kept in XLA glue for robustness.
    idx_t = jnp.transpose(idx, (0, 2, 1))                       # (B, k, n_pad)
    nbr = jax.vmap(lambda feats, ids: feats[ids])(xt, idx_t)    # (B,k,n_pad,C)

    # ---- layer 0 algebraic rewrite + fused add / conv / partial BN stats ---
    w0 = weights[0]                                             # (2C, F0)
    wa = w0[:C]
    wd = w0[C:] - w0[:C]
    h, s, ss = edge0(nbr, xq, wa, wd, k, tp, N)                 # (B,k,n_pad,F0)

    # ---- per-layer exact two-pass BN + LeakyReLU (+ next conv / final max) -
    count = B * N * k                                           # real rows only
    out = None
    for i in range(num_layers):
        scale, shift = _bn_scale_shift(s, ss, gammas[i], betas[i], count, eps)
        if i + 1 < num_layers:
            w_next = weights[i + 1].astype(jnp.bfloat16)        # pre-cast once
            h, s, ss = layer_step(h, scale, shift, w_next, k, tp, N, neg_slope)
        else:
            out = final_reduce(h, scale, shift, k, tp, neg_slope)
    if n_pad != N:
        out = out[:, :N]
    return jnp.transpose(out, (0, 2, 1))                        # (B, F_last, N)


def init_params(key, in_features, mlp):
    """Conv weights stored as (Cin, Cout) (== PyTorch Conv2d (Cout, Cin, 1, 1)
    squeezed + transposed). BN gamma=1, beta=0 (PyTorch default init)."""
    weights, gammas, betas = [], [], []
    cin = in_features * 2
    for cout in mlp:
        key, sub = jax.random.split(key)
        w = 0.1 * jax.random.normal(sub, (cin, cout), dtype=jnp.float32)
        weights.append(w)
        gammas.append(jnp.ones((1, cout), dtype=jnp.float32))
        betas.append(jnp.zeros((1, cout), dtype=jnp.float32))
        cin = cout
    return weights, gammas, betas


if __name__ == "__main__":
    # Small shapes: batch=2, in_features=4, num_points=16, k=8, mlp=(32, 64)
    B, C, N = 2, 4, 16
    K_NEIGHBORS = 8
    MLP = (32, 64)

    key = jax.random.PRNGKey(0)
    key, xkey = jax.random.split(key)
    x = jax.random.normal(xkey, (B, C, N), dtype=jnp.float32)
    params = init_params(key, C, MLP)

    fwd = jax.jit(functools.partial(multi_edge_convolution, k=K_NEIGHBORS))
    y = fwd(x, params)
    jax.block_until_ready(y)

    assert y.shape == (B, MLP[-1], N), y.shape
    assert jnp.all(jnp.isfinite(y))
    print("KERNEL_OK")
</pallas_src>

<mosaic_0001>
module attributes {stable_mosaic.version = 11 : i64} {
  func.func @kernel(%arg0: i32, %arg1: i32, %arg2: memref<1x8x4xf32, #tpu.memory_space<vmem>>, %arg3: memref<1x16x4xf32, #tpu.memory_space<vmem>>, %arg4: memref<1x1x16xf32, #tpu.memory_space<vmem>>, %arg5: memref<1x8x8xi32, #tpu.memory_space<vmem>>) attributes {dimension_semantics = [#tpu.dimension_semantics<parallel>, #tpu.dimension_semantics<parallel>], iteration_bounds = array<i64: 2, 2>, scalar_prefetch = 0 : i64, scratch_operands = 0 : i64, tpu.core_type = #tpu.core_type<tc>, window_params = [{transform_indices = @transform_0, window_bounds = array<i64: 1, 8, 4>}, {transform_indices = @transform_1, window_bounds = array<i64: 1, 16, 4>}, {transform_indices = @transform_2, window_bounds = array<i64: 1, 1, 16>}, {transform_indices = @transform_3, window_bounds = array<i64: 1, 8, 8>}]} {
    %c0 = arith.constant 0 : index
    %c0_0 = arith.constant 0 : index
    %c0_1 = arith.constant 0 : index
    %0 = vector.load %arg2[%c0, %c0_0, %c0_1] : memref<1x8x4xf32, #tpu.memory_space<vmem>>, vector<1x8x4xf32>
    %1 = vector.shape_cast %0 : vector<1x8x4xf32> to vector<8x4xf32>
    %c0_2 = arith.constant 0 : index
    %c0_3 = arith.constant 0 : index
    %c0_4 = arith.constant 0 : index
    %2 = vector.load %arg3[%c0_2, %c0_3, %c0_4] : memref<1x16x4xf32, #tpu.memory_space<vmem>>, vector<1x16x4xf32>
    %3 = vector.shape_cast %2 : vector<1x16x4xf32> to vector<16x4xf32>
    %cst = arith.constant dense<0.000000e+00> : vector<8x16xf32>
    %4 = tpu.matmul %1, %3, %cst {dimension_numbers = #tpu.dot_dimension_numbers<[1], [1], [0], [0], [0, 0, 1, 0], [], []>} : vector<8x4xf32>, vector<16x4xf32>, vector<8x16xf32> -> vector<8x16xf32>
    %cst_5 = arith.constant 2.000000e+00 : f32
    %5 = vector.broadcast %cst_5 : f32 to vector<8x16xf32>
    %6 = arith.mulf %5, %4 : vector<8x16xf32>
    %c0_6 = arith.constant 0 : index
    %c0_7 = arith.constant 0 : index
    %c0_8 = arith.constant 0 : index
    %7 = vector.load %arg4[%c0_6, %c0_7, %c0_8] : memref<1x1x16xf32, #tpu.memory_space<vmem>>, vector<1x1x16xf32>
    %8 = vector.shape_cast %7 : vector<1x1x16xf32> to vector<1x16xf32>
    %9 = vector.broadcast %8 : vector<1x16xf32> to vector<8x16xf32>
    %10 = arith.subf %6, %9 : vector<8x16xf32>
    %11 = tpu.iota {dimensions = array<i32: 1>} : vector<8x16xi32>
    %12 = arith.sitofp %11 : vector<8x16xi32> to vector<8x16xf32>
    %13 = tpu.iota {dimensions = array<i32: 1>} : vector<8x8xi32>
    %c0_i32 = arith.constant 0 : i32
    %14 = vector.broadcast %c0_i32 : i32 to vector<8x8xi32>
    %cst_9 = arith.constant dense<0xFF800000> : vector<8xf32>
    %15 = vector.multi_reduction <maximumf>, %10, %cst_9 [1] : vector<8x16xf32> to vector<8xf32>
    %16 = vector.shape_cast %15 : vector<8xf32> to vector<8x1xf32>
    %17 = vector.broadcast %16 : vector<8x1xf32> to vector<8x16xf32>
    %18 = arith.cmpf oeq, %10, %17 : vector<8x16xf32>
    %cst_10 = arith.constant 1.000000e+30 : f32
    %19 = vector.broadcast %cst_10 : f32 to vector<8x16xf32>
    %20 = arith.select %18, %12, %19 : vector<8x16xi1>, vector<8x16xf32>
    %cst_11 = arith.constant dense<0x7F800000> : vector<8xf32>
    %21 = vector.multi_reduction <minimumf>, %20, %cst_11 [1] : vector<8x16xf32> to vector<8xf32>
    %22 = vector.shape_cast %21 : vector<8xf32> to vector<8x1xf32>
    %c0_i32_12 = arith.constant 0 : i32
    %23 = vector.broadcast %c0_i32_12 : i32 to vector<8x8xi32>
    %24 = arith.cmpi eq, %13, %23 : vector<8x8xi32>
    %25 = arith.fptosi %22 : vector<8x1xf32> to vector<8x1xi32>
    %26 = vector.shape_cast %25 : vector<8x1xi32> to vector<8x1xi32>
    %27 = vector.broadcast %26 : vector<8x1xi32> to vector<8x8xi32>
    %28 = arith.select %24, %27, %14 : vector<8x8xi1>, vector<8x8xi32>
    %29 = vector.broadcast %22 : vector<8x1xf32> to vector<8x16xf32>
    %30 = arith.cmpf oeq, %12, %29 : vector<8x16xf32>
    %cst_13 = arith.constant 0.000000e+00 : f32
    %cst_14 = arith.constant 1.000000e+30 : f32
    %31 = arith.subf %cst_13, %cst_14 : f32
    %32 = vector.broadcast %31 : f32 to vector<8x16xf32>
    %33 = arith.select %30, %32, %10 : vector<8x16xi1>, vector<8x16xf32>
    %cst_15 = arith.constant dense<0xFF800000> : vector<8xf32>
    %34 = vector.multi_reduction <maximumf>, %33, %cst_15 [1] : vector<8x16xf32> to vector<8xf32>
    %35 = vector.shape_cast %34 : vector<8xf32> to vector<8x1xf32>
    %36 = vector.broadcast %35 : vector<8x1xf32> to vector<8x16xf32>
    %37 = arith.cmpf oeq, %33, %36 : vector<8x16xf32>
    %cst_16 = arith.constant 1.000000e+30 : f32
    %38 = vector.broadcast %cst_16 : f32 to vector<8x16xf32>
    %39 = arith.select %37, %12, %38 : vector<8x16xi1>, vector<8x16xf32>
    %cst_17 = arith.constant dense<0x7F800000> : vector<8xf32>
    %40 = vector.multi_reduction <minimumf>, %39, %cst_17 [1] : vector<8x16xf32> to vector<8xf32>
    %41 = vector.shape_cast %40 : vector<8xf32> to vector<8x1xf32>
    %c1_i32 = arith.constant 1 : i32
    %42 = vector.broadcast %c1_i32 : i32 to vector<8x8xi32>
    %43 = arith.cmpi eq, %13, %42 : vector<8x8xi32>
    %44 = arith.fptosi %41 : vector<8x1xf32> to vector<8x1xi32>
    %45 = vector.shape_cast %44 : vector<8x1xi32> to vector<8x1xi32>
    %46 = vector.broadcast %45 : vector<8x1xi32> to vector<8x8xi32>
    %47 = arith.select %43, %46, %28 : vector<8x8xi1>, vector<8x8xi32>
    %48 = vector.broadcast %41 : vector<8x1xf32> to vector<8x16xf32>
    %49 = arith.cmpf oeq, %12, %48 : vector<8x16xf32>
    %cst_18 = arith.constant 0.000000e+00 : f32
    %cst_19 = arith.constant 1.000000e+30 : f32
    %50 = arith.subf %cst_18, %cst_19 : f32
    %51 = vector.broadcast %50 : f32 to vector<8x16xf32>
    %52 = arith.select %49, %51, %33 : vector<8x16xi1>, vector<8x16xf32>
    %cst_20 = arith.constant dense<0xFF800000> : vector<8xf32>
    %53 = vector.multi_reduction <maximumf>, %52, %cst_20 [1] : vector<8x16xf32> to vector<8xf32>
    %54 = vector.shape_cast %53 : vector<8xf32> to vector<8x1xf32>
    %55 = vector.broadcast %54 : vector<8x1xf32> to vector<8x16xf32>
    %56 = arith.cmpf oeq, %52, %55 : vector<8x16xf32>
    %cst_21 = arith.constant 1.000000e+30 : f32
    %57 = vector.broadcast %cst_21 : f32 to vector<8x16xf32>
    %58 = arith.select %56, %12, %57 : vector<8x16xi1>, vector<8x16xf32>
    %cst_22 = arith.constant dense<0x7F800000> : vector<8xf32>
    %59 = vector.multi_reduction <minimumf>, %58, %cst_22 [1] : vector<8x16xf32> to vector<8xf32>
    %60 = vector.shape_cast %59 : vector<8xf32> to vector<8x1xf32>
    %c2_i32 = arith.constant 2 : i32
    %61 = vector.broadcast %c2_i32 : i32 to vector<8x8xi32>
    %62 = arith.cmpi eq, %13, %61 : vector<8x8xi32>
    %63 = arith.fptosi %60 : vector<8x1xf32> to vector<8x1xi32>
    %64 = vector.shape_cast %63 : vector<8x1xi32> to vector<8x1xi32>
    %65 = vector.broadcast %64 : vector<8x1xi32> to vector<8x8xi32>
    %66 = arith.select %62, %65, %47 : vector<8x8xi1>, vector<8x8xi32>
    %67 = vector.broadcast %60 : vector<8x1xf32> to vector<8x16xf32>
    %68 = arith.cmpf oeq, %12, %67 : vector<8x16xf32>
    %cst_23 = arith.constant 0.000000e+00 : f32
    %cst_24 = arith.constant 1.000000e+30 : f32
    %69 = arith.subf %cst_23, %cst_24 : f32
    %70 = vector.broadcast %69 : f32 to vector<8x16xf32>
    %71 = arith.select %68, %70, %52 : vector<8x16xi1>, vector<8x16xf32>
    %cst_25 = arith.constant dense<0xFF800000> : vector<8xf32>
    %72 = vector.multi_reduction <maximumf>, %71, %cst_25 [1] : vector<8x16xf32> to vector<8xf32>
    %73 = vector.shape_cast %72 : vector<8xf32> to vector<8x1xf32>
    %74 = vector.broadcast %73 : vector<8x1xf32> to vector<8x16xf32>
    %75 = arith.cmpf oeq, %71, %74 : vector<8x16xf32>
    %cst_26 = arith.constant 1.000000e+30 : f32
    %76 = vector.broadcast %cst_26 : f32 to vector<8x16xf32>
    %77 = arith.select %75, %12, %76 : vector<8x16xi1>, vector<8x16xf32>
    %cst_27 = arith.constant dense<0x7F800000> : vector<8xf32>
    %78 = vector.multi_reduction <minimumf>, %77, %cst_27 [1] : vector<8x16xf32> to vector<8xf32>
    %79 = vector.shape_cast %78 : vector<8xf32> to vector<8x1xf32>
    %c3_i32 = arith.constant 3 : i32
    %80 = vector.broadcast %c3_i32 : i32 to vector<8x8xi32>
    %81 = arith.cmpi eq, %13, %80 : vector<8x8xi32>
    %82 = arith.fptosi %79 : vector<8x1xf32> to vector<8x1xi32>
    %83 = vector.shape_cast %82 : vector<8x1xi32> to vector<8x1xi32>
    %84 = vector.broadcast %83 : vector<8x1xi32> to vector<8x8xi32>
    %85 = arith.select %81, %84, %66 : vector<8x8xi1>, vector<8x8xi32>
    %86 = vector.broadcast %79 : vector<8x1xf32> to vector<8x16xf32>
    %87 = arith.cmpf oeq, %12, %86 : vector<8x16xf32>
    %cst_28 = arith.constant 0.000000e+00 : f32
    %cst_29 = arith.constant 1.000000e+30 : f32
    %88 = arith.subf %cst_28, %cst_29 : f32
    %89 = vector.broadcast %88 : f32 to vector<8x16xf32>
    %90 = arith.select %87, %89, %71 : vector<8x16xi1>, vector<8x16xf32>
    %cst_30 = arith.constant dense<0xFF800000> : vector<8xf32>
    %91 = vector.multi_reduction <maximumf>, %90, %cst_30 [1] : vector<8x16xf32> to vector<8xf32>
    %92 = vector.shape_cast %91 : vector<8xf32> to vector<8x1xf32>
    %93 = vector.broadcast %92 : vector<8x1xf32> to vector<8x16xf32>
    %94 = arith.cmpf oeq, %90, %93 : vector<8x16xf32>
    %cst_31 = arith.constant 1.000000e+30 : f32
    %95 = vector.broadcast %cst_31 : f32 to vector<8x16xf32>
    %96 = arith.select %94, %12, %95 : vector<8x16xi1>, vector<8x16xf32>
    %cst_32 = arith.constant dense<0x7F800000> : vector<8xf32>
    %97 = vector.multi_reduction <minimumf>, %96, %cst_32 [1] : vector<8x16xf32> to vector<8xf32>
    %98 = vector.shape_cast %97 : vector<8xf32> to vector<8x1xf32>
    %c4_i32 = arith.constant 4 : i32
    %99 = vector.broadcast %c4_i32 : i32 to vector<8x8xi32>
    %100 = arith.cmpi eq, %13, %99 : vector<8x8xi32>
    %101 = arith.fptosi %98 : vector<8x1xf32> to vector<8x1xi32>
    %102 = vector.shape_cast %101 : vector<8x1xi32> to vector<8x1xi32>
    %103 = vector.broadcast %102 : vector<8x1xi32> to vector<8x8xi32>
    %104 = arith.select %100, %103, %85 : vector<8x8xi1>, vector<8x8xi32>
    %105 = vector.broadcast %98 : vector<8x1xf32> to vector<8x16xf32>
    %106 = arith.cmpf oeq, %12, %105 : vector<8x16xf32>
    %cst_33 = arith.constant 0.000000e+00 : f32
    %cst_34 = arith.constant 1.000000e+30 : f32
    %107 = arith.subf %cst_33, %cst_34 : f32
    %108 = vector.broadcast %107 : f32 to vector<8x16xf32>
    %109 = arith.select %106, %108, %90 : vector<8x16xi1>, vector<8x16xf32>
    %cst_35 = arith.constant dense<0xFF800000> : vector<8xf32>
    %110 = vector.multi_reduction <maximumf>, %109, %cst_35 [1] : vector<8x16xf32> to vector<8xf32>
    %111 = vector.shape_cast %110 : vector<8xf32> to vector<8x1xf32>
    %112 = vector.broadcast %111 : vector<8x1xf32> to vector<8x16xf32>
    %113 = arith.cmpf oeq, %109, %112 : vector<8x16xf32>
    %cst_36 = arith.constant 1.000000e+30 : f32
    %114 = vector.broadcast %cst_36 : f32 to vector<8x16xf32>
    %115 = arith.select %113, %12, %114 : vector<8x16xi1>, vector<8x16xf32>
    %cst_37 = arith.constant dense<0x7F800000> : vector<8xf32>
    %116 = vector.multi_reduction <minimumf>, %115, %cst_37 [1] : vector<8x16xf32> to vector<8xf32>
    %117 = vector.shape_cast %116 : vector<8xf32> to vector<8x1xf32>
    %c5_i32 = arith.constant 5 : i32
    %118 = vector.broadcast %c5_i32 : i32 to vector<8x8xi32>
    %119 = arith.cmpi eq, %13, %118 : vector<8x8xi32>
    %120 = arith.fptosi %117 : vector<8x1xf32> to vector<8x1xi32>
    %121 = vector.shape_cast %120 : vector<8x1xi32> to vector<8x1xi32>
    %122 = vector.broadcast %121 : vector<8x1xi32> to vector<8x8xi32>
    %123 = arith.select %119, %122, %104 : vector<8x8xi1>, vector<8x8xi32>
    %124 = vector.broadcast %117 : vector<8x1xf32> to vector<8x16xf32>
    %125 = arith.cmpf oeq, %12, %124 : vector<8x16xf32>
    %cst_38 = arith.constant 0.000000e+00 : f32
    %cst_39 = arith.constant 1.000000e+30 : f32
    %126 = arith.subf %cst_38, %cst_39 : f32
    %127 = vector.broadcast %126 : f32 to vector<8x16xf32>
    %128 = arith.select %125, %127, %109 : vector<8x16xi1>, vector<8x16xf32>
    %cst_40 = arith.constant dense<0xFF800000> : vector<8xf32>
    %129 = vector.multi_reduction <maximumf>, %128, %cst_40 [1] : vector<8x16xf32> to vector<8xf32>
    %130 = vector.shape_cast %129 : vector<8xf32> to vector<8x1xf32>
    %131 = vector.broadcast %130 : vector<8x1xf32> to vector<8x16xf32>
    %132 = arith.cmpf oeq, %128, %131 : vector<8x16xf32>
    %cst_41 = arith.constant 1.000000e+30 : f32
    %133 = vector.broadcast %cst_41 : f32 to vector<8x16xf32>
    %134 = arith.select %132, %12, %133 : vector<8x16xi1>, vector<8x16xf32>
    %cst_42 = arith.constant dense<0x7F800000> : vector<8xf32>
    %135 = vector.multi_reduction <minimumf>, %134, %cst_42 [1] : vector<8x16xf32> to vector<8xf32>
    %136 = vector.shape_cast %135 : vector<8xf32> to vector<8x1xf32>
    %c6_i32 = arith.constant 6 : i32
    %137 = vector.broadcast %c6_i32 : i32 to vector<8x8xi32>
    %138 = arith.cmpi eq, %13, %137 : vector<8x8xi32>
    %139 = arith.fptosi %136 : vector<8x1xf32> to vector<8x1xi32>
    %140 = vector.shape_cast %139 : vector<8x1xi32> to vector<8x1xi32>
    %141 = vector.broadcast %140 : vector<8x1xi32> to vector<8x8xi32>
    %142 = arith.select %138, %141, %123 : vector<8x8xi1>, vector<8x8xi32>
    %143 = vector.broadcast %136 : vector<8x1xf32> to vector<8x16xf32>
    %144 = arith.cmpf oeq, %12, %143 : vector<8x16xf32>
    %cst_43 = arith.constant 0.000000e+00 : f32
    %cst_44 = arith.constant 1.000000e+30 : f32
    %145 = arith.subf %cst_43, %cst_44 : f32
    %146 = vector.broadcast %145 : f32 to vector<8x16xf32>
    %147 = arith.select %144, %146, %128 : vector<8x16xi1>, vector<8x16xf32>
    %cst_45 = arith.constant dense<0xFF800000> : vector<8xf32>
    %148 = vector.multi_reduction <maximumf>, %147, %cst_45 [1] : vector<8x16xf32> to vector<8xf32>
    %149 = vector.shape_cast %148 : vector<8xf32> to vector<8x1xf32>
    %150 = vector.broadcast %149 : vector<8x1xf32> to vector<8x16xf32>
    %151 = arith.cmpf oeq, %147, %150 : vector<8x16xf32>
    %cst_46 = arith.constant 1.000000e+30 : f32
    %152 = vector.broadcast %cst_46 : f32 to vector<8x16xf32>
    %153 = arith.select %151, %12, %152 : vector<8x16xi1>, vector<8x16xf32>
    %cst_47 = arith.constant dense<0x7F800000> : vector<8xf32>
    %154 = vector.multi_reduction <minimumf>, %153, %cst_47 [1] : vector<8x16xf32> to vector<8xf32>
    %155 = vector.shape_cast %154 : vector<8xf32> to vector<8x1xf32>
    %c7_i32 = arith.constant 7 : i32
    %156 = vector.broadcast %c7_i32 : i32 to vector<8x8xi32>
    %157 = arith.cmpi eq, %13, %156 : vector<8x8xi32>
    %158 = arith.fptosi %155 : vector<8x1xf32> to vector<8x1xi32>
    %159 = vector.shape_cast %158 : vector<8x1xi32> to vector<8x1xi32>
    %160 = vector.broadcast %159 : vector<8x1xi32> to vector<8x8xi32>
    %161 = arith.select %157, %160, %142 : vector<8x8xi1>, vector<8x8xi32>
    %c0_48 = arith.constant 0 : index
    %c0_49 = arith.constant 0 : index
    %c0_50 = arith.constant 0 : index
    %162 = vector.load %arg5[%c0_48, %c0_49, %c0_50] : memref<1x8x8xi32, #tpu.memory_space<vmem>>, vector<1x8x8xi32>
    %163 = vector.shape_cast %162 : vector<1x8x8xi32> to vector<8x8xi32>
    %164 = vector.shape_cast %161 : vector<8x8xi32> to vector<1x8x8xi32>
    tpu.vector_store %arg5[%c0_48, %c0_49, %c0_50], %164 {strides = array<i32>} : memref<1x8x8xi32, #tpu.memory_space<vmem>>, vector<1x8x8xi32>,
    return
  }
  func.func @transform_0(%arg0: i32, %arg1: i32) -> (i32, i32, i32) {
    %c0_i32 = arith.constant 0 : i32
    %c0_i32_0 = arith.constant 0 : i32
    return %arg0, %arg1, %c0_i32 : i32, i32, i32
  }
  func.func @transform_1(%arg0: i32, %arg1: i32) -> (i32, i32, i32) {
    %c0_i32 = arith.constant 0 : i32
    %c0_i32_0 = arith.constant 0 : i32
    %c0_i32_1 = arith.constant 0 : i32
    return %arg0, %c0_i32, %c0_i32_0 : i32, i32, i32
  }
  func.func @transform_2(%arg0: i32, %arg1: i32) -> (i32, i32, i32) {
    %c0_i32 = arith.constant 0 : i32
    %c0_i32_0 = arith.constant 0 : i32
    %c0_i32_1 = arith.constant 0 : i32
    return %arg0, %c0_i32, %c0_i32_0 : i32, i32, i32
  }
  func.func @transform_3(%arg0: i32, %arg1: i32) -> (i32, i32, i32) {
    %c0_i32 = arith.constant 0 : i32
    %c0_i32_0 = arith.constant 0 : i32
    return %arg0, %arg1, %c0_i32 : i32, i32, i32
  }
}

module attributes {stable_mosaic.version = 11 : i64} {
  func.func @kernel(%arg0: i32, %arg1: i32, %arg2: memref<1x8x8x4xf32, #tpu.memory_space<vmem>>, %arg3: memref<1x8x4xf32, #tpu.memory_space<vmem>>, %arg4: memref<4x32xf32, #tpu.memory_space<vmem>>, %arg5: memref<4x32xf32, #tpu.memory_space<vmem>>, %arg6: memref<1x8x8x32xbf16, #tpu.memory_space<vmem>>, %arg7: memref<1x1x1x32xf32, #tpu.memory_space<vmem>>, %arg8: memref<1x1x1x32xf32, #tpu.memory_space<vmem>>) attributes {dimension_semantics = [#tpu.dimension_semantics<parallel>, #tpu.dimension_semantics<parallel>], iteration_bounds = array<i64: 2, 2>, scalar_prefetch = 0 : i64, scratch_operands = 0 : i64, tpu.core_type = #tpu.core_type<tc>, window_params = [{transform_indices = @transform_0, window_bounds = array<i64: 1, 8, 8, 4>}, {transform_indices = @transform_1, window_bounds = array<i64: 1, 8, 4>}, {pipeline_mode = #tpu.pipeline_mode<synchronous>, transform_indices = @transform_2, window_bounds = array<i64: 4, 32>}, {pipeline_mode = #tpu.pipeline_mode<synchronous>, transform_indices = @transform_3, window_bounds = array<i64: 4, 32>}, {transform_indices = @transform_4, window_bounds = array<i64: 1, 8, 8, 32>}, {transform_indices = @transform_5, window_bounds = array<i64: 1, 1, 1, 32>}, {transform_indices = @transform_6, window_bounds = array<i64: 1, 1, 1, 32>}]} {
    %c0 = arith.constant 0 : index
    %c0_0 = arith.constant 0 : index
    %c0_1 = arith.constant 0 : index
    %0 = vector.load %arg3[%c0, %c0_0, %c0_1] : memref<1x8x4xf32, #tpu.memory_space<vmem>>, vector<1x8x4xf32>
    %1 = vector.shape_cast %0 : vector<1x8x4xf32> to vector<8x4xf32>
    %c0_2 = arith.constant 0 : index
    %c0_3 = arith.constant 0 : index
    %2 = vector.load %arg5[%c0_2, %c0_3] : memref<4x32xf32, #tpu.memory_space<vmem>>, vector<4x32xf32>
    %cst = arith.constant dense<0.000000e+00> : vector<8x32xf32>
    %3 = tpu.matmul %1, %2, %cst {dimension_numbers = #tpu.dot_dimension_numbers<[1], [0], [0], [1], [0, 0, 1, 1], [], []>} : vector<8x4xf32>, vector<4x32xf32>, vector<8x32xf32> -> vector<8x32xf32>
    %cst_4 = arith.constant 0.000000e+00 : f32
    %4 = vector.broadcast %cst_4 : f32 to vector<1x32xf32>
    %cst_5 = arith.constant 0.000000e+00 : f32
    %5 = vector.broadcast %cst_5 : f32 to vector<1x32xf32>
    %c0_6 = arith.constant 0 : index
    %c0_7 = arith.constant 0 : index
    %c0_8 = arith.constant 0 : index
    %c0_9 = arith.constant 0 : index
    %6 = vector.load %arg2[%c0_6, %c0_7, %c0_8, %c0_9] : memref<1x8x8x4xf32, #tpu.memory_space<vmem>>, vector<1x1x8x4xf32>
    %7 = vector.shape_cast %6 : vector<1x1x8x4xf32> to vector<8x4xf32>
    %c0_10 = arith.constant 0 : index
    %c0_11 = arith.constant 0 : index
    %8 = vector.load %arg4[%c0_10, %c0_11] : memref<4x32xf32, #tpu.memory_space<vmem>>, vector<4x32xf32>
    %cst_12 = arith.constant dense<0.000000e+00> : vector<8x32xf32>
    %9 = tpu.matmul %7, %8, %cst_12 {dimension_numbers = #tpu.dot_dimension_numbers<[1], [0], [0], [1], [0, 0, 1, 1], [], []>} : vector<8x4xf32>, vector<4x32xf32>, vector<8x32xf32> -> vector<8x32xf32>
    %10 = arith.addf %9, %3 : vector<8x32xf32>
    %cst_13 = arith.constant dense<0.000000e+00> : vector<32xf32>
    %11 = vector.multi_reduction <add>, %10, %cst_13 [0] : vector<8x32xf32> to vector<32xf32>
    %12 = vector.shape_cast %11 : vector<32xf32> to vector<1x32xf32>
    %13 = arith.addf %4, %12 : vector<1x32xf32>
    %14 = arith.mulf %10, %10 : vector<8x32xf32>
    %cst_14 = arith.constant dense<0.000000e+00> : vector<32xf32>
    %15 = vector.multi_reduction <add>, %14, %cst_14 [0] : vector<8x32xf32> to vector<32xf32>
    %16 = vector.shape_cast %15 : vector<32xf32> to vector<1x32xf32>
    %17 = arith.addf %5, %16 : vector<1x32xf32>
    %18 = arith.truncf %10 : vector<8x32xf32> to vector<8x32xbf16>
    %c0_15 = arith.constant 0 : index
    %c0_16 = arith.constant 0 : index
    %c0_17 = arith.constant 0 : index
    %c0_18 = arith.constant 0 : index
    %19 = vector.load %arg6[%c0_15, %c0_16, %c0_17, %c0_18] : memref<1x8x8x32xbf16, #tpu.memory_space<vmem>>, vector<1x1x8x32xbf16>
    %20 = vector.shape_cast %19 : vector<1x1x8x32xbf16> to vector<8x32xbf16>
    %21 = vector.shape_cast %18 : vector<8x32xbf16> to vector<1x1x8x32xbf16>
    tpu.vector_store %arg6[%c0_15, %c0_16, %c0_17, %c0_18], %21 {strides = array<i32>} : memref<1x8x8x32xbf16, #tpu.memory_space<vmem>>, vector<1x1x8x32xbf16>,
    %c0_19 = arith.constant 0 : index
    %c1 = arith.constant 1 : index
    %c0_20 = arith.constant 0 : index
    %c0_21 = arith.constant 0 : index
    %22 = vector.load %arg2[%c0_19, %c1, %c0_20, %c0_21] : memref<1x8x8x4xf32, #tpu.memory_space<vmem>>, vector<1x1x8x4xf32>
    %23 = vector.shape_cast %22 : vector<1x1x8x4xf32> to vector<8x4xf32>
    %c0_22 = arith.constant 0 : index
    %c0_23 = arith.constant 0 : index
    %24 = vector.load %arg4[%c0_22, %c0_23] : memref<4x32xf32, #tpu.memory_space<vmem>>, vector<4x32xf32>
    %cst_24 = arith.constant dense<0.000000e+00> : vector<8x32xf32>
    %25 = tpu.matmul %23, %24, %cst_24 {dimension_numbers = #tpu.dot_dimension_numbers<[1], [0], [0], [1], [0, 0, 1, 1], [], []>} : vector<8x4xf32>, vector<4x32xf32>, vector<8x32xf32> -> vector<8x32xf32>
    %26 = arith.addf %25, %3 : vector<8x32xf32>
    %cst_25 = arith.constant dense<0.000000e+00> : vector<32xf32>
    %27 = vector.multi_reduction <add>, %26, %cst_25 [0] : vector<8x32xf32> to vector<32xf32>
    %28 = vector.shape_cast %27 : vector<32xf32> to vector<1x32xf32>
    %29 = arith.addf %13, %28 : vector<1x32xf32>
    %30 = arith.mulf %26, %26 : vector<8x32xf32>
    %cst_26 = arith.constant dense<0.000000e+00> : vector<32xf32>
    %31 = vector.multi_reduction <add>, %30, %cst_26 [0] : vector<8x32xf32> to vector<32xf32>
    %32 = vector.shape_cast %31 : vector<32xf32> to vector<1x32xf32>
    %33 = arith.addf %17, %32 : vector<1x32xf32>
    %34 = arith.truncf %26 : vector<8x32xf32> to vector<8x32xbf16>
    %c0_27 = arith.constant 0 : index
    %c1_28 = arith.constant 1 : index
    %c0_29 = arith.constant 0 : index
    %c0_30 = arith.constant 0 : index
    %35 = vector.load %arg6[%c0_27, %c1_28, %c0_29, %c0_30] : memref<1x8x8x32xbf16, #tpu.memory_space<vmem>>, vector<1x1x8x32xbf16>
    %36 = vector.shape_cast %35 : vector<1x1x8x32xbf16> to vector<8x32xbf16>
    %37 = vector.shape_cast %34 : vector<8x32xbf16> to vector<1x1x8x32xbf16>
    tpu.vector_store %arg6[%c0_27, %c1_28, %c0_29, %c0_30], %37 {strides = array<i32>} : memref<1x8x8x32xbf16, #tpu.memory_space<vmem>>, vector<1x1x8x32xbf16>,
    %c0_31 = arith.constant 0 : index
    %c2 = arith.constant 2 : index
    %c0_32 = arith.constant 0 : index
    %c0_33 = arith.constant 0 : index
    %38 = vector.load %arg2[%c0_31, %c2, %c0_32, %c0_33] : memref<1x8x8x4xf32, #tpu.memory_space<vmem>>, vector<1x1x8x4xf32>
    %39 = vector.shape_cast %38 : vector<1x1x8x4xf32> to vector<8x4xf32>
    %c0_34 = arith.constant 0 : index
    %c0_35 = arith.constant 0 : index
    %40 = vector.load %arg4[%c0_34, %c0_35] : memref<4x32xf32, #tpu.memory_space<vmem>>, vector<4x32xf32>
    %cst_36 = arith.constant dense<0.000000e+00> : vector<8x32xf32>
    %41 = tpu.matmul %39, %40, %cst_36 {dimension_numbers = #tpu.dot_dimension_numbers<[1], [0], [0], [1], [0, 0, 1, 1], [], []>} : vector<8x4xf32>, vector<4x32xf32>, vector<8x32xf32> -> vector<8x32xf32>
    %42 = arith.addf %41, %3 : vector<8x32xf32>
    %cst_37 = arith.constant dense<0.000000e+00> : vector<32xf32>
    %43 = vector.multi_reduction <add>, %42, %cst_37 [0] : vector<8x32xf32> to vector<32xf32>
    %44 = vector.shape_cast %43 : vector<32xf32> to vector<1x32xf32>
    %45 = arith.addf %29, %44 : vector<1x32xf32>
    %46 = arith.mulf %42, %42 : vector<8x32xf32>
    %cst_38 = arith.constant dense<0.000000e+00> : vector<32xf32>
    %47 = vector.multi_reduction <add>, %46, %cst_38 [0] : vector<8x32xf32> to vector<32xf32>
    %48 = vector.shape_cast %47 : vector<32xf32> to vector<1x32xf32>
    %49 = arith.addf %33, %48 : vector<1x32xf32>
    %50 = arith.truncf %42 : vector<8x32xf32> to vector<8x32xbf16>
    %c0_39 = arith.constant 0 : index
    %c2_40 = arith.constant 2 : index
    %c0_41 = arith.constant 0 : index
    %c0_42 = arith.constant 0 : index
    %51 = vector.load %arg6[%c0_39, %c2_40, %c0_41, %c0_42] : memref<1x8x8x32xbf16, #tpu.memory_space<vmem>>, vector<1x1x8x32xbf16>
    %52 = vector.shape_cast %51 : vector<1x1x8x32xbf16> to vector<8x32xbf16>
    %53 = vector.shape_cast %50 : vector<8x32xbf16> to vector<1x1x8x32xbf16>
    tpu.vector_store %arg6[%c0_39, %c2_40, %c0_41, %c0_42], %53 {strides = array<i32>} : memref<1x8x8x32xbf16, #tpu.memory_space<vmem>>, vector<1x1x8x32xbf16>,
    %c0_43 = arith.constant 0 : index
    %c3 = arith.constant 3 : index
    %c0_44 = arith.constant 0 : index
    %c0_45 = arith.constant 0 : index
    %54 = vector.load %arg2[%c0_43, %c3, %c0_44, %c0_45] : memref<1x8x8x4xf32, #tpu.memory_space<vmem>>, vector<1x1x8x4xf32>
    %55 = vector.shape_cast %54 : vector<1x1x8x4xf32> to vector<8x4xf32>
    %c0_46 = arith.constant 0 : index
    %c0_47 = arith.constant 0 : index
    %56 = vector.load %arg4[%c0_46, %c0_47] : memref<4x32xf32, #tpu.memory_space<vmem>>, vector<4x32xf32>
    %cst_48 = arith.constant dense<0.000000e+00> : vector<8x32xf32>
    %57 = tpu.matmul %55, %56, %cst_48 {dimension_numbers = #tpu.dot_dimension_numbers<[1], [0], [0], [1], [0, 0, 1, 1], [], []>} : vector<8x4xf32>, vector<4x32xf32>, vector<8x32xf32> -> vector<8x32xf32>
    %58 = arith.addf %57, %3 : vector<8x32xf32>
    %cst_49 = arith.constant dense<0.000000e+00> : vector<32xf32>
    %59 = vector.multi_reduction <add>, %58, %cst_49 [0] : vector<8x32xf32> to vector<32xf32>
    %60 = vector.shape_cast %59 : vector<32xf32> to vector<1x32xf32>
    %61 = arith.addf %45, %60 : vector<1x32xf32>
    %62 = arith.mulf %58, %58 : vector<8x32xf32>
    %cst_50 = arith.constant dense<0.000000e+00> : vector<32xf32>
    %63 = vector.multi_reduction <add>, %62, %cst_50 [0] : vector<8x32xf32> to vector<32xf32>
    %64 = vector.shape_cast %63 : vector<32xf32> to vector<1x32xf32>
    %65 = arith.addf %49, %64 : vector<1x32xf32>
    %66 = arith.truncf %58 : vector<8x32xf32> to vector<8x32xbf16>
    %c0_51 = arith.constant 0 : index
    %c3_52 = arith.constant 3 : index
    %c0_53 = arith.constant 0 : index
    %c0_54 = arith.constant 0 : index
    %67 = vector.load %arg6[%c0_51, %c3_52, %c0_53, %c0_54] : memref<1x8x8x32xbf16, #tpu.memory_space<vmem>>, vector<1x1x8x32xbf16>
    %68 = vector.shape_cast %67 : vector<1x1x8x32xbf16> to vector<8x32xbf16>
    %69 = vector.shape_cast %66 : vector<8x32xbf16> to vector<1x1x8x32xbf16>
    tpu.vector_store %arg6[%c0_51, %c3_52, %c0_53, %c0_54], %69 {strides = array<i32>} : memref<1x8x8x32xbf16, #tpu.memory_space<vmem>>, vector<1x1x8x32xbf16>,
    %c0_55 = arith.constant 0 : index
    %c4 = arith.constant 4 : index
    %c0_56 = arith.constant 0 : index
    %c0_57 = arith.constant 0 : index
    %70 = vector.load %arg2[%c0_55, %c4, %c0_56, %c0_57] : memref<1x8x8x4xf32, #tpu.memory_space<vmem>>, vector<1x1x8x4xf32>
    %71 = vector.shape_cast %70 : vector<1x1x8x4xf32> to vector<8x4xf32>
    %c0_58 = arith.constant 0 : index
    %c0_59 = arith.constant 0 : index
    %72 = vector.load %arg4[%c0_58, %c0_59] : memref<4x32xf32, #tpu.memory_space<vmem>>, vector<4x32xf32>
    %cst_60 = arith.constant dense<0.000000e+00> : vector<8x32xf32>
    %73 = tpu.matmul %71, %72, %cst_60 {dimension_numbers = #tpu.dot_dimension_numbers<[1], [0], [0], [1], [0, 0, 1, 1], [], []>} : vector<8x4xf32>, vector<4x32xf32>, vector<8x32xf32> -> vector<8x32xf32>
    %74 = arith.addf %73, %3 : vector<8x32xf32>
    %cst_61 = arith.constant dense<0.000000e+00> : vector<32xf32>
    %75 = vector.multi_reduction <add>, %74, %cst_61 [0] : vector<8x32xf32> to vector<32xf32>
    %76 = vector.shape_cast %75 : vector<32xf32> to vector<1x32xf32>
    %77 = arith.addf %61, %76 : vector<1x32xf32>
    %78 = arith.mulf %74, %74 : vector<8x32xf32>
    %cst_62 = arith.constant dense<0.000000e+00> : vector<32xf32>
    %79 = vector.multi_reduction <add>, %78, %cst_62 [0] : vector<8x32xf32> to vector<32xf32>
    %80 = vector.shape_cast %79 : vector<32xf32> to vector<1x32xf32>
    %81 = arith.addf %65, %80 : vector<1x32xf32>
    %82 = arith.truncf %74 : vector<8x32xf32> to vector<8x32xbf16>
    %c0_63 = arith.constant 0 : index
    %c4_64 = arith.constant 4 : index
    %c0_65 = arith.constant 0 : index
    %c0_66 = arith.constant 0 : index
    %83 = vector.load %arg6[%c0_63, %c4_64, %c0_65, %c0_66] : memref<1x8x8x32xbf16, #tpu.memory_space<vmem>>, vector<1x1x8x32xbf16>
    %84 = vector.shape_cast %83 : vector<1x1x8x32xbf16> to vector<8x32xbf16>
    %85 = vector.shape_cast %82 : vector<8x32xbf16> to vector<1x1x8x32xbf16>
    tpu.vector_store %arg6[%c0_63, %c4_64, %c0_65, %c0_66], %85 {strides = array<i32>} : memref<1x8x8x32xbf16, #tpu.memory_space<vmem>>, vector<1x1x8x32xbf16>,
    %c0_67 = arith.constant 0 : index
    %c5 = arith.constant 5 : index
    %c0_68 = arith.constant 0 : index
    %c0_69 = arith.constant 0 : index
    %86 = vector.load %arg2[%c0_67, %c5, %c0_68, %c0_69] : memref<1x8x8x4xf32, #tpu.memory_space<vmem>>, vector<1x1x8x4xf32>
    %87 = vector.shape_cast %86 : vector<1x1x8x4xf32> to vector<8x4xf32>
    %c0_70 = arith.constant 0 : index
    %c0_71 = arith.constant 0 : index
    %88 = vector.load %arg4[%c0_70, %c0_71] : memref<4x32xf32, #tpu.memory_space<vmem>>, vector<4x32xf32>
    %cst_72 = arith.constant dense<0.000000e+00> : vector<8x32xf32>
    %89 = tpu.matmul %87, %88, %cst_72 {dimension_numbers = #tpu.dot_dimension_numbers<[1], [0], [0], [1], [0, 0, 1, 1], [], []>} : vector<8x4xf32>, vector<4x32xf32>, vector<8x32xf32> -> vector<8x32xf32>
    %90 = arith.addf %89, %3 : vector<8x32xf32>
    %cst_73 = arith.constant dense<0.000000e+00> : vector<32xf32>
    %91 = vector.multi_reduction <add>, %90, %cst_73 [0] : vector<8x32xf32> to vector<32xf32>
    %92 = vector.shape_cast %91 : vector<32xf32> to vector<1x32xf32>
    %93 = arith.addf %77, %92 : vector<1x32xf32>
    %94 = arith.mulf %90, %90 : vector<8x32xf32>
    %cst_74 = arith.constant dense<0.000000e+00> : vector<32xf32>
    %95 = vector.multi_reduction <add>, %94, %cst_74 [0] : vector<8x32xf32> to vector<32xf32>
    %96 = vector.shape_cast %95 : vector<32xf32> to vector<1x32xf32>
    %97 = arith.addf %81, %96 : vector<1x32xf32>
    %98 = arith.truncf %90 : vector<8x32xf32> to vector<8x32xbf16>
    %c0_75 = arith.constant 0 : index
    %c5_76 = arith.constant 5 : index
    %c0_77 = arith.constant 0 : index
    %c0_78 = arith.constant 0 : index
    %99 = vector.load %arg6[%c0_75, %c5_76, %c0_77, %c0_78] : memref<1x8x8x32xbf16, #tpu.memory_space<vmem>>, vector<1x1x8x32xbf16>
    %100 = vector.shape_cast %99 : vector<1x1x8x32xbf16> to vector<8x32xbf16>
    %101 = vector.shape_cast %98 : vector<8x32xbf16> to vector<1x1x8x32xbf16>
    tpu.vector_store %arg6[%c0_75, %c5_76, %c0_77, %c0_78], %101 {strides = array<i32>} : memref<1x8x8x32xbf16, #tpu.memory_space<vmem>>, vector<1x1x8x32xbf16>,
    %c0_79 = arith.constant 0 : index
    %c6 = arith.constant 6 : index
    %c0_80 = arith.constant 0 : index
    %c0_81 = arith.constant 0 : index
    %102 = vector.load %arg2[%c0_79, %c6, %c0_80, %c0_81] : memref<1x8x8x4xf32, #tpu.memory_space<vmem>>, vector<1x1x8x4xf32>
    %103 = vector.shape_cast %102 : vector<1x1x8x4xf32> to vector<8x4xf32>
    %c0_82 = arith.constant 0 : index
    %c0_83 = arith.constant 0 : index
    %104 = vector.load %arg4[%c0_82, %c0_83] : memref<4x32xf32, #tpu.memory_space<vmem>>, vector<4x32xf32>
    %cst_84 = arith.constant dense<0.000000e+00> : vector<8x32xf32>
    %105 = tpu.matmul %103, %104, %cst_84 {dimension_numbers = #tpu.dot_dimension_numbers<[1], [0], [0], [1], [0, 0, 1, 1], [], []>} : vector<8x4xf32>, vector<4x32xf32>, vector<8x32xf32> -> vector<8x32xf32>
    %106 = arith.addf %105, %3 : vector<8x32xf32>
    %cst_85 = arith.constant dense<0.000000e+00> : vector<32xf32>
    %107 = vector.multi_reduction <add>, %106, %cst_85 [0] : vector<8x32xf32> to vector<32xf32>
    %108 = vector.shape_cast %107 : vector<32xf32> to vector<1x32xf32>
    %109 = arith.addf %93, %108 : vector<1x32xf32>
    %110 = arith.mulf %106, %106 : vector<8x32xf32>
    %cst_86 = arith.constant dense<0.000000e+00> : vector<32xf32>
    %111 = vector.multi_reduction <add>, %110, %cst_86 [0] : vector<8x32xf32> to vector<32xf32>
    %112 = vector.shape_cast %111 : vector<32xf32> to vector<1x32xf32>
    %113 = arith.addf %97, %112 : vector<1x32xf32>
    %114 = arith.truncf %106 : vector<8x32xf32> to vector<8x32xbf16>
    %c0_87 = arith.constant 0 : index
    %c6_88 = arith.constant 6 : index
    %c0_89 = arith.constant 0 : index
    %c0_90 = arith.constant 0 : index
    %115 = vector.load %arg6[%c0_87, %c6_88, %c0_89, %c0_90] : memref<1x8x8x32xbf16, #tpu.memory_space<vmem>>, vector<1x1x8x32xbf16>
    %116 = vector.shape_cast %115 : vector<1x1x8x32xbf16> to vector<8x32xbf16>
    %117 = vector.shape_cast %114 : vector<8x32xbf16> to vector<1x1x8x32xbf16>
    tpu.vector_store %arg6[%c0_87, %c6_88, %c0_89, %c0_90], %117 {strides = array<i32>} : memref<1x8x8x32xbf16, #tpu.memory_space<vmem>>, vector<1x1x8x32xbf16>,
    %c0_91 = arith.constant 0 : index
    %c7 = arith.constant 7 : index
    %c0_92 = arith.constant 0 : index
    %c0_93 = arith.constant 0 : index
    %118 = vector.load %arg2[%c0_91, %c7, %c0_92, %c0_93] : memref<1x8x8x4xf32, #tpu.memory_space<vmem>>, vector<1x1x8x4xf32>
    %119 = vector.shape_cast %118 : vector<1x1x8x4xf32> to vector<8x4xf32>
    %c0_94 = arith.constant 0 : index
    %c0_95 = arith.constant 0 : index
    %120 = vector.load %arg4[%c0_94, %c0_95] : memref<4x32xf32, #tpu.memory_space<vmem>>, vector<4x32xf32>
    %cst_96 = arith.constant dense<0.000000e+00> : vector<8x32xf32>
    %121 = tpu.matmul %119, %120, %cst_96 {dimension_numbers = #tpu.dot_dimension_numbers<[1], [0], [0], [1], [0, 0, 1, 1], [], []>} : vector<8x4xf32>, vector<4x32xf32>, vector<8x32xf32> -> vector<8x32xf32>
    %122 = arith.addf %121, %3 : vector<8x32xf32>
    %cst_97 = arith.constant dense<0.000000e+00> : vector<32xf32>
    %123 = vector.multi_reduction <add>, %122, %cst_97 [0] : vector<8x32xf32> to vector<32xf32>
    %124 = vector.shape_cast %123 : vector<32xf32> to vector<1x32xf32>
    %125 = arith.addf %109, %124 : vector<1x32xf32>
    %126 = arith.mulf %122, %122 : vector<8x32xf32>
    %cst_98 = arith.constant dense<0.000000e+00> : vector<32xf32>
    %127 = vector.multi_reduction <add>, %126, %cst_98 [0] : vector<8x32xf32> to vector<32xf32>
    %128 = vector.shape_cast %127 : vector<32xf32> to vector<1x32xf32>
    %129 = arith.addf %113, %128 : vector<1x32xf32>
    %130 = arith.truncf %122 : vector<8x32xf32> to vector<8x32xbf16>
    %c0_99 = arith.constant 0 : index
    %c7_100 = arith.constant 7 : index
    %c0_101 = arith.constant 0 : index
    %c0_102 = arith.constant 0 : index
    %131 = vector.load %arg6[%c0_99, %c7_100, %c0_101, %c0_102] : memref<1x8x8x32xbf16, #tpu.memory_space<vmem>>, vector<1x1x8x32xbf16>
    %132 = vector.shape_cast %131 : vector<1x1x8x32xbf16> to vector<8x32xbf16>
    %133 = vector.shape_cast %130 : vector<8x32xbf16> to vector<1x1x8x32xbf16>
    tpu.vector_store %arg6[%c0_99, %c7_100, %c0_101, %c0_102], %133 {strides = array<i32>} : memref<1x8x8x32xbf16, #tpu.memory_space<vmem>>, vector<1x1x8x32xbf16>,
    %c0_103 = arith.constant 0 : index
    %c0_104 = arith.constant 0 : index
    %c0_105 = arith.constant 0 : index
    %c0_106 = arith.constant 0 : index
    %134 = vector.load %arg7[%c0_103, %c0_104, %c0_105, %c0_106] : memref<1x1x1x32xf32, #tpu.memory_space<vmem>>, vector<1x1x1x32xf32>
    %135 = vector.shape_cast %134 : vector<1x1x1x32xf32> to vector<1x32xf32>
    %136 = vector.shape_cast %125 : vector<1x32xf32> to vector<1x1x1x32xf32>
    tpu.vector_store %arg7[%c0_103, %c0_104, %c0_105, %c0_106], %136 {strides = array<i32>} : memref<1x1x1x32xf32, #tpu.memory_space<vmem>>, vector<1x1x1x32xf32>,
    %c0_107 = arith.constant 0 : index
    %c0_108 = arith.constant 0 : index
    %c0_109 = arith.constant 0 : index
    %c0_110 = arith.constant 0 : index
    %137 = vector.load %arg8[%c0_107, %c0_108, %c0_109, %c0_110] : memref<1x1x1x32xf32, #tpu.memory_space<vmem>>, vector<1x1x1x32xf32>
    %138 = vector.shape_cast %137 : vector<1x1x1x32xf32> to vector<1x32xf32>
    %139 = vector.shape_cast %129 : vector<1x32xf32> to vector<1x1x1x32xf32>
    tpu.vector_store %arg8[%c0_107, %c0_108, %c0_109, %c0_110], %139 {strides = array<i32>} : memref<1x1x1x32xf32, #tpu.memory_space<vmem>>, vector<1x1x1x32xf32>,
    return
  }
  func.func @transform_0(%arg0: i32, %arg1: i32) -> (i32, i32, i32, i32) {
    %c0_i32 = arith.constant 0 : i32
    %c0_i32_0 = arith.constant 0 : i32
    %c0_i32_1 = arith.constant 0 : i32
    return %arg0, %c0_i32, %arg1, %c0_i32_0 : i32, i32, i32, i32
  }
  func.func @transform_1(%arg0: i32, %arg1: i32) -> (i32, i32, i32) {
    %c0_i32 = arith.constant 0 : i32
    %c0_i32_0 = arith.constant 0 : i32
    return %arg0, %arg1, %c0_i32 : i32, i32, i32
  }
  func.func @transform_2(%arg0: i32, %arg1: i32) -> (i32, i32) {
    %c0_i32 = arith.constant 0 : i32
    %c0_i32_0 = arith.constant 0 : i32
    %c0_i32_1 = arith.constant 0 : i32
    return %c0_i32, %c0_i32_0 : i32, i32
  }
  func.func @transform_3(%arg0: i32, %arg1: i32) -> (i32, i32) {
    %c0_i32 = arith.constant 0 : i32
    %c0_i32_0 = arith.constant 0 : i32
    %c0_i32_1 = arith.constant 0 : i32
    return %c0_i32, %c0_i32_0 : i32, i32
  }
  func.func @transform_4(%arg0: i32, %arg1: i32) -> (i32, i32, i32, i32) {
    %c0_i32 = arith.constant 0 : i32
    %c0_i32_0 = arith.constant 0 : i32
    %c0_i32_1 = arith.constant 0 : i32
    return %arg0, %c0_i32, %arg1, %c0_i32_0 : i32, i32, i32, i32
  }
  func.func @transform_5(%arg0: i32, %arg1: i32) -> (i32, i32, i32, i32) {
    %c0_i32 = arith.constant 0 : i32
    %c0_i32_0 = arith.constant 0 : i32
    %c0_i32_1 = arith.constant 0 : i32
    return %arg0, %arg1, %c0_i32, %c0_i32_0 : i32, i32, i32, i32
  }
  func.func @transform_6(%arg0: i32, %arg1: i32) -> (i32, i32, i32, i32) {
    %c0_i32 = arith.constant 0 : i32
    %c0_i32_0 = arith.constant 0 : i32
    %c0_i32_1 = arith.constant 0 : i32
    return %arg0, %arg1, %c0_i32, %c0_i32_0 : i32, i32, i32, i32
  }
}

module attributes {stable_mosaic.version = 11 : i64} {
  func.func @kernel(%arg0: i32, %arg1: i32, %arg2: memref<1x8x8x32xbf16, #tpu.memory_space<vmem>>, %arg3: memref<1x32xf32, #tpu.memory_space<vmem>>, %arg4: memref<1x32xf32, #tpu.memory_space<vmem>>, %arg5: memref<32x64xbf16, #tpu.memory_space<vmem>>, %arg6: memref<1x8x8x64xbf16, #tpu.memory_space<vmem>>, %arg7: memref<1x1x1x64xf32, #tpu.memory_space<vmem>>, %arg8: memref<1x1x1x64xf32, #tpu.memory_space<vmem>>) attributes {dimension_semantics = [#tpu.dimension_semantics<parallel>, #tpu.dimension_semantics<parallel>], iteration_bounds = array<i64: 2, 2>, scalar_prefetch = 0 : i64, scratch_operands = 0 : i64, tpu.core_type = #tpu.core_type<tc>, window_params = [{transform_indices = @transform_0, window_bounds = array<i64: 1, 8, 8, 32>}, {pipeline_mode = #tpu.pipeline_mode<synchronous>, transform_indices = @transform_1, window_bounds = array<i64: 1, 32>}, {pipeline_mode = #tpu.pipeline_mode<synchronous>, transform_indices = @transform_2, window_bounds = array<i64: 1, 32>}, {pipeline_mode = #tpu.pipeline_mode<synchronous>, transform_indices = @transform_3, window_bounds = array<i64: 32, 64>}, {transform_indices = @transform_4, window_bounds = array<i64: 1, 8, 8, 64>}, {transform_indices = @transform_5, window_bounds = array<i64: 1, 1, 1, 64>}, {transform_indices = @transform_6, window_bounds = array<i64: 1, 1, 1, 64>}]} {
    %c0 = arith.constant 0 : index
    %c0_0 = arith.constant 0 : index
    %0 = vector.load %arg3[%c0, %c0_0] : memref<1x32xf32, #tpu.memory_space<vmem>>, vector<1x32xf32>
    %c0_1 = arith.constant 0 : index
    %c0_2 = arith.constant 0 : index
    %1 = vector.load %arg4[%c0_1, %c0_2] : memref<1x32xf32, #tpu.memory_space<vmem>>, vector<1x32xf32>
    %cst = arith.constant 0.000000e+00 : f32
    %2 = vector.broadcast %cst : f32 to vector<1x64xf32>
    %cst_3 = arith.constant 0.000000e+00 : f32
    %3 = vector.broadcast %cst_3 : f32 to vector<1x64xf32>
    %c0_4 = arith.constant 0 : index
    %c0_5 = arith.constant 0 : index
    %c0_6 = arith.constant 0 : index
    %c0_7 = arith.constant 0 : index
    %4 = vector.load %arg2[%c0_4, %c0_5, %c0_6, %c0_7] : memref<1x8x8x32xbf16, #tpu.memory_space<vmem>>, vector<1x1x8x32xbf16>
    %5 = vector.shape_cast %4 : vector<1x1x8x32xbf16> to vector<8x32xbf16>
    %6 = arith.extf %5 : vector<8x32xbf16> to vector<8x32xf32>
    %7 = vector.broadcast %0 : vector<1x32xf32> to vector<8x32xf32>
    %8 = arith.mulf %6, %7 : vector<8x32xf32>
    %9 = vector.broadcast %1 : vector<1x32xf32> to vector<8x32xf32>
    %10 = arith.addf %8, %9 : vector<8x32xf32>
    %cst_8 = arith.constant 0.000000e+00 : f32
    %11 = vector.broadcast %cst_8 : f32 to vector<8x32xf32>
    %12 = arith.cmpf oge, %10, %11 : vector<8x32xf32>
    %cst_9 = arith.constant 2.000000e-01 : f32
    %13 = vector.broadcast %cst_9 : f32 to vector<8x32xf32>
    %14 = arith.mulf %13, %10 : vector<8x32xf32>
    %15 = arith.select %12, %10, %14 : vector<8x32xi1>, vector<8x32xf32>
    %16 = arith.truncf %15 : vector<8x32xf32> to vector<8x32xbf16>
    %c0_10 = arith.constant 0 : index
    %c0_11 = arith.constant 0 : index
    %17 = vector.load %arg5[%c0_10, %c0_11] : memref<32x64xbf16, #tpu.memory_space<vmem>>, vector<32x64xbf16>
    %cst_12 = arith.constant dense<0.000000e+00> : vector<8x64xf32>
    %18 = tpu.matmul %16, %17, %cst_12 {dimension_numbers = #tpu.dot_dimension_numbers<[1], [0], [0], [1], [0, 0, 1, 1], [], []>} : vector<8x32xbf16>, vector<32x64xbf16>, vector<8x64xf32> -> vector<8x64xf32>
    %cst_13 = arith.constant dense<0.000000e+00> : vector<64xf32>
    %19 = vector.multi_reduction <add>, %18, %cst_13 [0] : vector<8x64xf32> to vector<64xf32>
    %20 = vector.shape_cast %19 : vector<64xf32> to vector<1x64xf32>
    %21 = arith.addf %2, %20 : vector<1x64xf32>
    %22 = arith.mulf %18, %18 : vector<8x64xf32>
    %cst_14 = arith.constant dense<0.000000e+00> : vector<64xf32>
    %23 = vector.multi_reduction <add>, %22, %cst_14 [0] : vector<8x64xf32> to vector<64xf32>
    %24 = vector.shape_cast %23 : vector<64xf32> to vector<1x64xf32>
    %25 = arith.addf %3, %24 : vector<1x64xf32>
    %26 = arith.truncf %18 : vector<8x64xf32> to vector<8x64xbf16>
    %c0_15 = arith.constant 0 : index
    %c0_16 = arith.constant 0 : index
    %c0_17 = arith.constant 0 : index
    %c0_18 = arith.constant 0 : index
    %27 = vector.load %arg6[%c0_15, %c0_16, %c0_17, %c0_18] : memref<1x8x8x64xbf16, #tpu.memory_space<vmem>>, vector<1x1x8x64xbf16>
    %28 = vector.shape_cast %27 : vector<1x1x8x64xbf16> to vector<8x64xbf16>
    %29 = vector.shape_cast %26 : vector<8x64xbf16> to vector<1x1x8x64xbf16>
    tpu.vector_store %arg6[%c0_15, %c0_16, %c0_17, %c0_18], %29 {strides = array<i32>} : memref<1x8x8x64xbf16, #tpu.memory_space<vmem>>, vector<1x1x8x64xbf16>,
    %c0_19 = arith.constant 0 : index
    %c1 = arith.constant 1 : index
    %c0_20 = arith.constant 0 : index
    %c0_21 = arith.constant 0 : index
    %30 = vector.load %arg2[%c0_19, %c1, %c0_20, %c0_21] : memref<1x8x8x32xbf16, #tpu.memory_space<vmem>>, vector<1x1x8x32xbf16>
    %31 = vector.shape_cast %30 : vector<1x1x8x32xbf16> to vector<8x32xbf16>
    %32 = arith.extf %31 : vector<8x32xbf16> to vector<8x32xf32>
    %33 = vector.broadcast %0 : vector<1x32xf32> to vector<8x32xf32>
    %34 = arith.mulf %32, %33 : vector<8x32xf32>
    %35 = vector.broadcast %1 : vector<1x32xf32> to vector<8x32xf32>
    %36 = arith.addf %34, %35 : vector<8x32xf32>
    %cst_22 = arith.constant 0.000000e+00 : f32
    %37 = vector.broadcast %cst_22 : f32 to vector<8x32xf32>
    %38 = arith.cmpf oge, %36, %37 : vector<8x32xf32>
    %cst_23 = arith.constant 2.000000e-01 : f32
    %39 = vector.broadcast %cst_23 : f32 to vector<8x32xf32>
    %40 = arith.mulf %39, %36 : vector<8x32xf32>
    %41 = arith.select %38, %36, %40 : vector<8x32xi1>, vector<8x32xf32>
    %42 = arith.truncf %41 : vector<8x32xf32> to vector<8x32xbf16>
    %c0_24 = arith.constant 0 : index
    %c0_25 = arith.constant 0 : index
    %43 = vector.load %arg5[%c0_24, %c0_25] : memref<32x64xbf16, #tpu.memory_space<vmem>>, vector<32x64xbf16>
    %cst_26 = arith.constant dense<0.000000e+00> : vector<8x64xf32>
    %44 = tpu.matmul %42, %43, %cst_26 {dimension_numbers = #tpu.dot_dimension_numbers<[1], [0], [0], [1], [0, 0, 1, 1], [], []>} : vector<8x32xbf16>, vector<32x64xbf16>, vector<8x64xf32> -> vector<8x64xf32>
    %cst_27 = arith.constant dense<0.000000e+00> : vector<64xf32>
    %45 = vector.multi_reduction <add>, %44, %cst_27 [0] : vector<8x64xf32> to vector<64xf32>
    %46 = vector.shape_cast %45 : vector<64xf32> to vector<1x64xf32>
    %47 = arith.addf %21, %46 : vector<1x64xf32>
    %48 = arith.mulf %44, %44 : vector<8x64xf32>
    %cst_28 = arith.constant dense<0.000000e+00> : vector<64xf32>
    %49 = vector.multi_reduction <add>, %48, %cst_28 [0] : vector<8x64xf32> to vector<64xf32>
    %50 = vector.shape_cast %49 : vector<64xf32> to vector<1x64xf32>
    %51 = arith.addf %25, %50 : vector<1x64xf32>
    %52 = arith.truncf %44 : vector<8x64xf32> to vector<8x64xbf16>
    %c0_29 = arith.constant 0 : index
    %c1_30 = arith.constant 1 : index
    %c0_31 = arith.constant 0 : index
    %c0_32 = arith.constant 0 : index
    %53 = vector.load %arg6[%c0_29, %c1_30, %c0_31, %c0_32] : memref<1x8x8x64xbf16, #tpu.memory_space<vmem>>, vector<1x1x8x64xbf16>
    %54 = vector.shape_cast %53 : vector<1x1x8x64xbf16> to vector<8x64xbf16>
    %55 = vector.shape_cast %52 : vector<8x64xbf16> to vector<1x1x8x64xbf16>
    tpu.vector_store %arg6[%c0_29, %c1_30, %c0_31, %c0_32], %55 {strides = array<i32>} : memref<1x8x8x64xbf16, #tpu.memory_space<vmem>>, vector<1x1x8x64xbf16>,
    %c0_33 = arith.constant 0 : index
    %c2 = arith.constant 2 : index
    %c0_34 = arith.constant 0 : index
    %c0_35 = arith.constant 0 : index
    %56 = vector.load %arg2[%c0_33, %c2, %c0_34, %c0_35] : memref<1x8x8x32xbf16, #tpu.memory_space<vmem>>, vector<1x1x8x32xbf16>
    %57 = vector.shape_cast %56 : vector<1x1x8x32xbf16> to vector<8x32xbf16>
    %58 = arith.extf %57 : vector<8x32xbf16> to vector<8x32xf32>
    %59 = vector.broadcast %0 : vector<1x32xf32> to vector<8x32xf32>
    %60 = arith.mulf %58, %59 : vector<8x32xf32>
    %61 = vector.broadcast %1 : vector<1x32xf32> to vector<8x32xf32>
    %62 = arith.addf %60, %61 : vector<8x32xf32>
    %cst_36 = arith.constant 0.000000e+00 : f32
    %63 = vector.broadcast %cst_36 : f32 to vector<8x32xf32>
    %64 = arith.cmpf oge, %62, %63 : vector<8x32xf32>
    %cst_37 = arith.constant 2.000000e-01 : f32
    %65 = vector.broadcast %cst_37 : f32 to vector<8x32xf32>
    %66 = arith.mulf %65, %62 : vector<8x32xf32>
    %67 = arith.select %64, %62, %66 : vector<8x32xi1>, vector<8x32xf32>
    %68 = arith.truncf %67 : vector<8x32xf32> to vector<8x32xbf16>
    %c0_38 = arith.constant 0 : index
    %c0_39 = arith.constant 0 : index
    %69 = vector.load %arg5[%c0_38, %c0_39] : memref<32x64xbf16, #tpu.memory_space<vmem>>, vector<32x64xbf16>
    %cst_40 = arith.constant dense<0.000000e+00> : vector<8x64xf32>
    %70 = tpu.matmul %68, %69, %cst_40 {dimension_numbers = #tpu.dot_dimension_numbers<[1], [0], [0], [1], [0, 0, 1, 1], [], []>} : vector<8x32xbf16>, vector<32x64xbf16>, vector<8x64xf32> -> vector<8x64xf32>
    %cst_41 = arith.constant dense<0.000000e+00> : vector<64xf32>
    %71 = vector.multi_reduction <add>, %70, %cst_41 [0] : vector<8x64xf32> to vector<64xf32>
    %72 = vector.shape_cast %71 : vector<64xf32> to vector<1x64xf32>
    %73 = arith.addf %47, %72 : vector<1x64xf32>
    %74 = arith.mulf %70, %70 : vector<8x64xf32>
    %cst_42 = arith.constant dense<0.000000e+00> : vector<64xf32>
    %75 = vector.multi_reduction <add>, %74, %cst_42 [0] : vector<8x64xf32> to vector<64xf32>
    %76 = vector.shape_cast %75 : vector<64xf32> to vector<1x64xf32>
    %77 = arith.addf %51, %76 : vector<1x64xf32>
    %78 = arith.truncf %70 : vector<8x64xf32> to vector<8x64xbf16>
    %c0_43 = arith.constant 0 : index
    %c2_44 = arith.constant 2 : index
    %c0_45 = arith.constant 0 : index
    %c0_46 = arith.constant 0 : index
    %79 = vector.load %arg6[%c0_43, %c2_44, %c0_45, %c0_46] : memref<1x8x8x64xbf16, #tpu.memory_space<vmem>>, vector<1x1x8x64xbf16>
    %80 = vector.shape_cast %79 : vector<1x1x8x64xbf16> to vector<8x64xbf16>
    %81 = vector.shape_cast %78 : vector<8x64xbf16> to vector<1x1x8x64xbf16>
    tpu.vector_store %arg6[%c0_43, %c2_44, %c0_45, %c0_46], %81 {strides = array<i32>} : memref<1x8x8x64xbf16, #tpu.memory_space<vmem>>, vector<1x1x8x64xbf16>,
    %c0_47 = arith.constant 0 : index
    %c3 = arith.constant 3 : index
    %c0_48 = arith.constant 0 : index
    %c0_49 = arith.constant 0 : index
    %82 = vector.load %arg2[%c0_47, %c3, %c0_48, %c0_49] : memref<1x8x8x32xbf16, #tpu.memory_space<vmem>>, vector<1x1x8x32xbf16>
    %83 = vector.shape_cast %82 : vector<1x1x8x32xbf16> to vector<8x32xbf16>
    %84 = arith.extf %83 : vector<8x32xbf16> to vector<8x32xf32>
    %85 = vector.broadcast %0 : vector<1x32xf32> to vector<8x32xf32>
    %86 = arith.mulf %84, %85 : vector<8x32xf32>
    %87 = vector.broadcast %1 : vector<1x32xf32> to vector<8x32xf32>
    %88 = arith.addf %86, %87 : vector<8x32xf32>
    %cst_50 = arith.constant 0.000000e+00 : f32
    %89 = vector.broadcast %cst_50 : f32 to vector<8x32xf32>
    %90 = arith.cmpf oge, %88, %89 : vector<8x32xf32>
    %cst_51 = arith.constant 2.000000e-01 : f32
    %91 = vector.broadcast %cst_51 : f32 to vector<8x32xf32>
    %92 = arith.mulf %91, %88 : vector<8x32xf32>
    %93 = arith.select %90, %88, %92 : vector<8x32xi1>, vector<8x32xf32>
    %94 = arith.truncf %93 : vector<8x32xf32> to vector<8x32xbf16>
    %c0_52 = arith.constant 0 : index
    %c0_53 = arith.constant 0 : index
    %95 = vector.load %arg5[%c0_52, %c0_53] : memref<32x64xbf16, #tpu.memory_space<vmem>>, vector<32x64xbf16>
    %cst_54 = arith.constant dense<0.000000e+00> : vector<8x64xf32>
    %96 = tpu.matmul %94, %95, %cst_54 {dimension_numbers = #tpu.dot_dimension_numbers<[1], [0], [0], [1], [0, 0, 1, 1], [], []>} : vector<8x32xbf16>, vector<32x64xbf16>, vector<8x64xf32> -> vector<8x64xf32>
    %cst_55 = arith.constant dense<0.000000e+00> : vector<64xf32>
    %97 = vector.multi_reduction <add>, %96, %cst_55 [0] : vector<8x64xf32> to vector<64xf32>
    %98 = vector.shape_cast %97 : vector<64xf32> to vector<1x64xf32>
    %99 = arith.addf %73, %98 : vector<1x64xf32>
    %100 = arith.mulf %96, %96 : vector<8x64xf32>
    %cst_56 = arith.constant dense<0.000000e+00> : vector<64xf32>
    %101 = vector.multi_reduction <add>, %100, %cst_56 [0] : vector<8x64xf32> to vector<64xf32>
    %102 = vector.shape_cast %101 : vector<64xf32> to vector<1x64xf32>
    %103 = arith.addf %77, %102 : vector<1x64xf32>
    %104 = arith.truncf %96 : vector<8x64xf32> to vector<8x64xbf16>
    %c0_57 = arith.constant 0 : index
    %c3_58 = arith.constant 3 : index
    %c0_59 = arith.constant 0 : index
    %c0_60 = arith.constant 0 : index
    %105 = vector.load %arg6[%c0_57, %c3_58, %c0_59, %c0_60] : memref<1x8x8x64xbf16, #tpu.memory_space<vmem>>, vector<1x1x8x64xbf16>
    %106 = vector.shape_cast %105 : vector<1x1x8x64xbf16> to vector<8x64xbf16>
    %107 = vector.shape_cast %104 : vector<8x64xbf16> to vector<1x1x8x64xbf16>
    tpu.vector_store %arg6[%c0_57, %c3_58, %c0_59, %c0_60], %107 {strides = array<i32>} : memref<1x8x8x64xbf16, #tpu.memory_space<vmem>>, vector<1x1x8x64xbf16>,
    %c0_61 = arith.constant 0 : index
    %c4 = arith.constant 4 : index
    %c0_62 = arith.constant 0 : index
    %c0_63 = arith.constant 0 : index
    %108 = vector.load %arg2[%c0_61, %c4, %c0_62, %c0_63] : memref<1x8x8x32xbf16, #tpu.memory_space<vmem>>, vector<1x1x8x32xbf16>
    %109 = vector.shape_cast %108 : vector<1x1x8x32xbf16> to vector<8x32xbf16>
    %110 = arith.extf %109 : vector<8x32xbf16> to vector<8x32xf32>
    %111 = vector.broadcast %0 : vector<1x32xf32> to vector<8x32xf32>
    %112 = arith.mulf %110, %111 : vector<8x32xf32>
    %113 = vector.broadcast %1 : vector<1x32xf32> to vector<8x32xf32>
    %114 = arith.addf %112, %113 : vector<8x32xf32>
    %cst_64 = arith.constant 0.000000e+00 : f32
    %115 = vector.broadcast %cst_64 : f32 to vector<8x32xf32>
    %116 = arith.cmpf oge, %114, %115 : vector<8x32xf32>
    %cst_65 = arith.constant 2.000000e-01 : f32
    %117 = vector.broadcast %cst_65 : f32 to vector<8x32xf32>
    %118 = arith.mulf %117, %114 : vector<8x32xf32>
    %119 = arith.select %116, %114, %118 : vector<8x32xi1>, vector<8x32xf32>
    %120 = arith.truncf %119 : vector<8x32xf32> to vector<8x32xbf16>
    %c0_66 = arith.constant 0 : index
    %c0_67 = arith.constant 0 : index
    %121 = vector.load %arg5[%c0_66, %c0_67] : memref<32x64xbf16, #tpu.memory_space<vmem>>, vector<32x64xbf16>
    %cst_68 = arith.constant dense<0.000000e+00> : vector<8x64xf32>
    %122 = tpu.matmul %120, %121, %cst_68 {dimension_numbers = #tpu.dot_dimension_numbers<[1], [0], [0], [1], [0, 0, 1, 1], [], []>} : vector<8x32xbf16>, vector<32x64xbf16>, vector<8x64xf32> -> vector<8x64xf32>
    %cst_69 = arith.constant dense<0.000000e+00> : vector<64xf32>
    %123 = vector.multi_reduction <add>, %122, %cst_69 [0] : vector<8x64xf32> to vector<64xf32>
    %124 = vector.shape_cast %123 : vector<64xf32> to vector<1x64xf32>
    %125 = arith.addf %99, %124 : vector<1x64xf32>
    %126 = arith.mulf %122, %122 : vector<8x64xf32>
    %cst_70 = arith.constant dense<0.000000e+00> : vector<64xf32>
    %127 = vector.multi_reduction <add>, %126, %cst_70 [0] : vector<8x64xf32> to vector<64xf32>
    %128 = vector.shape_cast %127 : vector<64xf32> to vector<1x64xf32>
    %129 = arith.addf %103, %128 : vector<1x64xf32>
    %130 = arith.truncf %122 : vector<8x64xf32> to vector<8x64xbf16>
    %c0_71 = arith.constant 0 : index
    %c4_72 = arith.constant 4 : index
    %c0_73 = arith.constant 0 : index
    %c0_74 = arith.constant 0 : index
    %131 = vector.load %arg6[%c0_71, %c4_72, %c0_73, %c0_74] : memref<1x8x8x64xbf16, #tpu.memory_space<vmem>>, vector<1x1x8x64xbf16>
    %132 = vector.shape_cast %131 : vector<1x1x8x64xbf16> to vector<8x64xbf16>
    %133 = vector.shape_cast %130 : vector<8x64xbf16> to vector<1x1x8x64xbf16>
    tpu.vector_store %arg6[%c0_71, %c4_72, %c0_73, %c0_74], %133 {strides = array<i32>} : memref<1x8x8x64xbf16, #tpu.memory_space<vmem>>, vector<1x1x8x64xbf16>,
    %c0_75 = arith.constant 0 : index
    %c5 = arith.constant 5 : index
    %c0_76 = arith.constant 0 : index
    %c0_77 = arith.constant 0 : index
    %134 = vector.load %arg2[%c0_75, %c5, %c0_76, %c0_77] : memref<1x8x8x32xbf16, #tpu.memory_space<vmem>>, vector<1x1x8x32xbf16>
    %135 = vector.shape_cast %134 : vector<1x1x8x32xbf16> to vector<8x32xbf16>
    %136 = arith.extf %135 : vector<8x32xbf16> to vector<8x32xf32>
    %137 = vector.broadcast %0 : vector<1x32xf32> to vector<8x32xf32>
    %138 = arith.mulf %136, %137 : vector<8x32xf32>
    %139 = vector.broadcast %1 : vector<1x32xf32> to vector<8x32xf32>
    %140 = arith.addf %138, %139 : vector<8x32xf32>
    %cst_78 = arith.constant 0.000000e+00 : f32
    %141 = vector.broadcast %cst_78 : f32 to vector<8x32xf32>
    %142 = arith.cmpf oge, %140, %141 : vector<8x32xf32>
    %cst_79 = arith.constant 2.000000e-01 : f32
    %143 = vector.broadcast %cst_79 : f32 to vector<8x32xf32>
    %144 = arith.mulf %143, %140 : vector<8x32xf32>
    %145 = arith.select %142, %140, %144 : vector<8x32xi1>, vector<8x32xf32>
    %146 = arith.truncf %145 : vector<8x32xf32> to vector<8x32xbf16>
    %c0_80 = arith.constant 0 : index
    %c0_81 = arith.constant 0 : index
    %147 = vector.load %arg5[%c0_80, %c0_81] : memref<32x64xbf16, #tpu.memory_space<vmem>>, vector<32x64xbf16>
    %cst_82 = arith.constant dense<0.000000e+00> : vector<8x64xf32>
    %148 = tpu.matmul %146, %147, %cst_82 {dimension_numbers = #tpu.dot_dimension_numbers<[1], [0], [0], [1], [0, 0, 1, 1], [], []>} : vector<8x32xbf16>, vector<32x64xbf16>, vector<8x64xf32> -> vector<8x64xf32>
    %cst_83 = arith.constant dense<0.000000e+00> : vector<64xf32>
    %149 = vector.multi_reduction <add>, %148, %cst_83 [0] : vector<8x64xf32> to vector<64xf32>
    %150 = vector.shape_cast %149 : vector<64xf32> to vector<1x64xf32>
    %151 = arith.addf %125, %150 : vector<1x64xf32>
    %152 = arith.mulf %148, %148 : vector<8x64xf32>
    %cst_84 = arith.constant dense<0.000000e+00> : vector<64xf32>
    %153 = vector.multi_reduction <add>, %152, %cst_84 [0] : vector<8x64xf32> to vector<64xf32>
    %154 = vector.shape_cast %153 : vector<64xf32> to vector<1x64xf32>
    %155 = arith.addf %129, %154 : vector<1x64xf32>
    %156 = arith.truncf %148 : vector<8x64xf32> to vector<8x64xbf16>
    %c0_85 = arith.constant 0 : index
    %c5_86 = arith.constant 5 : index
    %c0_87 = arith.constant 0 : index
    %c0_88 = arith.constant 0 : index
    %157 = vector.load %arg6[%c0_85, %c5_86, %c0_87, %c0_88] : memref<1x8x8x64xbf16, #tpu.memory_space<vmem>>, vector<1x1x8x64xbf16>
    %158 = vector.shape_cast %157 : vector<1x1x8x64xbf16> to vector<8x64xbf16>
    %159 = vector.shape_cast %156 : vector<8x64xbf16> to vector<1x1x8x64xbf16>
    tpu.vector_store %arg6[%c0_85, %c5_86, %c0_87, %c0_88], %159 {strides = array<i32>} : memref<1x8x8x64xbf16, #tpu.memory_space<vmem>>, vector<1x1x8x64xbf16>,
    %c0_89 = arith.constant 0 : index
    %c6 = arith.constant 6 : index
    %c0_90 = arith.constant 0 : index
    %c0_91 = arith.constant 0 : index
    %160 = vector.load %arg2[%c0_89, %c6, %c0_90, %c0_91] : memref<1x8x8x32xbf16, #tpu.memory_space<vmem>>, vector<1x1x8x32xbf16>
    %161 = vector.shape_cast %160 : vector<1x1x8x32xbf16> to vector<8x32xbf16>
    %162 = arith.extf %161 : vector<8x32xbf16> to vector<8x32xf32>
    %163 = vector.broadcast %0 : vector<1x32xf32> to vector<8x32xf32>
    %164 = arith.mulf %162, %163 : vector<8x32xf32>
    %165 = vector.broadcast %1 : vector<1x32xf32> to vector<8x32xf32>
    %166 = arith.addf %164, %165 : vector<8x32xf32>
    %cst_92 = arith.constant 0.000000e+00 : f32
    %167 = vector.broadcast %cst_92 : f32 to vector<8x32xf32>
    %168 = arith.cmpf oge, %166, %167 : vector<8x32xf32>
    %cst_93 = arith.constant 2.000000e-01 : f32
    %169 = vector.broadcast %cst_93 : f32 to vector<8x32xf32>
    %170 = arith.mulf %169, %166 : vector<8x32xf32>
    %171 = arith.select %168, %166, %170 : vector<8x32xi1>, vector<8x32xf32>
    %172 = arith.truncf %171 : vector<8x32xf32> to vector<8x32xbf16>
    %c0_94 = arith.constant 0 : index
    %c0_95 = arith.constant 0 : index
    %173 = vector.load %arg5[%c0_94, %c0_95] : memref<32x64xbf16, #tpu.memory_space<vmem>>, vector<32x64xbf16>
    %cst_96 = arith.constant dense<0.000000e+00> : vector<8x64xf32>
    %174 = tpu.matmul %172, %173, %cst_96 {dimension_numbers = #tpu.dot_dimension_numbers<[1], [0], [0], [1], [0, 0, 1, 1], [], []>} : vector<8x32xbf16>, vector<32x64xbf16>, vector<8x64xf32> -> vector<8x64xf32>
    %cst_97 = arith.constant dense<0.000000e+00> : vector<64xf32>
    %175 = vector.multi_reduction <add>, %174, %cst_97 [0] : vector<8x64xf32> to vector<64xf32>
    %176 = vector.shape_cast %175 : vector<64xf32> to vector<1x64xf32>
    %177 = arith.addf %151, %176 : vector<1x64xf32>
    %178 = arith.mulf %174, %174 : vector<8x64xf32>
    %cst_98 = arith.constant dense<0.000000e+00> : vector<64xf32>
    %179 = vector.multi_reduction <add>, %178, %cst_98 [0] : vector<8x64xf32> to vector<64xf32>
    %180 = vector.shape_cast %179 : vector<64xf32> to vector<1x64xf32>
    %181 = arith.addf %155, %180 : vector<1x64xf32>
    %182 = arith.truncf %174 : vector<8x64xf32> to vector<8x64xbf16>
    %c0_99 = arith.constant 0 : index
    %c6_100 = arith.constant 6 : index
    %c0_101 = arith.constant 0 : index
    %c0_102 = arith.constant 0 : index
    %183 = vector.load %arg6[%c0_99, %c6_100, %c0_101, %c0_102] : memref<1x8x8x64xbf16, #tpu.memory_space<vmem>>, vector<1x1x8x64xbf16>
    %184 = vector.shape_cast %183 : vector<1x1x8x64xbf16> to vector<8x64xbf16>
    %185 = vector.shape_cast %182 : vector<8x64xbf16> to vector<1x1x8x64xbf16>
    tpu.vector_store %arg6[%c0_99, %c6_100, %c0_101, %c0_102], %185 {strides = array<i32>} : memref<1x8x8x64xbf16, #tpu.memory_space<vmem>>, vector<1x1x8x64xbf16>,
    %c0_103 = arith.constant 0 : index
    %c7 = arith.constant 7 : index
    %c0_104 = arith.constant 0 : index
    %c0_105 = arith.constant 0 : index
    %186 = vector.load %arg2[%c0_103, %c7, %c0_104, %c0_105] : memref<1x8x8x32xbf16, #tpu.memory_space<vmem>>, vector<1x1x8x32xbf16>
    %187 = vector.shape_cast %186 : vector<1x1x8x32xbf16> to vector<8x32xbf16>
    %188 = arith.extf %187 : vector<8x32xbf16> to vector<8x32xf32>
    %189 = vector.broadcast %0 : vector<1x32xf32> to vector<8x32xf32>
    %190 = arith.mulf %188, %189 : vector<8x32xf32>
    %191 = vector.broadcast %1 : vector<1x32xf32> to vector<8x32xf32>
    %192 = arith.addf %190, %191 : vector<8x32xf32>
    %cst_106 = arith.constant 0.000000e+00 : f32
    %193 = vector.broadcast %cst_106 : f32 to vector<8x32xf32>
    %194 = arith.cmpf oge, %192, %193 : vector<8x32xf32>
    %cst_107 = arith.constant 2.000000e-01 : f32
    %195 = vector.broadcast %cst_107 : f32 to vector<8x32xf32>
    %196 = arith.mulf %195, %192 : vector<8x32xf32>
    %197 = arith.select %194, %192, %196 : vector<8x32xi1>, vector<8x32xf32>
    %198 = arith.truncf %197 : vector<8x32xf32> to vector<8x32xbf16>
    %c0_108 = arith.constant 0 : index
    %c0_109 = arith.constant 0 : index
    %199 = vector.load %arg5[%c0_108, %c0_109] : memref<32x64xbf16, #tpu.memory_space<vmem>>, vector<32x64xbf16>
    %cst_110 = arith.constant dense<0.000000e+00> : vector<8x64xf32>
    %200 = tpu.matmul %198, %199, %cst_110 {dimension_numbers = #tpu.dot_dimension_numbers<[1], [0], [0], [1], [0, 0, 1, 1], [], []>} : vector<8x32xbf16>, vector<32x64xbf16>, vector<8x64xf32> -> vector<8x64xf32>
    %cst_111 = arith.constant dense<0.000000e+00> : vector<64xf32>
    %201 = vector.multi_reduction <add>, %200, %cst_111 [0] : vector<8x64xf32> to vector<64xf32>
    %202 = vector.shape_cast %201 : vector<64xf32> to vector<1x64xf32>
    %203 = arith.addf %177, %202 : vector<1x64xf32>
    %204 = arith.mulf %200, %200 : vector<8x64xf32>
    %cst_112 = arith.constant dense<0.000000e+00> : vector<64xf32>
    %205 = vector.multi_reduction <add>, %204, %cst_112 [0] : vector<8x64xf32> to vector<64xf32>
    %206 = vector.shape_cast %205 : vector<64xf32> to vector<1x64xf32>
    %207 = arith.addf %181, %206 : vector<1x64xf32>
    %208 = arith.truncf %200 : vector<8x64xf32> to vector<8x64xbf16>
    %c0_113 = arith.constant 0 : index
    %c7_114 = arith.constant 7 : index
    %c0_115 = arith.constant 0 : index
    %c0_116 = arith.constant 0 : index
    %209 = vector.load %arg6[%c0_113, %c7_114, %c0_115, %c0_116] : memref<1x8x8x64xbf16, #tpu.memory_space<vmem>>, vector<1x1x8x64xbf16>
    %210 = vector.shape_cast %209 : vector<1x1x8x64xbf16> to vector<8x64xbf16>
    %211 = vector.shape_cast %208 : vector<8x64xbf16> to vector<1x1x8x64xbf16>
    tpu.vector_store %arg6[%c0_113, %c7_114, %c0_115, %c0_116], %211 {strides = array<i32>} : memref<1x8x8x64xbf16, #tpu.memory_space<vmem>>, vector<1x1x8x64xbf16>,
    %c0_117 = arith.constant 0 : index
    %c0_118 = arith.constant 0 : index
    %c0_119 = arith.constant 0 : index
    %c0_120 = arith.constant 0 : index
    %212 = vector.load %arg7[%c0_117, %c0_118, %c0_119, %c0_120] : memref<1x1x1x64xf32, #tpu.memory_space<vmem>>, vector<1x1x1x64xf32>
    %213 = vector.shape_cast %212 : vector<1x1x1x64xf32> to vector<1x64xf32>
    %214 = vector.shape_cast %203 : vector<1x64xf32> to vector<1x1x1x64xf32>
    tpu.vector_store %arg7[%c0_117, %c0_118, %c0_119, %c0_120], %214 {strides = array<i32>} : memref<1x1x1x64xf32, #tpu.memory_space<vmem>>, vector<1x1x1x64xf32>,
    %c0_121 = arith.constant 0 : index
    %c0_122 = arith.constant 0 : index
    %c0_123 = arith.constant 0 : index
    %c0_124 = arith.constant 0 : index
    %215 = vector.load %arg8[%c0_121, %c0_122, %c0_123, %c0_124] : memref<1x1x1x64xf32, #tpu.memory_space<vmem>>, vector<1x1x1x64xf32>
    %216 = vector.shape_cast %215 : vector<1x1x1x64xf32> to vector<1x64xf32>
    %217 = vector.shape_cast %207 : vector<1x64xf32> to vector<1x1x1x64xf32>
    tpu.vector_store %arg8[%c0_121, %c0_122, %c0_123, %c0_124], %217 {strides = array<i32>} : memref<1x1x1x64xf32, #tpu.memory_space<vmem>>, vector<1x1x1x64xf32>,
    return
  }
  func.func @transform_0(%arg0: i32, %arg1: i32) -> (i32, i32, i32, i32) {
    %c0_i32 = arith.constant 0 : i32
    %c0_i32_0 = arith.constant 0 : i32
    %c0_i32_1 = arith.constant 0 : i32
    return %arg0, %c0_i32, %arg1, %c0_i32_0 : i32, i32, i32, i32
  }
  func.func @transform_1(%arg0: i32, %arg1: i32) -> (i32, i32) {
    %c0_i32 = arith.constant 0 : i32
    %c0_i32_0 = arith.constant 0 : i32
    %c0_i32_1 = arith.constant 0 : i32
    return %c0_i32, %c0_i32_0 : i32, i32
  }
  func.func @transform_2(%arg0: i32, %arg1: i32) -> (i32, i32) {
    %c0_i32 = arith.constant 0 : i32
    %c0_i32_0 = arith.constant 0 : i32
    %c0_i32_1 = arith.constant 0 : i32
    return %c0_i32, %c0_i32_0 : i32, i32
  }
  func.func @transform_3(%arg0: i32, %arg1: i32) -> (i32, i32) {
    %c0_i32 = arith.constant 0 : i32
    %c0_i32_0 = arith.constant 0 : i32
    %c0_i32_1 = arith.constant 0 : i32
    return %c0_i32, %c0_i32_0 : i32, i32
  }
  func.func @transform_4(%arg0: i32, %arg1: i32) -> (i32, i32, i32, i32) {
    %c0_i32 = arith.constant 0 : i32
    %c0_i32_0 = arith.constant 0 : i32
    %c0_i32_1 = arith.constant 0 : i32
    return %arg0, %c0_i32, %arg1, %c0_i32_0 : i32, i32, i32, i32
  }
  func.func @transform_5(%arg0: i32, %arg1: i32) -> (i32, i32, i32, i32) {
    %c0_i32 = arith.constant 0 : i32
    %c0_i32_0 = arith.constant 0 : i32
    %c0_i32_1 = arith.constant 0 : i32
    return %arg0, %arg1, %c0_i32, %c0_i32_0 : i32, i32, i32, i32
  }
  func.func @transform_6(%arg0: i32, %arg1: i32) -> (i32, i32, i32, i32) {
    %c0_i32 = arith.constant 0 : i32
    %c0_i32_0 = arith.constant 0 : i32
    %c0_i32_1 = arith.constant 0 : i32
    return %arg0, %arg1, %c0_i32, %c0_i32_0 : i32, i32, i32, i32
  }
}

module attributes {stable_mosaic.version = 11 : i64} {
  func.func @kernel(%arg0: i32, %arg1: i32, %arg2: memref<1x8x8x64xbf16, #tpu.memory_space<vmem>>, %arg3: memref<1x64xf32, #tpu.memory_space<vmem>>, %arg4: memref<1x64xf32, #tpu.memory_space<vmem>>, %arg5: memref<1x8x64xf32, #tpu.memory_space<vmem>>) attributes {dimension_semantics = [#tpu.dimension_semantics<parallel>, #tpu.dimension_semantics<parallel>], iteration_bounds = array<i64: 2, 2>, scalar_prefetch = 0 : i64, scratch_operands = 0 : i64, tpu.core_type = #tpu.core_type<tc>, window_params = [{transform_indices = @transform_0, window_bounds = array<i64: 1, 8, 8, 64>}, {pipeline_mode = #tpu.pipeline_mode<synchronous>, transform_indices = @transform_1, window_bounds = array<i64: 1, 64>}, {pipeline_mode = #tpu.pipeline_mode<synchronous>, transform_indices = @transform_2, window_bounds = array<i64: 1, 64>}, {transform_indices = @transform_3, window_bounds = array<i64: 1, 8, 64>}]} {
    %c0 = arith.constant 0 : index
    %c0_0 = arith.constant 0 : index
    %0 = vector.load %arg3[%c0, %c0_0] : memref<1x64xf32, #tpu.memory_space<vmem>>, vector<1x64xf32>
    %c0_1 = arith.constant 0 : index
    %c0_2 = arith.constant 0 : index
    %1 = vector.load %arg4[%c0_1, %c0_2] : memref<1x64xf32, #tpu.memory_space<vmem>>, vector<1x64xf32>
    %c0_3 = arith.constant 0 : index
    %c0_4 = arith.constant 0 : index
    %c0_5 = arith.constant 0 : index
    %c0_6 = arith.constant 0 : index
    %2 = vector.load %arg2[%c0_3, %c0_4, %c0_5, %c0_6] : memref<1x8x8x64xbf16, #tpu.memory_space<vmem>>, vector<1x1x8x64xbf16>
    %3 = vector.shape_cast %2 : vector<1x1x8x64xbf16> to vector<8x64xbf16>
    %4 = arith.extf %3 : vector<8x64xbf16> to vector<8x64xf32>
    %5 = vector.broadcast %0 : vector<1x64xf32> to vector<8x64xf32>
    %6 = arith.mulf %4, %5 : vector<8x64xf32>
    %7 = vector.broadcast %1 : vector<1x64xf32> to vector<8x64xf32>
    %8 = arith.addf %6, %7 : vector<8x64xf32>
    %cst = arith.constant 0.000000e+00 : f32
    %9 = vector.broadcast %cst : f32 to vector<8x64xf32>
    %10 = arith.cmpf oge, %8, %9 : vector<8x64xf32>
    %cst_7 = arith.constant 2.000000e-01 : f32
    %11 = vector.broadcast %cst_7 : f32 to vector<8x64xf32>
    %12 = arith.mulf %11, %8 : vector<8x64xf32>
    %13 = arith.select %10, %8, %12 : vector<8x64xi1>, vector<8x64xf32>
    %c0_8 = arith.constant 0 : index
    %c1 = arith.constant 1 : index
    %c0_9 = arith.constant 0 : index
    %c0_10 = arith.constant 0 : index
    %14 = vector.load %arg2[%c0_8, %c1, %c0_9, %c0_10] : memref<1x8x8x64xbf16, #tpu.memory_space<vmem>>, vector<1x1x8x64xbf16>
    %15 = vector.shape_cast %14 : vector<1x1x8x64xbf16> to vector<8x64xbf16>
    %16 = arith.extf %15 : vector<8x64xbf16> to vector<8x64xf32>
    %17 = vector.broadcast %0 : vector<1x64xf32> to vector<8x64xf32>
    %18 = arith.mulf %16, %17 : vector<8x64xf32>
    %19 = vector.broadcast %1 : vector<1x64xf32> to vector<8x64xf32>
    %20 = arith.addf %18, %19 : vector<8x64xf32>
    %cst_11 = arith.constant 0.000000e+00 : f32
    %21 = vector.broadcast %cst_11 : f32 to vector<8x64xf32>
    %22 = arith.cmpf oge, %20, %21 : vector<8x64xf32>
    %cst_12 = arith.constant 2.000000e-01 : f32
    %23 = vector.broadcast %cst_12 : f32 to vector<8x64xf32>
    %24 = arith.mulf %23, %20 : vector<8x64xf32>
    %25 = arith.select %22, %20, %24 : vector<8x64xi1>, vector<8x64xf32>
    %26 = arith.maximumf %13, %25 : vector<8x64xf32>
    %c0_13 = arith.constant 0 : index
    %c2 = arith.constant 2 : index
    %c0_14 = arith.constant 0 : index
    %c0_15 = arith.constant 0 : index
    %27 = vector.load %arg2[%c0_13, %c2, %c0_14, %c0_15] : memref<1x8x8x64xbf16, #tpu.memory_space<vmem>>, vector<1x1x8x64xbf16>
    %28 = vector.shape_cast %27 : vector<1x1x8x64xbf16> to vector<8x64xbf16>
    %29 = arith.extf %28 : vector<8x64xbf16> to vector<8x64xf32>
    %30 = vector.broadcast %0 : vector<1x64xf32> to vector<8x64xf32>
    %31 = arith.mulf %29, %30 : vector<8x64xf32>
    %32 = vector.broadcast %1 : vector<1x64xf32> to vector<8x64xf32>
    %33 = arith.addf %31, %32 : vector<8x64xf32>
    %cst_16 = arith.constant 0.000000e+00 : f32
    %34 = vector.broadcast %cst_16 : f32 to vector<8x64xf32>
    %35 = arith.cmpf oge, %33, %34 : vector<8x64xf32>
    %cst_17 = arith.constant 2.000000e-01 : f32
    %36 = vector.broadcast %cst_17 : f32 to vector<8x64xf32>
    %37 = arith.mulf %36, %33 : vector<8x64xf32>
    %38 = arith.select %35, %33, %37 : vector<8x64xi1>, vector<8x64xf32>
    %39 = arith.maximumf %26, %38 : vector<8x64xf32>
    %c0_18 = arith.constant 0 : index
    %c3 = arith.constant 3 : index
    %c0_19 = arith.constant 0 : index
    %c0_20 = arith.constant 0 : index
    %40 = vector.load %arg2[%c0_18, %c3, %c0_19, %c0_20] : memref<1x8x8x64xbf16, #tpu.memory_space<vmem>>, vector<1x1x8x64xbf16>
    %41 = vector.shape_cast %40 : vector<1x1x8x64xbf16> to vector<8x64xbf16>
    %42 = arith.extf %41 : vector<8x64xbf16> to vector<8x64xf32>
    %43 = vector.broadcast %0 : vector<1x64xf32> to vector<8x64xf32>
    %44 = arith.mulf %42, %43 : vector<8x64xf32>
    %45 = vector.broadcast %1 : vector<1x64xf32> to vector<8x64xf32>
    %46 = arith.addf %44, %45 : vector<8x64xf32>
    %cst_21 = arith.constant 0.000000e+00 : f32
    %47 = vector.broadcast %cst_21 : f32 to vector<8x64xf32>
    %48 = arith.cmpf oge, %46, %47 : vector<8x64xf32>
    %cst_22 = arith.constant 2.000000e-01 : f32
    %49 = vector.broadcast %cst_22 : f32 to vector<8x64xf32>
    %50 = arith.mulf %49, %46 : vector<8x64xf32>
    %51 = arith.select %48, %46, %50 : vector<8x64xi1>, vector<8x64xf32>
    %52 = arith.maximumf %39, %51 : vector<8x64xf32>
    %c0_23 = arith.constant 0 : index
    %c4 = arith.constant 4 : index
    %c0_24 = arith.constant 0 : index
    %c0_25 = arith.constant 0 : index
    %53 = vector.load %arg2[%c0_23, %c4, %c0_24, %c0_25] : memref<1x8x8x64xbf16, #tpu.memory_space<vmem>>, vector<1x1x8x64xbf16>
    %54 = vector.shape_cast %53 : vector<1x1x8x64xbf16> to vector<8x64xbf16>
    %55 = arith.extf %54 : vector<8x64xbf16> to vector<8x64xf32>
    %56 = vector.broadcast %0 : vector<1x64xf32> to vector<8x64xf32>
    %57 = arith.mulf %55, %56 : vector<8x64xf32>
    %58 = vector.broadcast %1 : vector<1x64xf32> to vector<8x64xf32>
    %59 = arith.addf %57, %58 : vector<8x64xf32>
    %cst_26 = arith.constant 0.000000e+00 : f32
    %60 = vector.broadcast %cst_26 : f32 to vector<8x64xf32>
    %61 = arith.cmpf oge, %59, %60 : vector<8x64xf32>
    %cst_27 = arith.constant 2.000000e-01 : f32
    %62 = vector.broadcast %cst_27 : f32 to vector<8x64xf32>
    %63 = arith.mulf %62, %59 : vector<8x64xf32>
    %64 = arith.select %61, %59, %63 : vector<8x64xi1>, vector<8x64xf32>
    %65 = arith.maximumf %52, %64 : vector<8x64xf32>
    %c0_28 = arith.constant 0 : index
    %c5 = arith.constant 5 : index
    %c0_29 = arith.constant 0 : index
    %c0_30 = arith.constant 0 : index
    %66 = vector.load %arg2[%c0_28, %c5, %c0_29, %c0_30] : memref<1x8x8x64xbf16, #tpu.memory_space<vmem>>, vector<1x1x8x64xbf16>
    %67 = vector.shape_cast %66 : vector<1x1x8x64xbf16> to vector<8x64xbf16>
    %68 = arith.extf %67 : vector<8x64xbf16> to vector<8x64xf32>
    %69 = vector.broadcast %0 : vector<1x64xf32> to vector<8x64xf32>
    %70 = arith.mulf %68, %69 : vector<8x64xf32>
    %71 = vector.broadcast %1 : vector<1x64xf32> to vector<8x64xf32>
    %72 = arith.addf %70, %71 : vector<8x64xf32>
    %cst_31 = arith.constant 0.000000e+00 : f32
    %73 = vector.broadcast %cst_31 : f32 to vector<8x64xf32>
    %74 = arith.cmpf oge, %72, %73 : vector<8x64xf32>
    %cst_32 = arith.constant 2.000000e-01 : f32
    %75 = vector.broadcast %cst_32 : f32 to vector<8x64xf32>
    %76 = arith.mulf %75, %72 : vector<8x64xf32>
    %77 = arith.select %74, %72, %76 : vector<8x64xi1>, vector<8x64xf32>
    %78 = arith.maximumf %65, %77 : vector<8x64xf32>
    %c0_33 = arith.constant 0 : index
    %c6 = arith.constant 6 : index
    %c0_34 = arith.constant 0 : index
    %c0_35 = arith.constant 0 : index
    %79 = vector.load %arg2[%c0_33, %c6, %c0_34, %c0_35] : memref<1x8x8x64xbf16, #tpu.memory_space<vmem>>, vector<1x1x8x64xbf16>
    %80 = vector.shape_cast %79 : vector<1x1x8x64xbf16> to vector<8x64xbf16>
    %81 = arith.extf %80 : vector<8x64xbf16> to vector<8x64xf32>
    %82 = vector.broadcast %0 : vector<1x64xf32> to vector<8x64xf32>
    %83 = arith.mulf %81, %82 : vector<8x64xf32>
    %84 = vector.broadcast %1 : vector<1x64xf32> to vector<8x64xf32>
    %85 = arith.addf %83, %84 : vector<8x64xf32>
    %cst_36 = arith.constant 0.000000e+00 : f32
    %86 = vector.broadcast %cst_36 : f32 to vector<8x64xf32>
    %87 = arith.cmpf oge, %85, %86 : vector<8x64xf32>
    %cst_37 = arith.constant 2.000000e-01 : f32
    %88 = vector.broadcast %cst_37 : f32 to vector<8x64xf32>
    %89 = arith.mulf %88, %85 : vector<8x64xf32>
    %90 = arith.select %87, %85, %89 : vector<8x64xi1>, vector<8x64xf32>
    %91 = arith.maximumf %78, %90 : vector<8x64xf32>
    %c0_38 = arith.constant 0 : index
    %c7 = arith.constant 7 : index
    %c0_39 = arith.constant 0 : index
    %c0_40 = arith.constant 0 : index
    %92 = vector.load %arg2[%c0_38, %c7, %c0_39, %c0_40] : memref<1x8x8x64xbf16, #tpu.memory_space<vmem>>, vector<1x1x8x64xbf16>
    %93 = vector.shape_cast %92 : vector<1x1x8x64xbf16> to vector<8x64xbf16>
    %94 = arith.extf %93 : vector<8x64xbf16> to vector<8x64xf32>
    %95 = vector.broadcast %0 : vector<1x64xf32> to vector<8x64xf32>
    %96 = arith.mulf %94, %95 : vector<8x64xf32>
    %97 = vector.broadcast %1 : vector<1x64xf32> to vector<8x64xf32>
    %98 = arith.addf %96, %97 : vector<8x64xf32>
    %cst_41 = arith.constant 0.000000e+00 : f32
    %99 = vector.broadcast %cst_41 : f32 to vector<8x64xf32>
    %100 = arith.cmpf oge, %98, %99 : vector<8x64xf32>
    %cst_42 = arith.constant 2.000000e-01 : f32
    %101 = vector.broadcast %cst_42 : f32 to vector<8x64xf32>
    %102 = arith.mulf %101, %98 : vector<8x64xf32>
    %103 = arith.select %100, %98, %102 : vector<8x64xi1>, vector<8x64xf32>
    %104 = arith.maximumf %91, %103 : vector<8x64xf32>
    %c0_43 = arith.constant 0 : index
    %c0_44 = arith.constant 0 : index
    %c0_45 = arith.constant 0 : index
    %105 = vector.load %arg5[%c0_43, %c0_44, %c0_45] : memref<1x8x64xf32, #tpu.memory_space<vmem>>, vector<1x8x64xf32>
    %106 = vector.shape_cast %105 : vector<1x8x64xf32> to vector<8x64xf32>
    %107 = vector.shape_cast %104 : vector<8x64xf32> to vector<1x8x64xf32>
    tpu.vector_store %arg5[%c0_43, %c0_44, %c0_45], %107 {strides = array<i32>} : memref<1x8x64xf32, #tpu.memory_space<vmem>>, vector<1x8x64xf32>,
    return
  }
  func.func @transform_0(%arg0: i32, %arg1: i32) -> (i32, i32, i32, i32) {
    %c0_i32 = arith.constant 0 : i32
    %c0_i32_0 = arith.constant 0 : i32
    %c0_i32_1 = arith.constant 0 : i32
    return %arg0, %c0_i32, %arg1, %c0_i32_0 : i32, i32, i32, i32
  }
  func.func @transform_1(%arg0: i32, %arg1: i32) -> (i32, i32) {
    %c0_i32 = arith.constant 0 : i32
    %c0_i32_0 = arith.constant 0 : i32
    %c0_i32_1 = arith.constant 0 : i32
    return %c0_i32, %c0_i32_0 : i32, i32
  }
  func.func @transform_2(%arg0: i32, %arg1: i32) -> (i32, i32) {
    %c0_i32 = arith.constant 0 : i32
    %c0_i32_0 = arith.constant 0 : i32
    %c0_i32_1 = arith.constant 0 : i32
    return %c0_i32, %c0_i32_0 : i32, i32
  }
  func.func @transform_3(%arg0: i32, %arg1: i32) -> (i32, i32, i32) {
    %c0_i32 = arith.constant 0 : i32
    %c0_i32_0 = arith.constant 0 : i32
    return %arg0, %arg1, %c0_i32 : i32, i32, i32
  }
}

</mosaic_0001>

<bundles_post_ra>
// kernel: multi_edge_convolution.4
= control target key start
LH: loop header
LB: loop body
LE: loop exit
PB: predicated region body
PF: predicated region fallthrough
CT: control target
= control target key end

     0   :  { %s697_s12 = smov 0   ;;  %s699_s13 = smov 0   ;;  %s813_s0 = inlined_call_operand.vmem [shape: f32[2,16,4], index: 0, kind: input, shape index: {}, may-alias: {0,1}]   ;;  %s814_s1 = inlined_call_operand.vmem [shape: f32[2,16,4], index: 1, kind: input, shape index: {}, may-alias: {0,1}]   ;;  %s815_s2 = inlined_call_operand.vmem [shape: f32[2,1,16], index: 2, kind: input, shape index: {}]   ;;  %s816_s3 = inlined_call_operand.vmem [shape: s32[2,16,8], index: 3, kind: output, shape index: {}]  }
   0x1   :  { %s701_s14 = smov 0   ;;  %s703_s15 = smov 0  }
   0x2   :  { %s705_s16 = smov 0  }
   0x3 LB: > { %s22_s17 = sadd.s32 1, %s664_s14  ;;  %s25_s18 = sadd.s32 1, %s668_s15  ;;  %s672_s16 = sphi %s705_s16, %s13_s16   ;;  %s668_s15 = sphi %s703_s15, %s820_s15   ;;  %s664_s14 = sphi %s701_s14, %s819_s14   ;;  %s660_s13 = sphi %s699_s13, %s818_s13   ;;  %s656_s12 = sphi %s697_s12, %s817_s12  }
   0x4   : > { %p23_p0 = scmp.ge.s32.totalorder %s22_s17, 2  ;;  %p547_p1 = scmp.ge.s32.totalorder %s672_s16, 1 }
   0x5   : > { %p174_p2 = scmp.lt.s32.totalorder %s672_s16, 5 }
   0x6   : > { %s822_s17 = smov (%p23_p0, %s22_s17), 0  ;;  %s824_s18 = smov (!%p23_p0, %s25_s18), %s668_s15 }
   0x7   : > { %p175_p3 = pnand %p547_p1, %p174_p2  ;;  %p27_p4 = scmp.ge.s32.totalorder %s824_s18, 2 }
   0x8   : > { %p212_p5 = scmp.lt.s32.totalorder (!%p175_p3), %s660_s13, 1  ;;  %p214_p6 = scmp.lt.s32.totalorder (!%p175_p3), %s656_s12, 1  ;;  %v674_v0 = vmov (!%p175_p3), 0.0|0.0   ;;  %vm675_vm0 = vmmov (!%p175_p3), 0   ;;  %v676_v1 = vmov (!%p175_p3), 0.0   ;;  %vm239_vm1 = vcmask (!%p175_p3), 31744  }
   0x9   : > { %s826_s18 = smov (%p27_p4, %s824_s18), 0  ;;  %178 = sbr.rel (%p175_p3) target bundleno = 2569 (0xa09), region = 32 }
   0xa   : > { %571 = vmatprep.subr.bf16.mxu0 (!%p175_p3), %v674_v0  ;;  %568 = vmatprep.mubr.msk.f32.mxu0 (!%p175_p3), %vm675_vm0, %v676_v1  ;;  %vm573_vm2 = vmpackc.low (!%p175_p3), %vm239_vm1, %vm239_vm1  ;;  %vm331_vm3 = vcmask (!%p175_p3), 130048   ;;  %v328_v12 = vlaneseq (!%p175_p3) }
   0xc   : > { %v742_v13 = vand.u32 (!%p175_p3), 127, %v328_v12 }
   0xe   : > { %v745_v14 = vcvt.s32.f32 (!%p175_p3), %v742_v13 }
  0x10   : > { %s828_s13 = smov (!%p212_p5, %s660_s13), 1  ;;  %s830_s12 = smov (!%p214_p6, %s656_s12), 1 }
  0x11   : > { %s560_s19 = sshll.u32 %s828_s13, 4  ;;  %s548_s20 = sshll.u32 %s828_s13, 1 }
  0x12   : > { %s224_s23 = scalar_lea.vmem %s814_s1, %s560_s19  ;;  %s730_s24 = sadd.s32 %s548_s20, %s830_s12 }
  0x13   : > { %v237_v2 = vld [vmem:[%s224_s23] sm:$0xff]  ;;  %v238_v3 = vld [vmem:[%s224_s23 + $0x8] sm:$0xff]  ;;  %s549_s25 = sshll.u32 %s730_s24, 3  ;;  %s227_s4 = scalar_lea.vmem %s815_s2, %s828_s13 }
  0x14   : > { %v572_v4 = vpack.c.bf16 %v238_v3, %v237_v2  ;;  %s219_s28 = scalar_lea.vmem %s813_s0, %s549_s25  ;;  %v557_v7 = vld [vmem:[%s227_s4] ss:$0 sm:$0xff]  ;;  %s235_s7 = scalar_lea.vmem %s816_s3, %s549_s25 }
  0x15   : > { %v236_v5 = vld [vmem:[%s219_s28] sm:$0xff] }
  0x16   : > { %574 = vmatpush3.bf16.xpose.msk.msra.mxu0 %vm573_vm2, %v572_v4 }
  0x1d   : > { %569 = vmatmul.mubr.msk.f32.vlgmr.msra.gmra.mrb[0].mxu0 %vm239_vm1, %v236_v5 }
  0xf0   : > { %v315_v6 = vpop.f32.mrb[0].mxu0 }
  0xf1   : > { %v319_v8 = vmul.f32 2.0, %v315_v6  ;;  %v570_v9 = vpop.f32.mrb[1].mxu0 }
  0xf3   : > { %v327_v10 = vsub.f32 %v319_v8, %v557_v7 }
  0xf5   : > { %v332_v11 = vsel %vm331_vm3, %v327_v10, -inf }
  0xf6   : > { %333 = vmax.xlane.f32.xlu0 %v332_v11 }
 0x183   : > { %v334_v15 = vpop.xlane.xlu0 %333 }
 0x184   : > { %vm335_vm4 = vcmp.eq.f32.partialorder %v327_v10, %v334_v15 }
 0x185   : > { %v336_v16 = vsel %vm335_vm4, %v745_v14, 1e+30  ;;  %vm340_vm4 = vcmp.eq.s32.totalorder %v742_v13, 0 }
 0x186   : > { %v337_v17 = vsel %vm331_vm3, %v336_v16, inf }
 0x187   : > { %338 = vmin.xlane.f32.xlu0 %v337_v17 }
 0x214   : > { %v749_v18 = vpop.xlane.xlu0 %338 }
 0x215   : > { %vm343_vm5 = vcmp.eq.f32.partialorder %v745_v14, %v749_v18  ;;  %v575_v60 = vtrunc.f32 %v749_v18 }
 0x216   : > { %v344_v19 = vsel %vm343_vm5, -1e+30, %v327_v10  ;;  %vm353_vm5 = vcmp.eq.s32.totalorder %v742_v13, 1 }
 0x217   : > { %v345_v20 = vsel %vm331_vm3, %v344_v19, -inf  ;;  %v576_v0 = vcvt.f32.s32 %v575_v60 }
 0x218   : > { %346 = vmax.xlane.f32.xlu1 %v345_v20 }
 0x219   : > { %v342_v7 = vsel %vm340_vm4, %v576_v0, 0 }
 0x2a5   : > { %v347_v21 = vpop.xlane.xlu1 %346 }
 0x2a6   : > { %vm348_vm6 = vcmp.eq.f32.partialorder %v344_v19, %v347_v21 }
 0x2a7   : > { %v349_v22 = vsel %vm348_vm6, %v745_v14, 1e+30  ;;  %vm366_vm6 = vcmp.eq.s32.totalorder %v742_v13, 2 }
 0x2a8   : > { %v350_v23 = vsel %vm331_vm3, %v349_v22, inf }
 0x2a9   : > { %351 = vmin.xlane.f32.xlu1 %v350_v23 }
 0x336   : > { %v756_v24 = vpop.xlane.xlu1 %351 }
 0x337   : > { %vm356_vm7 = vcmp.eq.f32.partialorder %v745_v14, %v756_v24  ;;  %v577_v61 = vtrunc.f32 %v756_v24 }
 0x338   : > { %v357_v25 = vsel %vm356_vm7, -1e+30, %v344_v19  ;;  %vm392_vm7 = vcmp.eq.s32.totalorder %v742_v13, 4 }
 0x339   : > { %v358_v26 = vsel %vm331_vm3, %v357_v25, -inf  ;;  %v578_v2 = vcvt.f32.s32 %v577_v61 }
 0x33a   : > { %359 = vmax.xlane.f32.xlu0 %v358_v26 }
 0x33b   : > { %v355_v9 = vsel %vm353_vm5, %v578_v2, %v342_v7 }
 0x3c7   : > { %v360_v27 = vpop.xlane.xlu0 %359 }
 0x3c8   : > { %vm361_vm8 = vcmp.eq.f32.partialorder %v357_v25, %v360_v27 }
 0x3c9   : > { %v362_v28 = vsel %vm361_vm8, %v745_v14, 1e+30  ;;  %vm405_vm8 = vcmp.eq.s32.totalorder %v742_v13, 5 }
 0x3ca   : > { %v363_v29 = vsel %vm331_vm3, %v362_v28, inf }
 0x3cb   : > { %364 = vmin.xlane.f32.xlu1 %v363_v29 }
 0x458   : > { %v365_v30 = vpop.xlane.xlu1 %364 }
 0x459   : > { %vm369_vm9 = vcmp.eq.f32.partialorder %v745_v14, %v365_v30  ;;  %v579_v62 = vtrunc.f32 %v365_v30 }
 0x45a   : > { %v370_v31 = vsel %vm369_vm9, -1e+30, %v357_v25  ;;  %vm418_vm9 = vcmp.eq.s32.totalorder %v742_v13, 6 }
 0x45b   : > { %v371_v32 = vsel %vm331_vm3, %v370_v31, -inf  ;;  %v580_v4 = vcvt.f32.s32 %v579_v62 }
 0x45c   : > { %372 = vmax.xlane.f32.xlu0 %v371_v32 }
 0x45d   : > { %v368_v11 = vsel %vm366_vm6, %v580_v4, %v355_v9 }
 0x4e9   : > { %v373_v33 = vpop.xlane.xlu0 %372 }
 0x4ea   : > { %vm374_vm10 = vcmp.eq.f32.partialorder %v370_v31, %v373_v33 }
 0x4eb   : > { %v375_v34 = vsel %vm374_vm10, %v745_v14, 1e+30  ;;  %vm431_vm10 = vcmp.eq.s32.totalorder %v742_v13, 7 }
 0x4ec   : > { %v376_v35 = vsel %vm331_vm3, %v375_v34, inf }
 0x4ed   : > { %377 = vmin.xlane.f32.xlu1 %v376_v35 }
 0x57a   : > { %v378_v36 = vpop.xlane.xlu1 %377 }
 0x57b   : > { %vm382_vm11 = vcmp.eq.f32.partialorder %v745_v14, %v378_v36  ;;  %v581_v63 = vtrunc.f32 %v378_v36 }
 0x57c   : > { %v383_v37 = vsel %vm382_vm11, -1e+30, %v370_v31  ;;  %vm434_vm11 = vcmask 64512  }
 0x57d   : > { %v384_v38 = vsel %vm331_vm3, %v383_v37, -inf  ;;  %v582_v6 = vcvt.f32.s32 %v581_v63 }
 0x57e   : > { %385 = vmax.xlane.f32.xlu0 %v384_v38 }
 0x60b   : > { %v386_v39 = vpop.xlane.xlu0 %385 }
 0x60c   : > { %vm387_vm12 = vcmp.eq.f32.partialorder %v383_v37, %v386_v39 }
 0x60d   : > { %v388_v40 = vsel %vm387_vm12, %v745_v14, 1e+30 }
 0x60e   : > { %v389_v41 = vsel %vm331_vm3, %v388_v40, inf }
 0x60f   : > { %390 = vmin.xlane.f32.xlu1 %v389_v41 }
 0x69c   : > { %v391_v42 = vpop.xlane.xlu1 %390 }
 0x69d   : > { %vm395_vm13 = vcmp.eq.f32.partialorder %v745_v14, %v391_v42  ;;  %v583_v1 = vtrunc.f32 %v391_v42 }
 0x69e   : > { %v396_v43 = vsel %vm395_vm13, -1e+30, %v383_v37 }
 0x69f   : > { %v397_v44 = vsel %vm331_vm3, %v396_v43, -inf  ;;  %v584_v8 = vcvt.f32.s32 %v583_v1 }
 0x6a0   : > { %398 = vmax.xlane.f32.xlu0 %v397_v44 }
 0x72d   : > { %v399_v45 = vpop.xlane.xlu0 %398 }
 0x72e   : > { %vm400_vm14 = vcmp.eq.f32.partialorder %v396_v43, %v399_v45 }
 0x72f   : > { %v401_v46 = vsel %vm400_vm14, %v745_v14, 1e+30 }
 0x730   : > { %v402_v47 = vsel %vm331_vm3, %v401_v46, inf }
 0x731   : > { %403 = vmin.xlane.f32.xlu1 %v402_v47 }
 0x7be   : > { %v404_v48 = vpop.xlane.xlu1 %403 }
 0x7bf   : > { %vm408_vm15 = vcmp.eq.f32.partialorder %v745_v14, %v404_v48  ;;  %v585_v3 = vtrunc.f32 %v404_v48 }
 0x7c0   : > { %v409_v49 = vsel %vm408_vm15, -1e+30, %v396_v43 }
 0x7c1   : > { %v410_v50 = vsel %vm331_vm3, %v409_v49, -inf  ;;  %v586_v10 = vcvt.f32.s32 %v585_v3 }
 0x7c2   : > { %411 = vmax.xlane.f32.xlu0 %v410_v50 }
 0x84f   : > { %v412_v51 = vpop.xlane.xlu0 %411 }
 0x850   : > { %vm413_vm0 = vcmp.eq.f32.partialorder %v409_v49, %v412_v51 }
 0x851   : > { %v414_v52 = vsel %vm413_vm0, %v745_v14, 1e+30 }
 0x852   : > { %v415_v53 = vsel %vm331_vm3, %v414_v52, inf }
 0x853   : > { %416 = vmin.xlane.f32.xlu1 %v415_v53 }
 0x8e0   : > { %v417_v54 = vpop.xlane.xlu1 %416 }
 0x8e1   : > { %vm421_vm1 = vcmp.eq.f32.partialorder %v745_v14, %v417_v54  ;;  %v587_v5 = vtrunc.f32 %v417_v54 }
 0x8e2   : > { %v422_v55 = vsel %vm421_vm1, -1e+30, %v409_v49 }
 0x8e3   : > { %v423_v56 = vsel %vm331_vm3, %v422_v55, -inf  ;;  %v588_v12 = vcvt.f32.s32 %v587_v5 }
 0x8e4   : > { %424 = vmax.xlane.f32.xlu0 %v423_v56 }
 0x971   : > { %v425_v57 = vpop.xlane.xlu0 %424 }
 0x972   : > { %vm426_vm2 = vcmp.eq.f32.partialorder %v422_v55, %v425_v57 }
 0x973   : > { %v427_v58 = vsel %vm426_vm2, %v745_v14, 1e+30 }
 0x974   : > { %v428_v59 = vsel %vm331_vm3, %v427_v58, inf  ;;  %vm379_vm3 = vcmp.eq.s32.totalorder %v742_v13, 3 }
 0x975   : > { %429 = vmin.xlane.f32.xlu1 %v428_v59  ;;  %v381_v15 = vsel %vm379_vm3, %v582_v6, %v368_v11 }
 0x976   : > { %v394_v17 = vsel %vm392_vm7, %v584_v8, %v381_v15 }
 0x977   : > { %v407_v18 = vsel %vm405_vm8, %v586_v10, %v394_v17 }
 0x978   : > { %v420_v20 = vsel %vm418_vm9, %v588_v12, %v407_v18 }
 0xa02   : > { %v430_v14 = vpop.xlane.xlu1 %429 }
 0xa03   : > { %v589_v16 = vtrunc.f32 %v430_v14 }
 0xa05   : > { %v590_v19 = vcvt.f32.s32 %v589_v16 }
 0xa07   : > { %v433_v21 = vsel %vm431_vm10, %v590_v19, %v420_v20 }
 0xa08   : > { %435 = vst.msk [vmem:[%s235_s7] sm:$0xff] %vm434_vm11, %v433_v21 }
 0xa09 PF: > { %s13_s16 = sadd.s32 1, %s672_s16   ;;  %s817_s12 = smov %s664_s14 }
 0xa0a   : > { %p10_p7 = scmp.ge.s32.totalorder %s13_s16, 6   ;;  %s818_s13 = smov %s668_s15 }
 0xa0b   : > { %s819_s14 = smov %s822_s17  ;;  %s820_s15 = smov %s826_s18 }
 0xa0c   :  { %12 = sbr.rel (!%p10_p7) target bundleno = 3 (0x3), region = 68 }

// kernel: multi_edge_convolution.5
= control target key start
LH: loop header
LB: loop body
LE: loop exit
PB: predicated region body
PF: predicated region fallthrough
CT: control target
= control target key end

     0   :  { %s1784_s21 = smov 0   ;;  %s1786_s22 = smov 0   ;;  %s2051_s0 = inlined_call_operand.vmem [shape: f32[2,8,16,4], index: 0, kind: input, shape index: {}]   ;;  %s2052_s1 = inlined_call_operand.vmem [shape: f32[2,16,4], index: 1, kind: input, shape index: {}]   ;;  %s2053_s2 = inlined_call_operand.vmem [shape: f32[4,32], index: 2, kind: input, shape index: {}]   ;;  %s2054_s3 = inlined_call_operand.vmem [shape: f32[4,32], index: 3, kind: input, shape index: {}]   ;;  %s2055_s4 = inlined_call_operand.vmem [shape: bf16[2,8,16,32], index: 4, kind: output, shape index: {0}]   ;;  %s2056_s5 = inlined_call_operand.vmem [shape: f32[2,2,1,32], index: 5, kind: output, shape index: {1}]   ;;  %s2057_s6 = inlined_call_operand.vmem [shape: f32[2,2,1,32], index: 6, kind: output, shape index: {2}]  }
   0x1   :  { %s1788_s23 = smov 0   ;;  %s1790_s24 = smov 0  }
   0x2   :  { %s1792_s25 = smov 0   ;;  %s1794_s26 = smov 0  }
   0x3   :  { %s1796_s27 = smov 0  }
   0x4 LB: > { %s26_s28 = sadd.s32 1, %s1737_s25  ;;  %s29_s29 = sadd.s32 1, %s1741_s26  ;;  %s1745_s27 = sphi %s1796_s27, %s17_s27   ;;  %s1741_s26 = sphi %s1794_s26, %s2064_s26   ;;  %s1737_s25 = sphi %s1792_s25, %s2063_s25   ;;  %s1733_s24 = sphi %s1790_s24, %s2062_s24   ;;  %s1729_s23 = sphi %s1788_s23, %s2061_s23   ;;  %s1725_s22 = sphi %s1786_s22, %s2060_s22   ;;  %s1721_s21 = sphi %s1784_s21, %s2059_s21  }
   0x5   : > { %p27_p0 = scmp.ge.s32.totalorder %s26_s28, 2  ;;  %s1519_s30 = sadd.s32 4294967295, %s1745_s27  }
   0x6   : > { %p45_p1 = scmp.ne.s32.totalorder %s1725_s22, %s1721_s21  ;;  %p46_p2 = scmp.eq.s32.totalorder %s1745_s27, 0 }
   0x7   : > { %s2066_s28 = smov (%p27_p0, %s26_s28), 0  ;;  %s2068_s29 = smov (!%p27_p0, %s29_s29), %s1741_s26 }
   0x8   : > { %p31_p3 = scmp.ge.s32.totalorder %s2068_s29, 2  ;;  %p147_p4 = scmp.eq.s32.totalorder %s1519_s30, 3 }
   0x9   : > { %s34_s7 = ssub.s32 %s1737_s25, %s2066_s28  ;;  %p47_p5 = por %p46_p2, %p45_p1 }
   0xa   : > { %s2070_s29 = smov (%p31_p3, %s2068_s29), 0  ;;  %p1832_p6 = por %p147_p4, %p45_p1 }
   0xb   : > { %s33_s9 = ssub.s32 %s1741_s26, %s2070_s29  ;;  %s38_s11 = sadd.s32 1, %s1725_s22 }
   0xc   : > { %s35_s10 = sor.u32 %s34_s7, %s33_s9  ;;  %p1522_p8 = scmp.ge.s32.totalorder %s1745_s27, 4 }
   0xd   : > { %p36_p7 = scmp.eq.s32.totalorder %s35_s10, 0 }
   0xe   : > { %231 = sbr.rel (%p1522_p8) target bundleno = 31 (0x1f), region = 24 }
   0xf   : > { %s1840_s12 = scalar_select %p36_p7, %s1725_s22, %s38_s11  }
  0x15   : > { %234 = sbr.rel (!%p47_p5) target bundleno = 31 (0x1f), region = 28  ;;  %s236_s13 = sand.u32 (%p47_p5), 1, %s1725_s22  }
  0x16   : > { %s1524_s14 = sshll.u32 (%p47_p5), %s1741_s26, 4  ;;  %s1523_s15 = sshll.u32 (%p47_p5), %s236_s13, 6 }
  0x17   : > { %s240_s16 = sadd.s32 (%p47_p5), %s1737_s25, %s1524_s14  ;;  %s238_s30 = scalar_lea.vmem (%p47_p5), [#allocation2], %s1523_s15 }
  0x18   : > { %s1525_s17 = sshll.u32 (%p47_p5), %s240_s16, 3 }
  0x19   : > { %s242_s20 = scalar_lea.vmem (%p47_p5), %s2051_s0, %s1525_s17 }
  0x1a   : > { %v284_v0 = vld [vmem:[%s242_s20] sm:$0xff] (%p47_p5)  ;;  %v286_v1 = vld [vmem:[%s242_s20 + $0x10] sm:$0xff] (%p47_p5) }
  0x1b   : > { %v288_v2 = vld [vmem:[%s242_s20 + $0x20] sm:$0xff] (%p47_p5)  ;;  %285 = vst [vmem:[%s238_s30] sm:$0xff] (%p47_p5), %v284_v0  ;;  %287 = vst [vmem:[%s238_s30 + $0x8] sm:$0xff] (%p47_p5), %v286_v1  ;;  %v290_v3 = vld [vmem:[%s242_s20 + $0x30] sm:$0xff] (%p47_p5) }
  0x1c   : > { %289 = vst [vmem:[%s238_s30 + $0x10] sm:$0xff] %v288_v2  ;;  %v292_v4 = vld [vmem:[%s242_s20 + $0x40] sm:$0xff]  ;;  %v294_v5 = vld [vmem:[%s242_s20 + $0x50] sm:$0xff]  ;;  %291 = vst [vmem:[%s238_s30 + $0x18] sm:$0xff] %v290_v3 }
  0x1d   : > { %293 = vst [vmem:[%s238_s30 + $0x20] sm:$0xff] %v292_v4  ;;  %295 = vst [vmem:[%s238_s30 + $0x28] sm:$0xff] %v294_v5  ;;  %v296_v6 = vld [vmem:[%s242_s20 + $0x60] sm:$0xff]  ;;  %v298_v7 = vld [vmem:[%s242_s20 + $0x70] sm:$0xff] }
  0x1e   : > { %297 = vst [vmem:[%s238_s30 + $0x30] sm:$0xff] %v296_v6  ;;  %299 = vst [vmem:[%s238_s30 + $0x38] sm:$0xff] %v298_v7 }
  0x1f PF: > { %p1526_p9 = scmp.ge.s32.totalorder %s1745_s27, 1  ;;  %p315_p10 = scmp.lt.s32.totalorder %s1745_s27, 5 }
  0x21   : > { %p316_p11 = pnand %p1526_p9, %p315_p10 }
  0x22   : > { %vm400_vm0 = vcmask (!%p316_p11), 1043456   ;;  %v475_v8 = vld [vmem:[%s2053_s2] sm:$0xf] (!%p316_p11)  ;;  %s322_s10 = sand.u32 (!%p316_p11), 1, %s1721_s21   ;;  %v1747_v9 = vmov (!%p316_p11), 0.0   ;;  %vm1748_vm1 = vmmov (!%p316_p11), 0  }
  0x23   : > { %319 = sbr.rel (%p316_p11) target bundleno = 308 (0x134), region = 70  ;;  %1593 = vmatprep.subr.mxu1 (!%p316_p11), %v1747_v9  ;;  %1595 = vmatprep.mubr.msk.f32.mxu1 (!%p316_p11), %vm1748_vm1, %v1747_v9  ;;  %s1527_s11 = sshll.u32 (!%p316_p11), %s322_s10, 6  ;;  %vm396_vm2 = vcmask (!%p316_p11), 31744   ;;  %v395_v10 = vld [vmem:[%s2054_s3] sm:$0xf] (!%p316_p11)  ;;  %vm552_vm3 = vcmask (!%p316_p11), 261120  }
  0x24   : > { %1594 = vmatpush3.msk.msra.mxu1 (!%p316_p11), %vm400_vm0, %v475_v8  ;;  %1588 = vmatprep.subr.mxu0 (!%p316_p11), %v1747_v9  ;;  %v674_v11 = vld [vmem:[%s2053_s2] sm:$0xf] (!%p316_p11)  ;;  %s1868_s17 = scalar_lea.vmem (!%p316_p11), [#allocation2], %s1527_s11  ;;  %p372_p12 = scmp.lt.s32.totalorder (!%p316_p11), %s1733_s24, 1  ;;  %vm571_vm4 = vcmask (!%p316_p11), 257024   ;;  %vm1266_vm5 = vcmask (!%p316_p11), 253952  }
  0x25   : > { %v474_v12 = vld [vmem:[%s1868_s17] sm:$0xff] (!%p316_p11)  ;;  %1603 = vmatprep.subr.mxu1 (!%p316_p11), %v1747_v9  ;;  %1589 = vmatpush3.msk.msra.mxu0 (!%p316_p11), %vm400_vm0, %v395_v10  ;;  %p374_p13 = scmp.lt.s32.totalorder (!%p316_p11), %s1729_s23, 1  ;;  %v1541_v13 = vld [vmem:[%s1868_s17 + $0x10] sm:$0xff] (!%p316_p11)  ;;  %v1537_v19 = vld [vmem:[%s1868_s17 + $0x8] sm:$0xff] (!%p316_p11)  ;;  %s1528_s16 = sshll.u32 (!%p316_p11), %s322_s10, 5 }
  0x26   : > { %1596 = vmatmul.mubr.msk.f32.vlgmr.msra.gmra.mrb[0].mxu1 (!%p316_p11), %vm396_vm2, %v474_v12  ;;  %1590 = vmatprep.mubr.msk.f32.mxu0 (!%p316_p11), %vm1748_vm1, %v1747_v9  ;;  %v872_v14 = vld [vmem:[%s2053_s2] sm:$0xf] (!%p316_p11)  ;;  %v1557_v20 = vld [vmem:[%s1868_s17 + $0x30] sm:$0xff] (!%p316_p11)  ;;  %v1545_v22 = vld [vmem:[%s1868_s17 + $0x18] sm:$0xff] (!%p316_p11)  ;;  %s1955_s21 = scalar_lea.vmem (!%p316_p11), [#allocation3], %s1528_s16 }
  0x27   : > { %1604 = vmatpush3.msk.msra.mxu1 (!%p316_p11), %vm400_vm0, %v674_v11  ;;  %1605 = vmatprep.mubr.msk.f32.mxu1 (!%p316_p11), %vm1748_vm1, %v1747_v9  ;;  %v1549_v15 = vld [vmem:[%s1868_s17 + $0x20] sm:$0xff] (!%p316_p11)  ;;  %v1553_v24 = vld [vmem:[%s1868_s17 + $0x28] sm:$0xff] (!%p316_p11)  ;;  %v1561_v26 = vld [vmem:[%s1868_s17 + $0x38] sm:$0xff] (!%p316_p11) }
  0x28   : > { %1598 = vmatprep.subr.mxu0 (!%p316_p11), %v1747_v9  ;;  %1613 = vmatprep.subr.mxu1 (!%p316_p11), %v1747_v9  ;;  %v575_v16 = vld [vmem:[%s2053_s2] sm:$0xf] (!%p316_p11) }
  0x29   : > { %v1070_v18 = vld [vmem:[%s2053_s2] sm:$0xf] (!%p316_p11) }
  0x2a   : > { %s373_s18 = scalar_select %p372_p12, %s1733_s24, 1  ;;  %1606 = vmatmul.mubr.msk.f32.vlgmr.msra.gmra.mrb[2].mxu1 %vm396_vm2, %v1541_v13  ;;  %v773_v21 = vld [vmem:[%s2053_s2] sm:$0xf] }
  0x2b   : > { %s375_s19 = scalar_select %p374_p13, %s1729_s23, 1  ;;  %1614 = vmatpush3.msk.msra.mxu1 %vm400_vm0, %v872_v14  ;;  %1615 = vmatprep.mubr.msk.f32.mxu1 %vm1748_vm1, %v1747_v9  ;;  %v971_v23 = vld [vmem:[%s2053_s2] sm:$0xf] }
  0x2c   : > { %s1529_s7 = sshll.u32 %s373_s18, 1  ;;  %1623 = vmatprep.subr.mxu1 %v1747_v9  ;;  %v1169_v25 = vld [vmem:[%s2053_s2] sm:$0xf] }
  0x2d   : > { %s1890_s9 = sadd.s32 %s1529_s7, %s375_s19  ;;  %s1566_s7 = sshll.u32 (%p1832_p6), %s1733_s24, 4 }
  0x2e   : > { %s1530_s11 = sshll.u32 %s1890_s9, 3  ;;  %1616 = vmatmul.mubr.msk.f32.vlgmr.msra.gmra.mrb[4].mxu1 %vm396_vm2, %v1549_v15  ;;  %s386_s18 = scalar_lea.vmem %s2056_s5, %s1890_s9 }
  0x2f   : > { %s379_s15 = scalar_lea.vmem %s2052_s1, %s1530_s11  ;;  %1624 = vmatpush3.msk.msra.mxu1 %vm400_vm0, %v1070_v18  ;;  %1625 = vmatprep.mubr.msk.f32.mxu1 %vm1748_vm1, %v1747_v9  ;;  %s393_s30 = scalar_lea.vmem %s2057_s6, %s1890_s9 }
  0x30   : > { %v394_v17 = vld [vmem:[%s379_s15] sm:$0xff]  ;;  %s1291_s11 = sadd.s32 (%p1832_p6), %s1729_s23, %s1566_s7 }
  0x31   : > { %1591 = vmatmul.mubr.msk.f32.vlgmr.msra.gmra.mrb[0].mxu0 %vm396_vm2, %v394_v17  ;;  %s1567_s9 = sshll.u32 (%p1832_p6), %s1291_s11, 2 }
  0x32   : > { %1599 = vmatpush3.msk.msra.mxu0 %vm400_vm0, %v575_v16  ;;  %1600 = vmatprep.mubr.msk.f32.mxu0 %vm1748_vm1, %v1747_v9  ;;  %s1293_s14 = scalar_lea.vmem (%p1832_p6), %s2055_s4, %s1567_s9 }
  0x33   : > { %1608 = vmatprep.subr.mxu0 %v1747_v9  ;;  %1626 = vmatmul.mubr.msk.f32.vlgmr.msra.gmra.mrb[6].mxu1 %vm396_vm2, %v1557_v20 }
  0x35   : > { %1601 = vmatmul.mubr.msk.f32.vlgmr.msra.gmra.mrb[2].mxu0 %vm396_vm2, %v1537_v19 }
  0x36   : > { %1609 = vmatpush3.msk.msra.mxu0 %vm400_vm0, %v773_v21  ;;  %1610 = vmatprep.mubr.msk.f32.mxu0 %vm1748_vm1, %v1747_v9 }
  0x37   : > { %1618 = vmatprep.subr.mxu0 %v1747_v9 }
  0x39   : > { %1611 = vmatmul.mubr.msk.f32.vlgmr.msra.gmra.mrb[4].mxu0 %vm396_vm2, %v1545_v22 }
  0x3a   : > { %1619 = vmatpush3.msk.msra.mxu0 %vm400_vm0, %v971_v23  ;;  %1620 = vmatprep.mubr.msk.f32.mxu0 %vm1748_vm1, %v1747_v9 }
  0x3b   : > { %1628 = vmatprep.subr.mxu0 %v1747_v9 }
  0x3d   : > { %1621 = vmatmul.mubr.msk.f32.vlgmr.msra.gmra.mrb[6].mxu0 %vm396_vm2, %v1553_v24 }
  0x3e   : > { %1629 = vmatpush3.msk.msra.mxu0 %vm400_vm0, %v1169_v25  ;;  %1630 = vmatprep.mubr.msk.f32.mxu0 %vm1748_vm1, %v1747_v9 }
  0x41   : > { %1631 = vmatmul.mubr.msk.f32.vlgmr.msra.gmra.mrb[8].mxu0 %vm396_vm2, %v1561_v26 }
  0xf9   : > { %v548_v27 = vpop.f32.mrb[0].mxu1 }
  0xfa   : > { %v1597_v28 = vpop.f32.mrb[1].mxu1 }
  0xfd   : > { %v747_v29 = vpop.f32.mrb[2].mxu1 }
  0xfe   : > { %v1607_v30 = vpop.f32.mrb[3].mxu1 }
 0x101   : > { %v945_v32 = vpop.f32.mrb[4].mxu1 }
 0x102   : > { %v1617_v37 = vpop.f32.mrb[5].mxu1 }
 0x104   : > { %v1948_v31 = vpop.f32.mrb[0].mxu0 }
 0x105   : > { %v549_v33 = vadd.f32 %v548_v27, %v1948_v31  ;;  %v748_v34 = vadd.f32 %v747_v29, %v1948_v31  ;;  %v1592_v35 = vpop.f32.mrb[1].mxu0  ;;  %v946_v36 = vadd.f32 %v945_v32, %v1948_v31 }
 0x106   : > { %v1143_v47 = vpop.f32.mrb[6].mxu1 }
 0x107   : > { %v570_v38 = vpack.c.bf16 %v549_v33, %v549_v33  ;;  %v751_v39 = vsel %vm552_vm3, %v748_v34, 0.0  ;;  %v759_v40 = vmul.f32 %v748_v34, %v748_v34  ;;  %v768_v41 = vpack.c.bf16 %v748_v34, %v748_v34  ;;  %v1627_v53 = vpop.f32.mrb[7].mxu1 }
 0x108   : > { %v752_v42 = vrot.slane %v751_v39, 4  ;;  %v949_v43 = vsel %vm552_vm3, %v946_v36, 0.0  ;;  %v957_v44 = vmul.f32 %v946_v36, %v946_v36  ;;  %v966_v45 = vpack.c.bf16 %v946_v36, %v946_v36  ;;  %v648_v46 = vpop.f32.mrb[2].mxu0 }
 0x109   : > { %572 = vst.msk [vmem:[%s1955_s21] sm:$0xf] %vm571_vm4, %v570_v38  ;;  %v760_v48 = vsel %vm552_vm3, %v759_v40, 0.0  ;;  %1544 = vst.msk [vmem:[%s1955_s21 + $0x8] sm:$0xf] %vm571_vm4, %v768_v41  ;;  %v950_v49 = vrot.slane %v949_v43, 4  ;;  %v561_v51 = vmul.f32 %v549_v33, %v549_v33  ;;  %v649_v61 = vadd.f32 %v648_v46, %v1948_v31 }
 0x10a   : > { %v553_v50 = vsel %vm552_vm3, %v549_v33, 0.0  ;;  %v1602_v52 = vpop.f32.mrb[3].mxu0  ;;  %v753_v54 = vadd.f32 %v752_v42, %v751_v39  ;;  %v761_v55 = vrot.slane %v760_v48, 4  ;;  %v958_v56 = vsel %vm552_vm3, %v957_v44, 0.0  ;;  %1552 = vst.msk [vmem:[%s1955_s21 + $0x10] sm:$0xf] %vm571_vm4, %v966_v45 }
 0x10b   : > { %v554_v57 = vrot.slane %v553_v50, 4  ;;  %v951_v58 = vadd.f32 %v950_v49, %v949_v43  ;;  %v959_v59 = vrot.slane %v958_v56, 4  ;;  %v562_v60 = vsel %vm552_vm3, %v561_v51, 0.0 }
 0x10c   : > { %v754_v62 = vrot.slane %v753_v54, 2  ;;  %v762_v63 = vadd.f32 %v761_v55, %v760_v48  ;;  %v563_v1 = vrot.slane %v562_v60, 4  ;;  %v846_v2 = vpop.f32.mrb[4].mxu0  ;;  %v652_v5 = vsel %vm552_vm3, %v649_v61, 0.0 }
 0x10d   : > { %v555_v0 = vadd.f32 %v554_v57, %v553_v50  ;;  %v952_v3 = vrot.slane %v951_v58, 2  ;;  %v960_v4 = vadd.f32 %v959_v59, %v958_v56  ;;  %v660_v6 = vmul.f32 %v649_v61, %v649_v61  ;;  %v1612_v7 = vpop.f32.mrb[5].mxu0 }
 0x10e   : > { %v755_v8 = vadd.f32 %v754_v62, %v753_v54  ;;  %v763_v9 = vrot.slane %v762_v63, 2  ;;  %v564_v11 = vadd.f32 %v563_v1, %v562_v60  ;;  %v653_v14 = vrot.slane %v652_v5, 4 }
 0x10f   : > { %v556_v10 = vrot.slane %v555_v0, 2  ;;  %v1969_v12 = vadd.f32 %v952_v3, %v951_v58  ;;  %v961_v13 = vrot.slane %v960_v4, 2  ;;  %v661_v15 = vsel %vm552_vm3, %v660_v6, 0.0 }
 0x110   : > { %v756_v16 = vrot.slane %v755_v8, 1  ;;  %v764_v17 = vadd.f32 %v763_v9, %v762_v63  ;;  %v565_v19 = vrot.slane %v564_v11, 2  ;;  %v1044_v20 = vpop.f32.mrb[6].mxu0  ;;  %v654_v21 = vadd.f32 %v653_v14, %v652_v5 }
 0x111   : > { %v557_v18 = vadd.f32 %v556_v10, %v555_v0  ;;  %v662_v22 = vrot.slane %v661_v15, 4  ;;  %v1622_v23 = vpop.f32.mrb[7].mxu0  ;;  %v954_v26 = vrot.slane %v1969_v12, 1  ;;  %v1973_v27 = vadd.f32 %v961_v13, %v960_v4 }
 0x112   : > { %v566_v25 = vadd.f32 %v565_v19, %v564_v11  ;;  %v655_v28 = vrot.slane %v654_v21, 2  ;;  %v757_v30 = vadd.f32 %v756_v16, %v755_v8  ;;  %v765_v32 = vrot.slane %v764_v17, 1 }
 0x113   : > { %v558_v24 = vrot.slane %v557_v18, 1  ;;  %v663_v29 = vadd.f32 %v662_v22, %v661_v15  ;;  %v669_v34 = vpack.c.bf16 %v649_v61, %v649_v61  ;;  %v1144_v39 = vadd.f32 %v1143_v47, %v1948_v31 }
 0x114   : > { %v567_v33 = vrot.slane %v566_v25, 1  ;;  %v1242_v35 = vpop.f32.mrb[8].mxu0  ;;  %v656_v37 = vadd.f32 %v655_v28, %v654_v21  ;;  %v847_v42 = vadd.f32 %v846_v2, %v1948_v31  ;;  %v1045_v43 = vadd.f32 %v1044_v20, %v1948_v31 }
 0x115   : > { %v559_v36 = vadd.f32 %v558_v24, %v557_v18  ;;  %v664_v38 = vrot.slane %v663_v29, 2  ;;  %v1632_v40 = vpop.f32.mrb[9].mxu0  ;;  %1540 = vst.msk [vmem:[%s1955_s21 + $0x4] sm:$0xf] %vm571_vm4, %v669_v34  ;;  %v1981_v44 = vadd.f32 %v1242_v35, %v1948_v31  ;;  %v1147_v48 = vsel %vm552_vm3, %v1144_v39, 0.0 }
 0x116   : > { %v568_v41 = vadd.f32 %v567_v33, %v566_v25  ;;  %v657_v45 = vrot.slane %v656_v37, 1  ;;  %v1155_v49 = vmul.f32 %v1144_v39, %v1144_v39  ;;  %v1148_v50 = vrot.slane %v1147_v48, 4 }
 0x117   : > { %v665_v46 = vadd.f32 %v664_v38, %v663_v29  ;;  %v1164_v51 = vpack.c.bf16 %v1144_v39, %v1144_v39  ;;  %v850_v47 = vsel %vm552_vm3, %v847_v42, 0.0  ;;  %v858_v52 = vmul.f32 %v847_v42, %v847_v42 }
 0x118   : > { %v658_v53 = vadd.f32 %v657_v45, %v656_v37  ;;  %v1156_v55 = vsel %vm552_vm3, %v1155_v49, 0.0  ;;  %v851_v56 = vrot.slane %v850_v47, 4  ;;  %v1149_v57 = vadd.f32 %v1148_v50, %v1147_v48 }
 0x119   : > { %v666_v54 = vrot.slane %v665_v46, 1  ;;  %v1157_v58 = vrot.slane %v1156_v55, 4  ;;  %1560 = vst.msk [vmem:[%s1955_s21 + $0x18] sm:$0xf] %vm571_vm4, %v1164_v51  ;;  %v859_v31 = vsel %vm552_vm3, %v858_v52, 0.0  ;;  %v867_v59 = vpack.c.bf16 %v847_v42, %v847_v42 }
 0x11a   : > { %v659_v60 = vadd.f32 %v658_v53, %v559_v36  ;;  %v852_v62 = vadd.f32 %v851_v56, %v850_v47  ;;  %v860_v63 = vrot.slane %v859_v31, 4  ;;  %v766_v0 = vadd.f32 %v765_v32, %v764_v17 }
 0x11b   : > { %v667_v61 = vadd.f32 %v666_v54, %v665_v46  ;;  %v1158_v1 = vadd.f32 %v1157_v58, %v1156_v55  ;;  %1548 = vst.msk [vmem:[%s1955_s21 + $0xc] sm:$0xf] %vm571_vm4, %v867_v59  ;;  %v1048_v2 = vsel %vm552_vm3, %v1045_v43, 0.0  ;;  %v1056_v3 = vmul.f32 %v1045_v43, %v1045_v43 }
 0x11c   : > { %v758_v5 = vadd.f32 %v757_v30, %v659_v60  ;;  %v853_v6 = vrot.slane %v852_v62, 2  ;;  %v861_v7 = vadd.f32 %v860_v63, %v859_v31  ;;  %v1150_v8 = vrot.slane %v1149_v57, 2 }
 0x11d   : > { %v668_v4 = vadd.f32 %v667_v61, %v568_v41  ;;  %v1159_v9 = vrot.slane %v1158_v1, 2  ;;  %v1049_v10 = vrot.slane %v1048_v2, 4  ;;  %v1057_v11 = vsel %vm552_vm3, %v1056_v3, 0.0  ;;  %v1309_v3 = vld [vmem:[%s1955_s21] sm:$0xf] (%p1832_p6) }
 0x11e   : > { %v854_v14 = vadd.f32 %v853_v6, %v852_v62  ;;  %v862_v15 = vrot.slane %v861_v7, 2  ;;  %v1058_v16 = vrot.slane %v1057_v11, 4  ;;  %v955_v17 = vadd.f32 %v954_v26, %v1969_v12  ;;  %1310 = vst [vmem:[%s1293_s14] sm:$0xf] (%p1832_p6), %v1309_v3 }
 0x11f   : > { %v767_v13 = vadd.f32 %v766_v0, %v668_v4  ;;  %v963_v18 = vrot.slane %v1973_v27, 1  ;;  %v1050_v19 = vadd.f32 %v1049_v10, %v1048_v2  ;;  %v1065_v20 = vpack.c.bf16 %v1045_v43, %v1045_v43  ;;  %v1311_v4 = vld [vmem:[%s1955_s21 + $0x4] sm:$0xf] (%p1832_p6) }
 0x120   : > { %v855_v21 = vrot.slane %v854_v14, 1  ;;  %v863_v22 = vadd.f32 %v862_v15, %v861_v7  ;;  %v1059_v23 = vadd.f32 %v1058_v16, %v1057_v11  ;;  %v1246_v24 = vsel %vm552_vm3, %v1981_v44, 0.0  ;;  %v1317_v7 = vld [vmem:[%s1955_s21 + $0x10] sm:$0xf] (%p1832_p6)  ;;  %1312 = vst [vmem:[%s1293_s14 + $0x8] sm:$0xf] (%p1832_p6), %v1311_v4 }
 0x121   : > { %v1151_v25 = vadd.f32 %v1150_v8, %v1149_v57  ;;  %v1160_v28 = vadd.f32 %v1159_v9, %v1158_v1  ;;  %v1051_v29 = vrot.slane %v1050_v19, 2  ;;  %1556 = vst.msk [vmem:[%s1955_s21 + $0x14] sm:$0xf] %vm571_vm4, %v1065_v20  ;;  %v1247_v30 = vrot.slane %v1246_v24, 4  ;;  %v1321_v9 = vld [vmem:[%s1955_s21 + $0x18] sm:$0xf] (%p1832_p6) }
 0x122   : > { %v856_v32 = vadd.f32 %v855_v21, %v854_v14  ;;  %v864_v33 = vrot.slane %v863_v22, 1  ;;  %v1060_v12 = vrot.slane %v1059_v23, 2  ;;  %v1254_v26 = vmul.f32 %v1981_v44, %v1981_v44  ;;  %v1315_v6 = vld [vmem:[%s1955_s21 + $0xc] sm:$0xf] (%p1832_p6)  ;;  %1318 = vst [vmem:[%s1293_s14 + $0x20] sm:$0xf] (%p1832_p6), %v1317_v7 }
 0x123   : > { %v964_v34 = vadd.f32 %v963_v18, %v1973_v27  ;;  %v1052_v35 = vadd.f32 %v1051_v29, %v1050_v19  ;;  %v1248_v36 = vadd.f32 %v1247_v30, %v1246_v24  ;;  %v1263_v37 = vpack.c.bf16 %v1981_v44, %v1981_v44  ;;  %1316 = vst [vmem:[%s1293_s14 + $0x18] sm:$0xf] (%p1832_p6), %v1315_v6 }
 0x124   : > { %v857_v38 = vadd.f32 %v856_v32, %v758_v5  ;;  %v865_v39 = vadd.f32 %v864_v33, %v863_v22  ;;  %v1061_v40 = vadd.f32 %v1060_v12, %v1059_v23  ;;  %v1255_v41 = vsel %vm552_vm3, %v1254_v26, 0.0  ;;  %v1313_v5 = vld [vmem:[%s1955_s21 + $0x8] sm:$0xf] (%p1832_p6)  ;;  %1322 = vst [vmem:[%s1293_s14 + $0x30] sm:$0xf] (%p1832_p6), %v1321_v9 }
 0x125   : > { %v1152_v42 = vrot.slane %v1151_v25, 1  ;;  %v1053_v43 = vrot.slane %v1052_v35, 1  ;;  %v1249_v45 = vrot.slane %v1248_v36, 2  ;;  %v1256_v46 = vrot.slane %v1255_v41, 4  ;;  %1564 = vst.msk [vmem:[%s1955_s21 + $0x1c] sm:$0xf] %vm571_vm4, %v1263_v37 }
 0x126   : > { %v1161_v48 = vrot.slane %v1160_v28, 1  ;;  %v866_v49 = vadd.f32 %v865_v39, %v767_v13  ;;  %v956_v50 = vadd.f32 %v955_v17, %v857_v38  ;;  %v1062_v27 = vrot.slane %v1061_v40, 1  ;;  %1314 = vst [vmem:[%s1293_s14 + $0x10] sm:$0xf] (%p1832_p6), %v1313_v5 }
 0x127   : > { %v1054_v51 = vadd.f32 %v1053_v43, %v1052_v35  ;;  %v1250_v47 = vadd.f32 %v1249_v45, %v1248_v36  ;;  %v1257_v52 = vadd.f32 %v1256_v46, %v1255_v41  ;;  %v1153_v54 = vadd.f32 %v1152_v42, %v1151_v25 }
 0x128   : > { %v965_v44 = vadd.f32 %v964_v34, %v866_v49  ;;  %v1063_v53 = vadd.f32 %v1062_v27, %v1061_v40  ;;  %v1162_v58 = vadd.f32 %v1161_v48, %v1160_v28  ;;  %v1319_v8 = vld [vmem:[%s1955_s21 + $0x14] sm:$0xf] (%p1832_p6) }
 0x129   : > { %v1055_v55 = vadd.f32 %v1054_v51, %v956_v50  ;;  %v1251_v56 = vrot.slane %v1250_v47, 1  ;;  %v1258_v57 = vrot.slane %v1257_v52, 2  ;;  %1320 = vst [vmem:[%s1293_s14 + $0x28] sm:$0xf] (%p1832_p6), %v1319_v8 }
 0x12a   : > { %v1064_v31 = vadd.f32 %v1063_v53, %v965_v44 }
 0x12b   : > { %v1154_v59 = vadd.f32 %v1153_v54, %v1055_v55  ;;  %v1252_v60 = vadd.f32 %v1251_v56, %v1250_v47  ;;  %v1259_v61 = vadd.f32 %v1258_v57, %v1257_v52 }
 0x12c   : > { %v1163_v62 = vadd.f32 %v1162_v58, %v1064_v31  ;;  %v1323_v10 = vld [vmem:[%s1955_s21 + $0x1c] sm:$0xf] (%p1832_p6) }
 0x12d   : > { %v1253_v63 = vadd.f32 %v1252_v60, %v1154_v59  ;;  %v1260_v0 = vrot.slane %v1259_v61, 1  ;;  %1289 = sbr.rel (!%p1832_p6) target bundleno = 308 (0x134), region = 78  ;;  %1324 = vst [vmem:[%s1293_s14 + $0x38] sm:$0xf] (%p1832_p6), %v1323_v10 }
 0x12f   : > { %v1261_v1 = vadd.f32 %v1260_v0, %v1259_v61  ;;  %1267 = vst.msk [vmem:[%s386_s18] sm:$0x1] %vm1266_vm5, %v1253_v63 }
 0x131   : > { %v1262_v2 = vadd.f32 %v1261_v1, %v1163_v62 }
 0x133   : > { %1268 = vst.msk [vmem:[%s393_s30] sm:$0x1] %vm1266_vm5, %v1262_v2 }
 0x134 PF: > { %s17_s27 = sadd.s32 1, %s1745_s27   ;;  %s2059_s21 = smov %s1725_s22 }
 0x135   : > { %p14_p0 = scmp.ge.s32.totalorder %s17_s27, 6   ;;  %s2060_s22 = smov %s1840_s12 }
 0x136   : > { %s2061_s23 = smov %s1737_s25  ;;  %s2062_s24 = smov %s1741_s26 }
 0x137   : > { %s2063_s25 = smov %s2066_s28  ;;  %s2064_s26 = smov %s2070_s29 }
 0x138   :  { %16 = sbr.rel (!%p14_p0) target bundleno = 4 (0x4), region = 191 }

// kernel: multi_edge_convolution.6
= control target key start
LH: loop header
LB: loop body
LE: loop exit
PB: predicated region body
PF: predicated region fallthrough
CT: control target
= control target key end

     0   :  { %s1637_s21 = smov 0   ;;  %s1639_s22 = smov 0   ;;  %s1913_s0 = inlined_call_operand.vmem [shape: bf16[2,8,16,32], index: 0, kind: input, shape index: {}]   ;;  %s1914_s1 = inlined_call_operand.vmem [shape: f32[1,32], index: 1, kind: input, shape index: {}]   ;;  %s1915_s2 = inlined_call_operand.vmem [shape: f32[1,32], index: 2, kind: input, shape index: {}]   ;;  %s1916_s3 = inlined_call_operand.vmem [shape: bf16[32,64], index: 3, kind: input, shape index: {}]   ;;  %s1917_s4 = inlined_call_operand.vmem [shape: bf16[2,8,16,64], index: 4, kind: output, shape index: {0}]   ;;  %s1918_s5 = inlined_call_operand.vmem [shape: f32[2,2,1,64], index: 5, kind: output, shape index: {1}]   ;;  %s1919_s6 = inlined_call_operand.vmem [shape: f32[2,2,1,64], index: 6, kind: output, shape index: {2}]  }
   0x1   :  { %s1641_s23 = smov 0   ;;  %s1643_s24 = smov 0  }
   0x2   :  { %s1645_s25 = smov 0   ;;  %s1647_s26 = smov 0  }
   0x3   :  { %s1649_s27 = smov 0  }
   0x4 LB: > { %s26_s28 = sadd.s32 1, %s1590_s25  ;;  %s29_s29 = sadd.s32 1, %s1594_s26  ;;  %s1598_s27 = sphi %s1649_s27, %s17_s27   ;;  %s1594_s26 = sphi %s1647_s26, %s1926_s26   ;;  %s1590_s25 = sphi %s1645_s25, %s1925_s25   ;;  %s1586_s24 = sphi %s1643_s24, %s1924_s24   ;;  %s1582_s23 = sphi %s1641_s23, %s1923_s23   ;;  %s1578_s22 = sphi %s1639_s22, %s1922_s22   ;;  %s1574_s21 = sphi %s1637_s21, %s1921_s21  }
   0x5   : > { %p27_p0 = scmp.ge.s32.totalorder %s26_s28, 2  ;;  %s1325_s30 = sadd.s32 4294967295, %s1598_s27  }
   0x6   : > { %p45_p1 = scmp.ne.s32.totalorder %s1578_s22, %s1574_s21  ;;  %p46_p2 = scmp.eq.s32.totalorder %s1598_s27, 0 }
   0x7   : > { %s1928_s28 = smov (%p27_p0, %s26_s28), 0  ;;  %s1930_s29 = smov (!%p27_p0, %s29_s29), %s1594_s26 }
   0x8   : > { %p31_p3 = scmp.ge.s32.totalorder %s1930_s29, 2  ;;  %p140_p4 = scmp.eq.s32.totalorder %s1325_s30, 3 }
   0x9   : > { %s34_s7 = ssub.s32 %s1590_s25, %s1928_s28  ;;  %p47_p5 = por %p46_p2, %p45_p1 }
   0xa   : > { %s1932_s29 = smov (%p31_p3, %s1930_s29), 0  ;;  %p1685_p6 = por %p140_p4, %p45_p1 }
   0xb   : > { %s33_s9 = ssub.s32 %s1594_s26, %s1932_s29  ;;  %s38_s11 = sadd.s32 1, %s1578_s22 }
   0xc   : > { %s35_s10 = sor.u32 %s34_s7, %s33_s9  ;;  %p1328_p8 = scmp.ge.s32.totalorder %s1598_s27, 4 }
   0xd   : > { %p36_p7 = scmp.eq.s32.totalorder %s35_s10, 0 }
   0xe   : > { %227 = sbr.rel (%p1328_p8) target bundleno = 32 (0x20), region = 28 }
   0xf   : > { %s1693_s12 = scalar_select %p36_p7, %s1578_s22, %s38_s11  }
  0x15   : > { %230 = sbr.rel (!%p47_p5) target bundleno = 32 (0x20), region = 32  ;;  %s232_s13 = sand.u32 (%p47_p5), 1, %s1578_s22  }
  0x16   : > { %s1330_s14 = sshll.u32 (%p47_p5), %s1594_s26, 4  ;;  %s1329_s15 = sshll.u32 (%p47_p5), %s232_s13, 5 }
  0x17   : > { %s236_s16 = sadd.s32 (%p47_p5), %s1590_s25, %s1330_s14  ;;  %s234_s30 = scalar_lea.vmem (%p47_p5), [#allocation2], %s1329_s15 }
  0x18   : > { %s1331_s17 = sshll.u32 (%p47_p5), %s236_s16, 2 }
  0x19   : > { %s238_s20 = scalar_lea.vmem (%p47_p5), %s1913_s0, %s1331_s17 }
  0x1a   : > { %v254_v0 = vld [vmem:[%s238_s20] sm:$0xf] (%p47_p5)  ;;  %v256_v1 = vld [vmem:[%s238_s20 + $0x8] sm:$0xf] (%p47_p5)  ;;  %v258_v2 = vld [vmem:[%s238_s20 + $0x10] sm:$0xf] (%p47_p5) }
  0x1b   : > { %255 = vst [vmem:[%s234_s30] sm:$0xf] (%p47_p5), %v254_v0  ;;  %257 = vst [vmem:[%s234_s30 + $0x4] sm:$0xf] (%p47_p5), %v256_v1  ;;  %v260_v3 = vld [vmem:[%s238_s20 + $0x18] sm:$0xf] (%p47_p5) }
  0x1c   : > { %259 = vst [vmem:[%s234_s30 + $0x8] sm:$0xf] %v258_v2  ;;  %v262_v4 = vld [vmem:[%s238_s20 + $0x20] sm:$0xf]  ;;  %v264_v5 = vld [vmem:[%s238_s20 + $0x28] sm:$0xf] }
  0x1d   : > { %261 = vst [vmem:[%s234_s30 + $0xc] sm:$0xf] %v260_v3  ;;  %263 = vst [vmem:[%s234_s30 + $0x10] sm:$0xf] %v262_v4  ;;  %v266_v6 = vld [vmem:[%s238_s20 + $0x30] sm:$0xf] }
  0x1e   : > { %265 = vst [vmem:[%s234_s30 + $0x14] sm:$0xf] %v264_v5  ;;  %v268_v7 = vld [vmem:[%s238_s20 + $0x38] sm:$0xf]  ;;  %267 = vst [vmem:[%s234_s30 + $0x18] sm:$0xf] %v266_v6 }
  0x1f   : > { %269 = vst [vmem:[%s234_s30 + $0x1c] sm:$0xf] %v268_v7 }
  0x20 PF: > { %p1332_p9 = scmp.ge.s32.totalorder %s1598_s27, 1  ;;  %p307_p10 = scmp.lt.s32.totalorder %s1598_s27, 5 }
  0x22   : > { %p308_p11 = pnand %p1332_p9, %p307_p10 }
  0x23   : > { %v1528_v8 = vld [vmem:[%s1916_s3] sm:$0xff] (!%p308_p11)   ;;  %v1600_v9 = vmov (!%p308_p11), 0.0   ;;  %v1530_v11 = vld [vmem:[%s1916_s3 + $0x8] sm:$0xff] (!%p308_p11)   ;;  %vm1601_vm0 = vmmov (!%p308_p11), 0   ;;  %s314_s15 = sand.u32 (!%p308_p11), 1, %s1574_s21   ;;  %vm409_vm3 = vcmask (!%p308_p11), 261120  }
  0x24   : > { %311 = sbr.rel (%p308_p11) target bundleno = 310 (0x136), region = 73  ;;  %1406 = vmatprep.subr.bf16.mxu0 (!%p308_p11), %v1600_v9  ;;  %1414 = vmatprep.subr.bf16.mxu1 (!%p308_p11), %v1600_v9  ;;  %v1529_v10 = vld [vmem:[%s1916_s3] sm:$0xff] (!%p308_p11)   ;;  %v1531_v12 = vld [vmem:[%s1916_s3 + $0x8] sm:$0xff] (!%p308_p11)   ;;  %s1722_s18 = sshll.u32 (!%p308_p11), %s314_s15, 5  ;;  %vm453_vm10 = vcmask (!%p308_p11), 523264   ;;  %vm472_vm11 = vcmask (!%p308_p11), 519168  }
  0x25   : > { %1407 = vmatpush3.bf16.msra.mxu0 (!%p308_p11), %v1528_v8  ;;  %1410 = vmatprep.mubr.msk.bf16.mxu0 (!%p308_p11), %vm1601_vm0, %v1600_v9  ;;  %v1730_v13 = vld [vmem:[%s1914_s1] ss:$0 sm:$0xff] (!%p308_p11)  ;;  %s1733_s21 = scalar_lea.vmem (!%p308_p11), [#allocation2], %s1722_s18  ;;  %v1534_v38 = vld [vmem:[%s1916_s3 + $0x8] sm:$0xff] (!%p308_p11)   ;;  %s1832_s7 = scalar_lea.vmem (!%p308_p11), [#allocation3], %s1722_s18  ;;  %vm1090_vm12 = vcmask (!%p308_p11), 516096  }
  0x26   : > { %1415 = vmatpush3.bf16.msra.mxu1 (!%p308_p11), %v1529_v10  ;;  %1408 = vmatprep.subr.bf16.mxu0 (!%p308_p11), %v1600_v9  ;;  %v373_v14 = vld [vmem:[%s1733_s21] sm:$0xff] (!%p308_p11)   ;;  %v1347_v20 = vld [vmem:[%s1733_s21 + $0x8] sm:$0xff] (!%p308_p11)   ;;  %v1357_v33 = vld [vmem:[%s1733_s21 + $0x10] sm:$0xff] (!%p308_p11)   ;;  %p356_p12 = scmp.lt.s32.totalorder (!%p308_p11), %s1586_s24, 1  ;;  %p358_p13 = scmp.lt.s32.totalorder (!%p308_p11), %s1582_s23, 1 }
  0x27   : > { %1416 = vmatprep.subr.bf16.mxu1 (!%p308_p11), %v1600_v9  ;;  %1418 = vmatprep.mubr.msk.bf16.mxu1 (!%p308_p11), %vm1601_vm0, %v1600_v9  ;;  %v374_v15 = vunpack.c.l.bf16 (!%p308_p11), %v373_v14  ;;  %v476_v16 = vunpack.c.h.bf16 (!%p308_p11), %v373_v14  ;;  %v1740_v17 = vld [vmem:[%s1915_s2] ss:$0 sm:$0xff] (!%p308_p11)  ;;  %v564_v23 = vunpack.c.l.bf16 (!%p308_p11), %v1347_v20  ;;  %v652_v24 = vunpack.c.h.bf16 (!%p308_p11), %v1347_v20  ;;  %v1535_v43 = vld [vmem:[%s1916_s3 + $0x8] sm:$0xff] (!%p308_p11)   ;;  %v1367_v50 = vld [vmem:[%s1733_s21 + $0x18] sm:$0xff] (!%p308_p11)  }
  0x28   : > { %v1532_v27 = vld [vmem:[%s1916_s3] sm:$0xff] (!%p308_p11)   ;;  %v740_v39 = vunpack.c.l.bf16 (!%p308_p11), %v1357_v33  ;;  %v828_v40 = vunpack.c.h.bf16 (!%p308_p11), %v1357_v33  ;;  %v916_v53 = vunpack.c.l.bf16 (!%p308_p11), %v1367_v50  ;;  %v1004_v54 = vunpack.c.h.bf16 (!%p308_p11), %v1367_v50  ;;  %v1538_v62 = vld [vmem:[%s1916_s3 + $0x8] sm:$0xff] (!%p308_p11)  }
  0x29   : > { %1409 = vmatpush3.bf16.msra.mxu0 (!%p308_p11), %v1530_v11  ;;  %v381_v18 = vmul.f32 (!%p308_p11), %v1730_v13, %v374_v15  ;;  %v477_v19 = vmul.f32 (!%p308_p11), %v1730_v13, %v476_v16  ;;  %v565_v28 = vmul.f32 (!%p308_p11), %v1730_v13, %v564_v23  ;;  %v653_v29 = vmul.f32 (!%p308_p11), %v1730_v13, %v652_v24  ;;  %v1533_v32 = vld [vmem:[%s1916_s3] sm:$0xff] (!%p308_p11)   ;;  %v1539_v63 = vld [vmem:[%s1916_s3 + $0x8] sm:$0xff] (!%p308_p11)  }
  0x2a   : > { %1417 = vmatpush3.bf16.msra.mxu1 (!%p308_p11), %v1531_v12  ;;  %1422 = vmatprep.subr.bf16.mxu0 (!%p308_p11), %v1600_v9  ;;  %v741_v44 = vmul.f32 (!%p308_p11), %v1730_v13, %v740_v39  ;;  %v829_v45 = vmul.f32 (!%p308_p11), %v1730_v13, %v828_v40  ;;  %v1536_v55 = vld [vmem:[%s1916_s3] sm:$0xff] (!%p308_p11)   ;;  %v917_v59 = vmul.f32 (!%p308_p11), %v1730_v13, %v916_v53  ;;  %v1542_v10 = vld [vmem:[%s1916_s3 + $0x8] sm:$0xff] (!%p308_p11)  }
  0x2b   : > { %1430 = vmatprep.subr.bf16.mxu1 %v1600_v9  ;;  %v388_v21 = vadd.f32 %v1740_v17, %v381_v18  ;;  %v478_v22 = vadd.f32 %v1740_v17, %v477_v19  ;;  %v566_v36 = vadd.f32 %v1740_v17, %v565_v28  ;;  %v654_v37 = vadd.f32 %v1740_v17, %v653_v29  ;;  %v1537_v56 = vld [vmem:[%s1916_s3] sm:$0xff]   ;;  %v1543_v11 = vld [vmem:[%s1916_s3 + $0x8] sm:$0xff]   ;;  %s357_s18 = scalar_select %p356_p12, %s1586_s24, 1 }
  0x2c   : > { %v742_v49 = vadd.f32 %v1740_v17, %v741_v44  ;;  %v830_v52 = vadd.f32 %v1740_v17, %v829_v45  ;;  %v1005_v60 = vmul.f32 %v1730_v13, %v1004_v54  ;;  %v918_v1 = vadd.f32 %v1740_v17, %v917_v59  ;;  %v1540_v5 = vld [vmem:[%s1916_s3] sm:$0xff]   ;;  %s359_s21 = scalar_select %p358_p13, %s1582_s23, 1 }
  0x2d   : > { %vm389_vm1 = vcmp.ge.f32.partialorder %v388_v21, 0.0  ;;  %v390_v25 = vmul.f32 0.2, %v388_v21  ;;  %vm479_vm2 = vcmp.ge.f32.partialorder %v478_v22, 0.0  ;;  %v480_v26 = vmul.f32 0.2, %v478_v22 }
  0x2e   : > { %vm567_vm4 = vcmp.ge.f32.partialorder %v566_v36, 0.0  ;;  %v568_v41 = vmul.f32 0.2, %v566_v36  ;;  %vm655_vm5 = vcmp.ge.f32.partialorder %v654_v37, 0.0  ;;  %v656_v42 = vmul.f32 0.2, %v654_v37 }
  0x2f   : > { %v391_v30 = vsel %vm389_vm1, %v388_v21, %v390_v25  ;;  %v481_v31 = vsel %vm479_vm2, %v478_v22, %v480_v26  ;;  %vm743_vm6 = vcmp.ge.f32.partialorder %v742_v49, 0.0  ;;  %v744_v57 = vmul.f32 0.2, %v742_v49  ;;  %v1541_v6 = vld [vmem:[%s1916_s3] sm:$0xff]   ;;  %s1335_s9 = sshll.u32 %s357_s18, 1  ;;  %s1378_s19 = sshll.u32 (%p1685_p6), %s1586_s24, 4 }
  0x30   : > { %v392_v34 = vpack.c.bf16 %v391_v30, %v391_v30  ;;  %v482_v35 = vpack.c.bf16 %v481_v31, %v481_v31  ;;  %v569_v46 = vsel %vm567_vm4, %v566_v36, %v568_v41  ;;  %v657_v47 = vsel %vm655_vm5, %v654_v37, %v656_v42  ;;  %s361_s10 = sadd.s32 %s1335_s9, %s359_s21  ;;  %s1115_s20 = sadd.s32 (%p1685_p6), %s1582_s23, %s1378_s19 }
  0x31   : > { %v570_v48 = vpack.c.bf16 %v569_v46, %v569_v46  ;;  %v658_v51 = vpack.c.bf16 %v657_v47, %v657_v47  ;;  %vm831_vm7 = vcmp.ge.f32.partialorder %v830_v52, 0.0  ;;  %v832_v58 = vmul.f32 0.2, %v830_v52  ;;  %s362_s14 = scalar_lea.vmem %s1918_s5, %s361_s10  ;;  %s369_s17 = scalar_lea.vmem %s1919_s6, %s361_s10 }
  0x32   : > { %1411 = vmatmul.mubr.msk.bf16.vlgmr.msra.gmra.mrb[0].mxu0 %vm409_vm3, %v392_v34  ;;  %1419 = vmatmul.mubr.msk.bf16.vlgmr.msra.gmra.mrb[0].mxu1 %vm409_vm3, %v482_v35  ;;  %v745_v61 = vsel %vm743_vm6, %v742_v49, %v744_v57  ;;  %v1006_v2 = vadd.f32 %v1740_v17, %v1005_v60  ;;  %v920_v7 = vmul.f32 0.2, %v918_v1  ;;  %vm919_vm8 = vcmp.ge.f32.partialorder %v918_v1, 0.0  ;;  %s1379_s30 = sshll.u32 (%p1685_p6), %s1115_s20, 2 }
  0x33   : > { %1423 = vmatpush3.bf16.msra.mxu0 %v1532_v27  ;;  %1431 = vmatpush3.bf16.msra.mxu1 %v1533_v32  ;;  %v833_v0 = vsel %vm831_vm7, %v830_v52, %v832_v58  ;;  %v746_v3 = vpack.c.bf16 %v745_v61, %v745_v61  ;;  %s1117_s21 = scalar_lea.vmem (%p1685_p6), %s1917_s4, %s1379_s30 }
  0x34   : > { %1424 = vmatprep.subr.bf16.mxu0 %v1600_v9  ;;  %1432 = vmatprep.subr.bf16.mxu1 %v1600_v9  ;;  %v834_v4 = vpack.c.bf16 %v833_v0, %v833_v0  ;;  %v1008_v8 = vmul.f32 0.2, %v1006_v2  ;;  %vm1007_vm9 = vcmp.ge.f32.partialorder %v1006_v2, 0.0  ;;  %v921_v12 = vsel %vm919_vm8, %v918_v1, %v920_v7 }
  0x35   : > { %1426 = vmatprep.mubr.msk.bf16.mxu0 %vm1601_vm0, %v1600_v9  ;;  %1434 = vmatprep.mubr.msk.bf16.mxu1 %vm1601_vm0, %v1600_v9  ;;  %v922_v14 = vpack.c.bf16 %v921_v12, %v921_v12 }
  0x36   : > { %v1009_v13 = vsel %vm1007_vm9, %v1006_v2, %v1008_v8 }
  0x37   : > { %1425 = vmatpush3.bf16.msra.mxu0 %v1534_v38  ;;  %1433 = vmatpush3.bf16.msra.mxu1 %v1535_v43  ;;  %v1010_v15 = vpack.c.bf16 %v1009_v13, %v1009_v13 }
  0x38   : > { %1438 = vmatprep.subr.bf16.mxu0 %v1600_v9  ;;  %1446 = vmatprep.subr.bf16.mxu1 %v1600_v9 }
  0x3a   : > { %1427 = vmatmul.mubr.msk.bf16.vlgmr.msra.gmra.mrb[4].mxu0 %vm409_vm3, %v570_v48  ;;  %1435 = vmatmul.mubr.msk.bf16.vlgmr.msra.gmra.mrb[4].mxu1 %vm409_vm3, %v658_v51 }
  0x3b   : > { %1439 = vmatpush3.bf16.msra.mxu0 %v1536_v55  ;;  %1447 = vmatpush3.bf16.msra.mxu1 %v1537_v56 }
  0x3c   : > { %1440 = vmatprep.subr.bf16.mxu0 %v1600_v9  ;;  %1448 = vmatprep.subr.bf16.mxu1 %v1600_v9 }
  0x3d   : > { %1442 = vmatprep.mubr.msk.bf16.mxu0 %vm1601_vm0, %v1600_v9  ;;  %1450 = vmatprep.mubr.msk.bf16.mxu1 %vm1601_vm0, %v1600_v9 }
  0x3f   : > { %1441 = vmatpush3.bf16.msra.mxu0 %v1538_v62  ;;  %1449 = vmatpush3.bf16.msra.mxu1 %v1539_v63 }
  0x40   : > { %1454 = vmatprep.subr.bf16.mxu0 %v1600_v9  ;;  %1462 = vmatprep.subr.bf16.mxu1 %v1600_v9 }
  0x42   : > { %1443 = vmatmul.mubr.msk.bf16.vlgmr.msra.gmra.mrb[8].mxu0 %vm409_vm3, %v746_v3  ;;  %1451 = vmatmul.mubr.msk.bf16.vlgmr.msra.gmra.mrb[8].mxu1 %vm409_vm3, %v834_v4 }
  0x43   : > { %1455 = vmatpush3.bf16.msra.mxu0 %v1540_v5  ;;  %1463 = vmatpush3.bf16.msra.mxu1 %v1541_v6 }
  0x44   : > { %1456 = vmatprep.subr.bf16.mxu0 %v1600_v9  ;;  %1464 = vmatprep.subr.bf16.mxu1 %v1600_v9 }
  0x45   : > { %1458 = vmatprep.mubr.msk.bf16.mxu0 %vm1601_vm0, %v1600_v9  ;;  %1466 = vmatprep.mubr.msk.bf16.mxu1 %vm1601_vm0, %v1600_v9 }
  0x47   : > { %1457 = vmatpush3.bf16.msra.mxu0 %v1542_v10  ;;  %1465 = vmatpush3.bf16.msra.mxu1 %v1543_v11 }
  0x4a   : > { %1459 = vmatmul.mubr.msk.bf16.vlgmr.msra.gmra.mrb[12].mxu0 %vm409_vm3, %v922_v14  ;;  %1467 = vmatmul.mubr.msk.bf16.vlgmr.msra.gmra.mrb[12].mxu1 %vm409_vm3, %v1010_v15 }
 0x105   : > { %v447_v16 = vpop.f32.mrb[0].mxu0  ;;  %v536_v17 = vpop.f32.mrb[0].mxu1 }
 0x106   : > { %v454_v18 = vsel %vm453_vm10, %v447_v16, 0.0  ;;  %v462_v19 = vmul.f32 %v447_v16, %v447_v16  ;;  %v471_v20 = vpack.c.bf16 %v447_v16, %v447_v16  ;;  %v542_v21 = vsel %vm453_vm10, %v536_v17, 0.0  ;;  %v1412_v9 = vpop.f32.mrb[1].mxu0  ;;  %v1420_v22 = vpop.f32.mrb[1].mxu1 }
 0x107   : > { %v455_v23 = vrot.slane %v454_v18, 4  ;;  %v543_v24 = vrot.slane %v542_v21, 4  ;;  %v550_v25 = vmul.f32 %v536_v17, %v536_v17  ;;  %v559_v26 = vpack.c.bf16 %v536_v17, %v536_v17  ;;  %v450_v27 = vpop.f32.mrb[2].mxu0  ;;  %v539_v28 = vpop.f32.mrb[2].mxu1 }
 0x108   : > { %v463_v29 = vsel %vm453_vm10, %v462_v19, 0.0  ;;  %473 = vst.msk [vmem:[%s1832_s7] sm:$0xf] %vm472_vm11, %v471_v20  ;;  %v1413_v30 = vpop.f32.mrb[3].mxu0  ;;  %v1421_v31 = vpop.f32.mrb[3].mxu1 }
 0x109   : > { %v456_v32 = vadd.f32 %v455_v23, %v454_v18  ;;  %v464_v33 = vrot.slane %v463_v29, 4  ;;  %v544_v34 = vadd.f32 %v543_v24, %v542_v21  ;;  %v551_v35 = vsel %vm453_vm10, %v550_v25, 0.0  ;;  %1346 = vst.msk [vmem:[%s1832_s7 + $0x4] sm:$0xf] %vm472_vm11, %v559_v26 }
 0x10a   : > { %v552_v36 = vrot.slane %v551_v35, 4 }
 0x10b   : > { %v457_v37 = vrot.slane %v456_v32, 2  ;;  %v465_v38 = vadd.f32 %v464_v33, %v463_v29  ;;  %v545_v39 = vrot.slane %v544_v34, 2 }
 0x10c   : > { %v553_v40 = vadd.f32 %v552_v36, %v551_v35 }
 0x10d   : > { %v458_v41 = vadd.f32 %v457_v37, %v456_v32  ;;  %v466_v42 = vrot.slane %v465_v38, 2  ;;  %v546_v43 = vadd.f32 %v545_v39, %v544_v34  ;;  %v624_v44 = vpop.f32.mrb[4].mxu0  ;;  %v712_v45 = vpop.f32.mrb[4].mxu1 }
 0x10e   : > { %v554_v46 = vrot.slane %v553_v40, 2  ;;  %v630_v47 = vsel %vm453_vm10, %v624_v44, 0.0  ;;  %v638_v48 = vmul.f32 %v624_v44, %v624_v44  ;;  %v647_v49 = vpack.c.bf16 %v624_v44, %v624_v44  ;;  %v1428_v50 = vpop.f32.mrb[5].mxu0  ;;  %v1436_v51 = vpop.f32.mrb[5].mxu1 }
 0x10f   : > { %v459_v52 = vrot.slane %v458_v41, 1  ;;  %v467_v53 = vadd.f32 %v466_v42, %v465_v38  ;;  %v547_v54 = vrot.slane %v546_v43, 1  ;;  %v631_v55 = vrot.slane %v630_v47, 4  ;;  %v627_v56 = vpop.f32.mrb[6].mxu0  ;;  %v715_v57 = vpop.f32.mrb[6].mxu1 }
 0x110   : > { %v555_v58 = vadd.f32 %v554_v46, %v553_v40  ;;  %v639_v59 = vsel %vm453_vm10, %v638_v48, 0.0  ;;  %1351 = vst.msk [vmem:[%s1832_s7 + $0x8] sm:$0xf] %vm472_vm11, %v647_v49  ;;  %v718_v60 = vsel %vm453_vm10, %v712_v45, 0.0  ;;  %v726_v61 = vmul.f32 %v712_v45, %v712_v45  ;;  %v1429_v62 = vpop.f32.mrb[7].mxu0  ;;  %v1437_v63 = vpop.f32.mrb[7].mxu1 }
 0x111   : > { %v460_v0 = vadd.f32 %v459_v52, %v458_v41  ;;  %v468_v1 = vrot.slane %v467_v53, 1  ;;  %v548_v2 = vadd.f32 %v547_v54, %v546_v43  ;;  %v632_v3 = vadd.f32 %v631_v55, %v630_v47 }
 0x112   : > { %v556_v4 = vrot.slane %v555_v58, 1  ;;  %v640_v5 = vrot.slane %v639_v59, 4  ;;  %v719_v6 = vrot.slane %v718_v60, 4  ;;  %v727_v7 = vsel %vm453_vm10, %v726_v61, 0.0 }
 0x113   : > { %v469_v8 = vadd.f32 %v468_v1, %v467_v53  ;;  %v549_v10 = vadd.f32 %v548_v2, %v460_v0  ;;  %v633_v11 = vrot.slane %v632_v3, 2  ;;  %v728_v12 = vrot.slane %v727_v7, 4 }
 0x114   : > { %v557_v13 = vadd.f32 %v556_v4, %v555_v58  ;;  %v641_v14 = vadd.f32 %v640_v5, %v639_v59  ;;  %v720_v15 = vadd.f32 %v719_v6, %v718_v60  ;;  %v735_v16 = vpack.c.bf16 %v712_v45, %v712_v45 }
 0x115   : > { %v634_v17 = vadd.f32 %v633_v11, %v632_v3  ;;  %v729_v18 = vadd.f32 %v728_v12, %v727_v7  ;;  %v800_v19 = vpop.f32.mrb[8].mxu0  ;;  %v888_v20 = vpop.f32.mrb[8].mxu1 }
 0x116   : > { %v558_v21 = vadd.f32 %v557_v13, %v469_v8  ;;  %v642_v9 = vrot.slane %v641_v14, 2  ;;  %v721_v22 = vrot.slane %v720_v15, 2  ;;  %1356 = vst.msk [vmem:[%s1832_s7 + $0xc] sm:$0xf] %vm472_vm11, %v735_v16  ;;  %v806_v23 = vsel %vm453_vm10, %v800_v19, 0.0  ;;  %v1444_v24 = vpop.f32.mrb[9].mxu0 }
 0x117   : > { %v1452_v25 = vpop.f32.mrb[9].mxu1  ;;  %v635_v26 = vrot.slane %v634_v17, 1  ;;  %v730_v27 = vrot.slane %v729_v18, 2  ;;  %v807_v28 = vrot.slane %v806_v23, 4  ;;  %v814_v29 = vmul.f32 %v800_v19, %v800_v19  ;;  %v803_v30 = vpop.f32.mrb[10].mxu0 }
 0x118   : > { %v891_v31 = vpop.f32.mrb[10].mxu1  ;;  %v643_v32 = vadd.f32 %v642_v9, %v641_v14  ;;  %v722_v33 = vadd.f32 %v721_v22, %v720_v15  ;;  %v823_v34 = vpack.c.bf16 %v800_v19, %v800_v19  ;;  %v894_v35 = vsel %vm453_vm10, %v888_v20, 0.0  ;;  %v1445_v36 = vpop.f32.mrb[11].mxu0 }
 0x119   : > { %v1453_v37 = vpop.f32.mrb[11].mxu1  ;;  %v636_v38 = vadd.f32 %v635_v26, %v634_v17  ;;  %v731_v39 = vadd.f32 %v730_v27, %v729_v18  ;;  %v808_v40 = vadd.f32 %v807_v28, %v806_v23  ;;  %v815_v41 = vsel %vm453_vm10, %v814_v29, 0.0 }
 0x11a   : > { %v644_v42 = vrot.slane %v643_v32, 1  ;;  %v723_v43 = vrot.slane %v722_v33, 1  ;;  %v816_v44 = vrot.slane %v815_v41, 4  ;;  %1361 = vst.msk [vmem:[%s1832_s7 + $0x10] sm:$0xf] %vm472_vm11, %v823_v34  ;;  %v895_v45 = vrot.slane %v894_v35, 4 }
 0x11b   : > { %v637_v46 = vadd.f32 %v636_v38, %v549_v10  ;;  %v732_v47 = vrot.slane %v731_v39, 1  ;;  %v809_v48 = vrot.slane %v808_v40, 2  ;;  %v902_v49 = vmul.f32 %v888_v20, %v888_v20 }
 0x11c   : > { %v645_v50 = vadd.f32 %v644_v42, %v643_v32  ;;  %v724_v51 = vadd.f32 %v723_v43, %v722_v33  ;;  %v817_v52 = vadd.f32 %v816_v44, %v815_v41  ;;  %v896_v53 = vadd.f32 %v895_v45, %v894_v35 }
 0x11d   : > { %v733_v54 = vadd.f32 %v732_v47, %v731_v39  ;;  %v810_v55 = vadd.f32 %v809_v48, %v808_v40  ;;  %v903_v56 = vsel %vm453_vm10, %v902_v49, 0.0  ;;  %v911_v57 = vpack.c.bf16 %v888_v20, %v888_v20  ;;  %v976_v58 = vpop.f32.mrb[12].mxu0  ;;  %v1064_v59 = vpop.f32.mrb[12].mxu1 }
 0x11e   : > { %v646_v60 = vadd.f32 %v645_v50, %v558_v21  ;;  %v725_v61 = vadd.f32 %v724_v51, %v637_v46  ;;  %v818_v62 = vrot.slane %v817_v52, 2  ;;  %v897_v63 = vrot.slane %v896_v53, 2  ;;  %v1460_v0 = vpop.f32.mrb[13].mxu0  ;;  %v1468_v1 = vpop.f32.mrb[13].mxu1 }
 0x11f   : > { %v811_v2 = vrot.slane %v810_v55, 1  ;;  %v904_v3 = vrot.slane %v903_v56, 4  ;;  %1366 = vst.msk [vmem:[%s1832_s7 + $0x14] sm:$0xf] %vm472_vm11, %v911_v57  ;;  %v982_v4 = vsel %vm453_vm10, %v976_v58, 0.0  ;;  %v990_v5 = vmul.f32 %v976_v58, %v976_v58  ;;  %v979_v6 = vpop.f32.mrb[14].mxu0 }
 0x120   : > { %v1067_v7 = vpop.f32.mrb[14].mxu1  ;;  %v734_v8 = vadd.f32 %v733_v54, %v646_v60  ;;  %v819_v10 = vadd.f32 %v818_v62, %v817_v52  ;;  %v898_v11 = vadd.f32 %v897_v63, %v896_v53  ;;  %v983_v12 = vrot.slane %v982_v4, 4  ;;  %v1461_v13 = vpop.f32.mrb[15].mxu0  ;;  %v1135_v62 = vld [vmem:[%s1832_s7 + $0x4] sm:$0xf] (%p1685_p6) }
 0x121   : > { %v1469_v14 = vpop.f32.mrb[15].mxu1  ;;  %v812_v15 = vadd.f32 %v811_v2, %v810_v55  ;;  %v905_v16 = vadd.f32 %v904_v3, %v903_v56  ;;  %v991_v17 = vsel %vm453_vm10, %v990_v5, 0.0  ;;  %v999_v18 = vpack.c.bf16 %v976_v58, %v976_v58  ;;  %v1137_v63 = vld [vmem:[%s1832_s7 + $0x8] sm:$0xf] (%p1685_p6)  ;;  %v1139_v0 = vld [vmem:[%s1832_s7 + $0xc] sm:$0xf] (%p1685_p6) }
 0x122   : > { %v820_v19 = vrot.slane %v819_v10, 1  ;;  %v899_v20 = vrot.slane %v898_v11, 1  ;;  %v984_v21 = vadd.f32 %v983_v12, %v982_v4  ;;  %v992_v9 = vrot.slane %v991_v17, 4  ;;  %v1141_v1 = vld [vmem:[%s1832_s7 + $0x10] sm:$0xf] (%p1685_p6) }
 0x123   : > { %v813_v22 = vadd.f32 %v812_v15, %v725_v61  ;;  %v906_v23 = vrot.slane %v905_v16, 2  ;;  %1371 = vst.msk [vmem:[%s1832_s7 + $0x18] sm:$0xf] %vm472_vm11, %v999_v18  ;;  %v1070_v24 = vsel %vm453_vm10, %v1064_v59, 0.0  ;;  %v1078_v25 = vmul.f32 %v1064_v59, %v1064_v59  ;;  %v1133_v61 = vld [vmem:[%s1832_s7] sm:$0xf] (%p1685_p6) }
 0x124   : > { %v821_v26 = vadd.f32 %v820_v19, %v819_v10  ;;  %v900_v27 = vadd.f32 %v899_v20, %v898_v11  ;;  %v985_v28 = vrot.slane %v984_v21, 2  ;;  %v993_v29 = vadd.f32 %v992_v9, %v991_v17  ;;  %1134 = vst [vmem:[%s1117_s21] sm:$0xf] (%p1685_p6), %v1133_v61  ;;  %1136 = vst [vmem:[%s1117_s21 + $0x8] sm:$0xf] (%p1685_p6), %v1135_v62 }
 0x125   : > { %v907_v30 = vadd.f32 %v906_v23, %v905_v16  ;;  %v1071_v31 = vrot.slane %v1070_v24, 4  ;;  %v1079_v32 = vsel %vm453_vm10, %v1078_v25, 0.0  ;;  %v1087_v33 = vpack.c.bf16 %v1064_v59, %v1064_v59  ;;  %1138 = vst [vmem:[%s1117_s21 + $0x10] sm:$0xf] (%p1685_p6), %v1137_v63  ;;  %1140 = vst [vmem:[%s1117_s21 + $0x18] sm:$0xf] (%p1685_p6), %v1139_v0 }
 0x126   : > { %v822_v34 = vadd.f32 %v821_v26, %v734_v8  ;;  %v901_v35 = vadd.f32 %v900_v27, %v813_v22  ;;  %v986_v36 = vadd.f32 %v985_v28, %v984_v21  ;;  %v994_v37 = vrot.slane %v993_v29, 2  ;;  %v1143_v2 = vld [vmem:[%s1832_s7 + $0x14] sm:$0xf] (%p1685_p6)  ;;  %1142 = vst [vmem:[%s1117_s21 + $0x20] sm:$0xf] (%p1685_p6), %v1141_v1 }
 0x127   : > { %v908_v38 = vrot.slane %v907_v30, 1  ;;  %v1072_v39 = vadd.f32 %v1071_v31, %v1070_v24  ;;  %v1080_v40 = vrot.slane %v1079_v32, 4  ;;  %1376 = vst.msk [vmem:[%s1832_s7 + $0x1c] sm:$0xf] %vm472_vm11, %v1087_v33  ;;  %1144 = vst [vmem:[%s1117_s21 + $0x28] sm:$0xf] (%p1685_p6), %v1143_v2 }
 0x128   : > { %v987_v41 = vrot.slane %v986_v36, 1  ;;  %v995_v42 = vadd.f32 %v994_v37, %v993_v29 }
 0x129   : > { %v909_v43 = vadd.f32 %v908_v38, %v907_v30  ;;  %v1073_v44 = vrot.slane %v1072_v39, 2  ;;  %v1081_v45 = vadd.f32 %v1080_v40, %v1079_v32 }
 0x12a   : > { %v988_v46 = vadd.f32 %v987_v41, %v986_v36  ;;  %v996_v47 = vrot.slane %v995_v42, 1  ;;  %v1145_v3 = vld [vmem:[%s1832_s7 + $0x18] sm:$0xf] (%p1685_p6) }
 0x12b   : > { %v910_v48 = vadd.f32 %v909_v43, %v822_v34  ;;  %v1074_v49 = vadd.f32 %v1073_v44, %v1072_v39  ;;  %v1082_v50 = vrot.slane %v1081_v45, 2  ;;  %1146 = vst [vmem:[%s1117_s21 + $0x30] sm:$0xf] (%p1685_p6), %v1145_v3 }
 0x12c   : > { %v989_v51 = vadd.f32 %v988_v46, %v901_v35  ;;  %v997_v52 = vadd.f32 %v996_v47, %v995_v42 }
 0x12d   : > { %v1075_v53 = vrot.slane %v1074_v49, 1  ;;  %v1083_v54 = vadd.f32 %v1082_v50, %v1081_v45 }
 0x12e   : > { %v998_v55 = vadd.f32 %v997_v52, %v910_v48  ;;  %v1147_v4 = vld [vmem:[%s1832_s7 + $0x1c] sm:$0xf] (%p1685_p6) }
 0x12f   : > { %v1076_v56 = vadd.f32 %v1075_v53, %v1074_v49  ;;  %v1084_v57 = vrot.slane %v1083_v54, 1  ;;  %1113 = sbr.rel (!%p1685_p6) target bundleno = 310 (0x136), region = 81  ;;  %1148 = vst [vmem:[%s1117_s21 + $0x38] sm:$0xf] (%p1685_p6), %v1147_v4 }
 0x131   : > { %v1077_v58 = vadd.f32 %v1076_v56, %v989_v51  ;;  %v1085_v59 = vadd.f32 %v1084_v57, %v1083_v54 }
 0x133   : > { %v1086_v60 = vadd.f32 %v1085_v59, %v998_v55  ;;  %1091 = vst.msk [vmem:[%s362_s14] sm:$0x1] %vm1090_vm12, %v1077_v58 }
 0x135   : > { %1092 = vst.msk [vmem:[%s369_s17] sm:$0x1] %vm1090_vm12, %v1086_v60 }
 0x136 PF: > { %s17_s27 = sadd.s32 1, %s1598_s27   ;;  %s1921_s21 = smov %s1578_s22 }
 0x137   : > { %p14_p0 = scmp.ge.s32.totalorder %s17_s27, 6   ;;  %s1922_s22 = smov %s1693_s12 }
 0x138   : > { %s1923_s23 = smov %s1590_s25  ;;  %s1924_s24 = smov %s1594_s26 }
 0x139   : > { %s1925_s25 = smov %s1928_s28  ;;  %s1926_s26 = smov %s1932_s29 }
 0x13a   :  { %16 = sbr.rel (!%p14_p0) target bundleno = 4 (0x4), region = 191 }

// kernel: multi_edge_convolution.7
= control target key start
LH: loop header
LB: loop body
LE: loop exit
PB: predicated region body
PF: predicated region fallthrough
CT: control target
= control target key end

     0   :  { %8 = vsyncpa [#allocation4], 0  ;;  %s805_s0 = inlined_call_operand.vmem [shape: bf16[2,8,16,64], index: 0, kind: input, shape index: {}]   ;;  %s806_s1 = inlined_call_operand.vmem [shape: f32[1,64], index: 1, kind: input, shape index: {}]   ;;  %s807_s2 = inlined_call_operand.vmem [shape: f32[1,64], index: 2, kind: input, shape index: {}]   ;;  %s808_s3 = inlined_call_operand.hbm [shape: f32[2,16,64], index: 3, kind: output, shape index: {}]  }
   0x1   :  { %10 = vsyncpa [#allocation4 + $0x1], 0  ;;  %s650_s12 = smov 0   ;;  %s652_s13 = smov 0  }
   0x2   :  { %s654_s14 = smov 0   ;;  %s656_s15 = smov 0  }
   0x3   :  { %s658_s16 = smov 0   ;;  %s660_s17 = smov 0  }
   0x4   :  { %s662_s18 = smov 0   ;;  %s664_s19 = smov 0  }
   0x5 LB: > { %s438_s20 = sadd.s32 4294967295, %s627_s19   ;;  %s439_s21 = sadd.s32 4294967294, %s627_s19   ;;  %s627_s19 = sphi %s664_s19, %s16_s19   ;;  %s623_s18 = sphi %s662_s18, %s818_s18   ;;  %s619_s17 = sphi %s660_s17, %s817_s17   ;;  %s615_s16 = sphi %s658_s16, %s816_s16   ;;  %s611_s15 = sphi %s656_s15, %s815_s15   ;;  %s607_s14 = sphi %s654_s14, %s814_s14   ;;  %s603_s13 = sphi %s652_s13, %s813_s13   ;;  %s599_s12 = sphi %s650_s12, %s812_s12  }
   0x6   : > { %s25_s22 = sadd.s32 1, %s619_s17  ;;  %s28_s23 = sadd.s32 1, %s623_s18 }
   0x7   : > { %p26_p0 = scmp.ge.s32.totalorder %s25_s22, 2  ;;  %p44_p1 = scmp.ne.s32.totalorder %s607_s14, %s603_s13 }
   0x8   : > { %p45_p2 = scmp.eq.s32.totalorder %s627_s19, 0  ;;  %p118_p5 = scmp.eq.s32.totalorder %s438_s20, 3 }
   0x9   : > { %s820_s22 = smov (%p26_p0, %s25_s22), 0  ;;  %s822_s23 = smov (!%p26_p0, %s28_s23), %s623_s18 }
   0xa   : > { %s33_s24 = ssub.s32 %s619_s17, %s820_s22  ;;  %p702_p3 = por %p45_p2, %p44_p1 }
   0xb   : > { %p30_p4 = scmp.ge.s32.totalorder %s822_s23, 2  ;;  %p123_p6 = scmp.ne.s32.totalorder %s603_s13, %s599_s12 }
   0xc   : > { %p124_p7 = scmp.eq.s32.totalorder %s439_s21, 3  ;;  %p710_p8 = por %p118_p5, %p44_p1 }
   0xd   : > { %s824_s23 = smov (%p30_p4, %s822_s23), 0  ;;  %s37_s30 = sadd.s32 1, %s607_s14 }
   0xe   : > { %p714_p9 = por %p124_p7, %p123_p6  ;;  %s32_s28 = ssub.s32 %s623_s18, %s824_s23 }
   0xf   : > { %s34_s29 = sor.u32 %s33_s24, %s32_s28  ;;  %p441_p11 = scmp.ge.s32.totalorder %s627_s19, 4 }
  0x10   : > { %p35_p10 = scmp.eq.s32.totalorder %s34_s29, 0 }
  0x11   : > { %146 = sbr.rel (%p441_p11) target bundleno = 35 (0x23), region = 24 }
  0x12   : > { %s722_s4 = scalar_select %p35_p10, %s607_s14, %s37_s30  }
  0x18   : > { %149 = sbr.rel (!%p702_p3) target bundleno = 35 (0x23), region = 28  ;;  %s151_s5 = sand.u32 (%p702_p3), 1, %s607_s14  }
  0x19   : > { %s443_s6 = sshll.u32 (%p702_p3), %s623_s18, 4  ;;  %s442_s7 = sshll.u32 (%p702_p3), %s151_s5, 5 }
  0x1a   : > { %s155_s8 = sadd.s32 (%p702_p3), %s619_s17, %s443_s6  ;;  %s153_s21 = scalar_lea.vmem (%p702_p3), [#allocation2], %s442_s7 }
  0x1b   : > { %s444_s9 = sshll.u32 (%p702_p3), %s155_s8, 2 }
  0x1c   : > { %s157_s20 = scalar_lea.vmem (%p702_p3), %s805_s0, %s444_s9 }
  0x1d   : > { %v173_v0 = vld [vmem:[%s157_s20] sm:$0xf] (%p702_p3)  ;;  %v175_v1 = vld [vmem:[%s157_s20 + $0x8] sm:$0xf] (%p702_p3)  ;;  %v177_v2 = vld [vmem:[%s157_s20 + $0x10] sm:$0xf] (%p702_p3) }
  0x1e   : > { %174 = vst [vmem:[%s153_s21] sm:$0xf] (%p702_p3), %v173_v0  ;;  %176 = vst [vmem:[%s153_s21 + $0x4] sm:$0xf] (%p702_p3), %v175_v1  ;;  %v179_v3 = vld [vmem:[%s157_s20 + $0x18] sm:$0xf] (%p702_p3) }
  0x1f   : > { %178 = vst [vmem:[%s153_s21 + $0x8] sm:$0xf] %v177_v2  ;;  %v181_v4 = vld [vmem:[%s157_s20 + $0x20] sm:$0xf]  ;;  %v183_v5 = vld [vmem:[%s157_s20 + $0x28] sm:$0xf] }
  0x20   : > { %180 = vst [vmem:[%s153_s21 + $0xc] sm:$0xf] %v179_v3  ;;  %182 = vst [vmem:[%s153_s21 + $0x10] sm:$0xf] %v181_v4  ;;  %v185_v6 = vld [vmem:[%s157_s20 + $0x30] sm:$0xf] }
  0x21   : > { %184 = vst [vmem:[%s153_s21 + $0x14] sm:$0xf] %v183_v5  ;;  %v187_v7 = vld [vmem:[%s157_s20 + $0x38] sm:$0xf]  ;;  %186 = vst [vmem:[%s153_s21 + $0x18] sm:$0xf] %v185_v6 }
  0x22   : > { %188 = vst [vmem:[%s153_s21 + $0x1c] sm:$0xf] %v187_v7 }
  0x23 PF: > { %p445_p12 = scmp.ge.s32.totalorder %s627_s19, 1  ;;  %p226_p13 = scmp.lt.s32.totalorder %s627_s19, 5 }
  0x25   : > { %p227_p0 = pnand %p445_p12, %p226_p13 }
  0x26   : > { %s736_s24 = sand.u32 (!%p227_p0), 1, %s603_s13   ;;  %v448_v8 = vld [vmem:[%s806_s1] ss:$0 sm:$0xff] (!%p227_p0)  ;;  %s458_s8 = sshll.u32 (!%p227_p0), %s615_s16, 1  ;;  %vm340_vm8 = vcmask (!%p227_p0), 523264  }
  0x27   : > { %230 = sbr.rel (%p227_p0) target bundleno = 79 (0x4f), region = 69  ;;  %s446_s25 = sshll.u32 (!%p227_p0), %s736_s24, 5  ;;  %v449_v17 = vld [vmem:[%s807_s2] ss:$0 sm:$0xff] (!%p227_p0) }
  0x28   : > { %s235_s30 = scalar_lea.vmem (!%p227_p0), [#allocation2], %s446_s25  ;;  %s447_s7 = sshll.u32 (!%p227_p0), %s736_s24, 3 }
  0x29   : > { %v258_v9 = vld [vmem:[%s235_s30] sm:$0xff] (!%p227_p0)   ;;  %v451_v10 = vld [vmem:[%s235_s30 + $0x8] sm:$0xff] (!%p227_p0)   ;;  %v453_v11 = vld [vmem:[%s235_s30 + $0x10] sm:$0xff] (!%p227_p0)   ;;  %s354_s9 = sadd.s32 (!%p227_p0), %s611_s15, %s458_s8  ;;  %s255_s10 = scalar_lea.vmem (!%p227_p0), [#allocation3], %s447_s7 }
  0x2a   : > { %v259_v12 = vunpack.c.l.bf16 (!%p227_p0), %v258_v9  ;;  %v279_v13 = vunpack.c.h.bf16 (!%p227_p0), %v258_v9  ;;  %v288_v14 = vunpack.c.l.bf16 (!%p227_p0), %v451_v10  ;;  %v297_v15 = vunpack.c.h.bf16 (!%p227_p0), %v451_v10  ;;  %v455_v16 = vld [vmem:[%s235_s30 + $0x18] sm:$0xff] (!%p227_p0)   ;;  %s358_s11 = sshll.u32 (!%p227_p0), %s255_s10, 4  ;;  %s459_s20 = sshll.u32 (!%p227_p0), %s354_s9, 7  ;;  %s748_s11 = int_to_ptr.vmem [resolvable:$true] %s358_s11 }
  0x2b   : > { %v306_v18 = vunpack.c.l.bf16 (!%p227_p0), %v453_v11  ;;  %v315_v19 = vunpack.c.h.bf16 (!%p227_p0), %v453_v11  ;;  %v324_v20 = vunpack.c.l.bf16 (!%p227_p0), %v455_v16  ;;  %v333_v21 = vunpack.c.h.bf16 (!%p227_p0), %v455_v16  ;;  %s753_s25 = scalar_lea.hbm (!%p227_p0), %s808_s3, %s459_s20  ;;  %s343_s15 = scalar_lea.sflag (!%p227_p0), [#allocation4], %s736_s24 }
  0x2c   : > { %v266_v22 = vmul.f32 (!%p227_p0), %v448_v8, %v259_v12  ;;  %v280_v23 = vmul.f32 (!%p227_p0), %v448_v8, %v279_v13  ;;  %v289_v24 = vmul.f32 (!%p227_p0), %v448_v8, %v288_v14  ;;  %v298_v25 = vmul.f32 (!%p227_p0), %v448_v8, %v297_v15  ;;  %s533_s28 = scalar_lea.vmem (!%p227_p0), %s748_s11, 128  ;;  %s629_s29 = smov (!%p227_p0), [#allocation3]  }
  0x2d   : > { %v307_v26 = vmul.f32 (!%p227_p0), %v448_v8, %v306_v18  ;;  %v316_v27 = vmul.f32 (!%p227_p0), %v448_v8, %v315_v19  ;;  %v325_v28 = vmul.f32 (!%p227_p0), %v448_v8, %v324_v20  ;;  %v334_v35 = vmul.f32 (!%p227_p0), %v448_v8, %v333_v21  ;;  %p534_p1 = scmp.ne.s32.totalorder (!%p227_p0), %s748_s11, %s533_s28  ;;  %s537_s30 = sshll.u32 (!%p227_p0), %s629_s29, 4  ;;  %s538_s30 = int_to_ptr.vmem [resolvable:$false] %s537_s30 }
  0x2e   : > { %v273_v29 = vadd.f32 %v449_v17, %v266_v22  ;;  %v281_v30 = vadd.f32 %v449_v17, %v280_v23  ;;  %v290_v31 = vadd.f32 %v449_v17, %v289_v24  ;;  %v299_v32 = vadd.f32 %v449_v17, %v298_v25  ;;  %s539_s5 = scalar_lea.vmem %s538_s30, 256  ;;  %p540_p4 = scmp.lt.s32.totalorder %s748_s11, %s538_s30 }
  0x2f   : > { %v308_v33 = vadd.f32 %v449_v17, %v307_v26  ;;  %v317_v34 = vadd.f32 %v449_v17, %v316_v27  ;;  %v326_v43 = vadd.f32 %v449_v17, %v325_v28  ;;  %v335_v48 = vadd.f32 %v449_v17, %v334_v35  ;;  %p535_p2 = pnand %p534_p1, %p710_p8  ;;  %p541_p5 = scmp.lt.s32.totalorder %s539_s5, %s533_s28 }
  0x30   : > { %vm274_vm0 = vcmp.ge.f32.partialorder %v273_v29, 0.0  ;;  %v275_v36 = vmul.f32 0.2, %v273_v29  ;;  %vm282_vm1 = vcmp.ge.f32.partialorder %v281_v30, 0.0  ;;  %v283_v37 = vmul.f32 0.2, %v281_v30 }
  0x31   : > { %vm291_vm2 = vcmp.ge.f32.partialorder %v290_v31, 0.0  ;;  %v292_v38 = vmul.f32 0.2, %v290_v31  ;;  %vm300_vm3 = vcmp.ge.f32.partialorder %v299_v32, 0.0  ;;  %v301_v39 = vmul.f32 0.2, %v299_v32  ;;  %p536_p3 = pneg %p535_p2  ;;  %p542_p6 = por %p541_p5, %p540_p4 }
  0x32   : > { %v276_v40 = vsel %vm274_vm0, %v273_v29, %v275_v36  ;;  %v284_v41 = vsel %vm282_vm1, %v281_v30, %v283_v37  ;;  %v310_v42 = vmul.f32 0.2, %v308_v33  ;;  %vm309_vm4 = vcmp.ge.f32.partialorder %v308_v33, 0.0 }
  0x33   : > { %v285_v44 = vmax.f32 %v276_v40, %v284_v41  ;;  %v293_v45 = vsel %vm291_vm2, %v290_v31, %v292_v38  ;;  %v302_v46 = vsel %vm300_vm3, %v299_v32, %v301_v39  ;;  %v319_v47 = vmul.f32 0.2, %v317_v34  ;;  %p543_p7 = pnand %p542_p6, %p536_p3 }
  0x34   : > { %vm318_vm5 = vcmp.ge.f32.partialorder %v317_v34, 0.0  ;;  %v311_v50 = vsel %vm309_vm4, %v308_v33, %v310_v42  ;;  %v328_v51 = vmul.f32 0.2, %v326_v43  ;;  %vm327_vm6 = vcmp.ge.f32.partialorder %v326_v43, 0.0 }
  0x35   : > { %v294_v49 = vmax.f32 %v285_v44, %v293_v45  ;;  %v320_v53 = vsel %vm318_vm5, %v317_v34, %v319_v47  ;;  %v337_v54 = vmul.f32 0.2, %v335_v48  ;;  %vm336_vm7 = vcmp.ge.f32.partialorder %v335_v48, 0.0 }
  0x36   : > { %v329_v56 = vsel %vm327_vm6, %v326_v43, %v328_v51 }
  0x37   : > { %v303_v52 = vmax.f32 %v294_v49, %v302_v46  ;;  %v338_v58 = vsel %vm336_vm7, %v335_v48, %v337_v54 }
  0x39   : > { %v312_v55 = vmax.f32 %v303_v52, %v311_v50 }
  0x3b   : > { %v321_v57 = vmax.f32 %v312_v55, %v320_v53 }
  0x3d   : > { %v330_v59 = vmax.f32 %v321_v57, %v329_v56 }
  0x3f   : > { %v339_v60 = vmax.f32 %v330_v59, %v338_v58 }
  0x41   : > { %341 = vst.msk [vmem:[%s255_s10] sm:$0xff] %vm340_vm8, %v339_v60 }
  0x42   : > { %546 = shalt.err (!%p543_p7)
}
  0x43   : > { %s547_s24 = scalar_lea.hbm %s753_s25, 128  ;;  %s551_s8 = scalar_lea.hbm %s808_s3, 512 }
  0x44   : > { %p548_p10 = scmp.ne.s32.totalorder %s753_s25, %s547_s24  ;;  %p552_p13 = scmp.lt.u32.totalorder %s753_s25, %s808_s3 }
  0x45   : > { %p553_p0 = scmp.lt.u32.totalorder %s551_s8, %s547_s24  ;;  %p555_p2 = scmp.lt.u32.totalorder %s547_s24, %s753_s25 }
  0x46   : > { %p549_p11 = pnand %p548_p10, %p710_p8 }
  0x47   : > { %p554_p1 = por %p553_p0, %p552_p13 }
  0x48   : > { %p550_p12 = pneg %p549_p11 }
  0x49   : > { %p556_p3 = por %p555_p2, %p554_p1 }
  0x4b   : > { %p557_p4 = pnand %p556_p3, %p550_p12 }
  0x4d   : > { %560 = shalt.err (!%p557_p4)
}
  0x4e   : > { %462 = dma.vmem_to_hbm [thread:$0]  (%p710_p8), %s748_s11, 128, %s753_s25, %s343_s15  }
  0x4f PF: > { %p468_p5 = scmp.ge.s32.totalorder %s627_s19, 2  ;;  %s370_s20 = sand.u32 1, %s599_s12  }
  0x50   : > { %s371_s16 = scalar_lea.sflag [#allocation4], %s370_s20 }
  0x51   : > { %p465_p6 = pnand %p468_p5, %p714_p9 }
  0x53   : > { %594 = dma.done.wait (!%p465_p6), %s371_s16, 128  }
  0x54   : > { %596 = vsyncadd (!%p465_p6), %s371_s16, 4294967168  ;;  %s16_s19 = sadd.s32 1, %s627_s19   ;;  %s812_s12 = smov %s603_s13 }
  0x55   : > { %p13_p7 = scmp.ge.s32.totalorder %s16_s19, 6   ;;  %s813_s13 = smov %s607_s14 }
  0x56   : > { %s814_s14 = smov %s722_s4  ;;  %s815_s15 = smov %s619_s17 }
  0x57   : > { %s816_s16 = smov %s623_s18  ;;  %s817_s17 = smov %s820_s22 }
  0x58   : > { %s818_s18 = smov %s824_s23  ;;  %15 = sbr.rel (!%p13_p7) target bundleno = 5 (0x5), region = 120 }
  0x5f   :  { %376 = vsyncpa [#allocation4], 1 }
  0x60   :  { %378 = vsyncpa [#allocation4 + $0x1], 1 }

</bundles_post_ra>
